<compile_context>
chip_gen: v7x
topology: tpu7x:2x2x1
jax: 0.10.0
libtpu: 0.0.40
codegen_flags: <defaults>
</compile_context>

<pallas_src>
import functools
import math

import jax
import jax.numpy as jnp
from jax.experimental import pallas as pl
from jax.experimental.pallas import tpu as pltpu

EPS = 1e-5
LANE = 128


def _round_up(v, m):
    return (v + m - 1) // m * m


def _nbytes(shape, dtype):
    return math.prod(shape) * jnp.dtype(dtype).itemsize


# ---------------------------------------------------------------------------
# In-kernel helpers
# ---------------------------------------------------------------------------
def _conv3x3_acc(x_ref, w_ref, taps, rows, cpi):
    """3x3 conv as 9 accumulated MXU matmuls over shifted row-windows of the
    flattened (row-major, padded, phase-split) spatial tile resident in VMEM."""
    cpo = w_ref.shape[-1]
    acc = jnp.zeros((rows, cpo), jnp.float32)
    for t, (p, off) in enumerate(taps):
        a = x_ref[0, off:off + rows, p * cpi:(p + 1) * cpi]
        acc = acc + jnp.dot(a, w_ref[t], preferred_element_type=jnp.float32)
    return acc


def _emit_stats(st_ref, acc, valid):
    """Per-channel partial (sum, sum-of-squares) over valid output columns.
    One-pass form; finalized (mean/var/rsqrt) in the wrapper."""
    av = acc * valid
    st_ref[0, 0:1, :] = jnp.sum(av, axis=0, keepdims=True)
    st_ref[0, 1:2, :] = jnp.sum(av * acc, axis=0, keepdims=True)


# ---------------------------------------------------------------------------
# Pallas kernels
# ---------------------------------------------------------------------------
def conv1_stats_kernel(xs_ref, w1_ref, val_ref, y1_ref, s1_ref,
                       *, taps, rows, cpi):
    acc = _conv3x3_acc(xs_ref, w1_ref, taps, rows, cpi)
    _emit_stats(s1_ref, acc, val_ref[...])
    y1_ref[0] = acc.astype(y1_ref.dtype)


def conv1_ds_stats_kernel(xs_ref, w1_ref, wd_ref, val_ref,
                          y1_ref, yds_ref, s1_ref, sd_ref,
                          *, taps, ds_tap, rows, cpi):
    valid = val_ref[...]
    acc = _conv3x3_acc(xs_ref, w1_ref, taps, rows, cpi)
    _emit_stats(s1_ref, acc, valid)
    y1_ref[0] = acc.astype(y1_ref.dtype)
    # 1x1 downsample conv on the strided identity: the needed phase of the
    # input tile is already resident in VMEM -> no extra HBM read.
    p, off = ds_tap
    a = xs_ref[0, off:off + rows, p * cpi:(p + 1) * cpi]
    accd = jnp.dot(a, wd_ref[...], preferred_element_type=jnp.float32)
    _emit_stats(sd_ref, accd, valid)
    yds_ref[0] = accd.astype(yds_ref.dtype)


def bn_relu_conv2_stats_kernel(yp_ref, w2_ref, sc1_ref, sh1_ref, int_ref, val_ref,
                               y2_ref, s2_ref, h_scr, *, rows, wq2):
    # BN1 (precomputed scale/shift) + ReLU in f32; the interior mask zeroes the
    # spatial padding ring so it acts as conv zero-padding for conv2.
    h = jnp.maximum(yp_ref[0].astype(jnp.float32) * sc1_ref[...] + sh1_ref[...],
                    0.0)
    h_scr[...] = (h * int_ref[...]).astype(h_scr.dtype)

    cpo = w2_ref.shape[-1]
    acc = jnp.zeros((rows, cpo), jnp.float32)
    for t in range(9):
        kh, kw = t // 3, t % 3
        off = kh * wq2 + kw
        acc = acc + jnp.dot(h_scr[off:off + rows, :], w2_ref[t],
                            preferred_element_type=jnp.float32)
    _emit_stats(s2_ref, acc, val_ref[...])
    y2_ref[0] = acc.astype(y2_ref.dtype)


def bn2_add_relu_kernel(y2_ref, id_ref, sc2_ref, sh2_ref, o_ref):
    y = y2_ref[0].astype(jnp.float32) * sc2_ref[...] + sh2_ref[...]
    o_ref[0] = jnp.maximum(y + id_ref[0].astype(jnp.float32), 0.0)


def bn2_dsbn_add_relu_kernel(y2_ref, yds_ref, sc2_ref, sh2_ref, scd_ref, shd_ref,
                             o_ref):
    y = y2_ref[0].astype(jnp.float32) * sc2_ref[...] + sh2_ref[...]
    idv = yds_ref[0].astype(jnp.float32) * scd_ref[...] + shd_ref[...]
    o_ref[0] = jnp.maximum(y + idv, 0.0)


# ---------------------------------------------------------------------------
# BlockSpec helpers (grid = (N,): one image per step)
# ---------------------------------------------------------------------------
def _per_image_spec(shape):
    nd = len(shape)
    return pl.BlockSpec((1,) + tuple(shape[1:]),
                        lambda i, _nd=nd: (i,) + (0,) * (_nd - 1))


def _bcast_spec(shape):
    nd = len(shape)
    return pl.BlockSpec(tuple(shape), lambda i, _nd=nd: (0,) * _nd)


_PARALLEL = pltpu.CompilerParams(dimension_semantics=("parallel",))


# ---------------------------------------------------------------------------
# Plain-JAX layout glue
# ---------------------------------------------------------------------------
def _phase_split_flatten(xp, stride):
    """Space-to-depth by `stride` of a (zero-padded) NHWC image + flatten
    spatial row-major.  Returns (flat (N, R, stride*stride*C), hq, wq)."""
    n, hp, wp, c = xp.shape
    s = stride
    hq = -(-hp // s)
    wq = -(-wp // s)
    xp = jnp.pad(xp, ((0, 0), (0, hq * s - hp), (0, wq * s - wp), (0, 0)))
    xs = xp.reshape(n, hq, s, wq, s, c).transpose(0, 1, 3, 2, 4, 5)
    xs = xs.reshape(n, hq, wq, s * s * c)
    xs = jnp.pad(xs, ((0, 0), (0, 1), (0, 0), (0, 0)))     # 1 extra zero row
    return xs.reshape(n, (hq + 1) * wq, s * s * c), hq, wq


def _bn_scale_shift(partial_stats, gamma, beta, count):
    """Finalize training-mode BN from per-image partial (sum, sumsq)."""
    tot = jnp.sum(partial_stats, axis=0)                    # (2, C)
    mean = tot[0] / count
    var = jnp.maximum(tot[1] / count - mean * mean, 0.0)    # biased variance
    scale = gamma * jax.lax.rsqrt(var + EPS)
    shift = beta - mean * scale
    return scale[None, :], shift[None, :]                   # (1, C) each


# ---------------------------------------------------------------------------
# ResBasicBlock forward (Pallas)
# ---------------------------------------------------------------------------
def res_basic_block(x_nchw, params, stride=1, compute_dtype=jnp.bfloat16):
    s = int(stride)
    x = jnp.transpose(x_nchw, (0, 2, 3, 1)).astype(jnp.float32)    # NCHW -> NHWC
    n, h, w, cin = x.shape
    cout = params["w1"].shape[-1]
    cpi = _round_up(cin, LANE)
    cpo = _round_up(cout, LANE)
    ho = (h - 1) // s + 1
    wo = (w - 1) // s + 1
    m = n * ho * wo                       # BN population: N * H_out * W_out
    has_ds = (s != 1) or (cin != cout)

    # ---- channel pad (lane-dense) + spatial pad(1) + space-to-depth + flatten
    x_cp = jnp.pad(x, ((0, 0), (0, 0), (0, 0), (0, cpi - cin)))
    xp = jnp.pad(x_cp, ((0, 0), (1, 1), (1, 1), (0, 0)))
    xs_flat, hq, wq = _phase_split_flatten(xp, s)
    xs_flat = xs_flat.astype(compute_dtype)

    # conv taps in phase-split coordinates: tap (kh, kw) reads phase
    # p = (kh%s)*s + kw%s at flat-row offset (kh//s)*wq + kw//s.
    taps = tuple(((kh % s) * s + (kw % s), (kh // s) * wq + (kw // s))
                 for kh in range(3) for kw in range(3))
    ds_tap = ((1 % s) * s + (1 % s), (1 // s) * wq + (1 // s))  # = x[ho*s, wo*s]

    # ---- weights / BN params, zero-padded to lane-dense channel counts ------
    w1 = jnp.pad(params["w1"], ((0, 0), (0, 0), (0, cpi - cin), (0, cpo - cout)))
    w1 = w1.reshape(9, cpi, cpo).astype(compute_dtype)
    w2 = jnp.pad(params["w2"], ((0, 0), (0, 0), (0, cpo - cout), (0, cpo - cout)))
    w2 = w2.reshape(9, cpo, cpo).astype(compute_dtype)

    def _pad_vec(v, fill):
        v = jnp.asarray(v, jnp.float32).reshape(-1)
        return jnp.pad(v, (0, cpo - cout), constant_values=fill)

    g1, b1 = _pad_vec(params["g1"], 1.0), _pad_vec(params["b1"], 0.0)
    g2, b2 = _pad_vec(params["g2"], 1.0), _pad_vec(params["b2"], 0.0)

    # column-validity mask: columns wo..wq-1 come from the overcompute-to-row-
    # width trick and are excluded from BN statistics (and sliced off later).
    rows1 = ho * wq
    r1 = jnp.arange(rows1, dtype=jnp.int32)
    valid1 = ((r1 % wq) < wo).astype(jnp.float32)[:, None]

    st_shape = (n, 2, cpo)
    y1_shape = (n, rows1, cpo)

    # ---- kernel A: conv1 (+ fused 1x1 downsample conv) + partial BN stats ---
    flops_a = 2 * n * rows1 * cpi * cpo * (9 + (1 if has_ds else 0))
    bytes_a = (_nbytes(xs_flat.shape, compute_dtype)
               + _nbytes(w1.shape, compute_dtype)
               + (2 if has_ds else 1) * _nbytes(y1_shape, compute_dtype)
               + 2 * _nbytes(st_shape, jnp.float32))
    if has_ds:
        wd = jnp.pad(params["wd"],
                     ((0, cpi - cin), (0, cpo - cout))).astype(compute_dtype)
        gd, bd = _pad_vec(params["gd"], 1.0), _pad_vec(params["bd"], 0.0)
        kern_a = functools.partial(conv1_ds_stats_kernel, taps=taps,
                                   ds_tap=ds_tap, rows=rows1, cpi=cpi)
        y1f, ydsf, s1, sd = pl.pallas_call(
            kern_a,
            grid=(n,),
            in_specs=[_per_image_spec(xs_flat.shape), _bcast_spec(w1.shape),
                      _bcast_spec(wd.shape), _bcast_spec(valid1.shape)],
            out_specs=(_per_image_spec(y1_shape), _per_image_spec(y1_shape),
                       _per_image_spec(st_shape), _per_image_spec(st_shape)),
            out_shape=(jax.ShapeDtypeStruct(y1_shape, compute_dtype),
                       jax.ShapeDtypeStruct(y1_shape, compute_dtype),
                       jax.ShapeDtypeStruct(st_shape, jnp.float32),
                       jax.ShapeDtypeStruct(st_shape, jnp.float32)),
            compiler_params=_PARALLEL,
            cost_estimate=pl.CostEstimate(flops=flops_a, transcendentals=0,
                                          bytes_accessed=bytes_a),
        )(xs_flat, w1, wd, valid1)
    else:
        kern_a = functools.partial(conv1_stats_kernel, taps=taps,
                                   rows=rows1, cpi=cpi)
        y1f, s1 = pl.pallas_call(
            kern_a,
            grid=(n,),
            in_specs=[_per_image_spec(xs_flat.shape), _bcast_spec(w1.shape),
                      _bcast_spec(valid1.shape)],
            out_specs=(_per_image_spec(y1_shape), _per_image_spec(st_shape)),
            out_shape=(jax.ShapeDtypeStruct(y1_shape, compute_dtype),
                       jax.ShapeDtypeStruct(st_shape, jnp.float32)),
            compiler_params=_PARALLEL,
            cost_estimate=pl.CostEstimate(flops=flops_a, transcendentals=0,
                                          bytes_accessed=bytes_a),
        )(xs_flat, w1, valid1)

    # ---- BN1 finalize (tiny per-channel reduction in plain JAX) -------------
    sc1, sh1 = _bn_scale_shift(s1, g1, b1, m)

    # ---- kernel C: BN1-apply + ReLU + conv2 + partial BN stats --------------
    y1_valid = y1f.reshape(n, ho, wq, cpo)[:, :, :wo, :]
    y1p = jnp.pad(y1_valid, ((0, 0), (1, 2), (1, 1), (0, 0)))     # pad(1)+spare
    wq2 = wo + 2
    rtot2 = (ho + 3) * wq2
    y1p_flat = y1p.reshape(n, rtot2, cpo)

    rows2 = ho * wq2
    r2 = jnp.arange(rtot2, dtype=jnp.int32)
    i2, j2 = r2 // wq2, r2 % wq2
    interior = (((i2 >= 1) & (i2 <= ho) & (j2 >= 1) & (j2 <= wo))
                .astype(jnp.float32))[:, None]
    rv = jnp.arange(rows2, dtype=jnp.int32)
    valid2 = ((rv % wq2) < wo).astype(jnp.float32)[:, None]

    y2_shape = (n, rows2, cpo)
    flops_c = 2 * n * rows2 * cpo * cpo * 9
    bytes_c = (_nbytes(y1p_flat.shape, compute_dtype)
               + _nbytes(w2.shape, compute_dtype)
               + _nbytes(y2_shape, compute_dtype)
               + _nbytes(st_shape, jnp.float32))
    kern_c = functools.partial(bn_relu_conv2_stats_kernel, rows=rows2, wq2=wq2)
    y2f, s2 = pl.pallas_call(
        kern_c,
        grid=(n,),
        in_specs=[_per_image_spec(y1p_flat.shape), _bcast_spec(w2.shape),
                  _bcast_spec(sc1.shape), _bcast_spec(sh1.shape),
                  _bcast_spec(interior.shape), _bcast_spec(valid2.shape)],
        out_specs=(_per_image_spec(y2_shape), _per_image_spec(st_shape)),
        out_shape=(jax.ShapeDtypeStruct(y2_shape, compute_dtype),
                   jax.ShapeDtypeStruct(st_shape, jnp.float32)),
        scratch_shapes=[pltpu.VMEM((rtot2, cpo), compute_dtype)],
        compiler_params=_PARALLEL,
        cost_estimate=pl.CostEstimate(flops=flops_c, transcendentals=0,
                                      bytes_accessed=bytes_c),
    )(y1p_flat, w2, sc1, sh1, interior, valid2)

    # ---- kernel D: BN2 (+ downsample BN) apply + residual add + ReLU --------
    sc2, sh2 = _bn_scale_shift(s2, g2, b2, m)
    y2_valid = y2f.reshape(n, ho, wq2, cpo)[:, :, :wo, :].reshape(n, ho * wo, cpo)
    o_shape = (n, ho * wo, cpo)

    if has_ds:
        scd, shd = _bn_scale_shift(sd, gd, bd, m)
        yds_valid = ydsf.reshape(n, ho, wq, cpo)[:, :, :wo, :]
        yds_valid = yds_valid.reshape(n, ho * wo, cpo)
        out_flat = pl.pallas_call(
            bn2_dsbn_add_relu_kernel,
            grid=(n,),
            in_specs=[_per_image_spec(y2_valid.shape),
                      _per_image_spec(yds_valid.shape),
                      _bcast_spec(sc2.shape), _bcast_spec(sh2.shape),
                      _bcast_spec(scd.shape), _bcast_spec(shd.shape)],
            out_specs=_per_image_spec(o_shape),
            out_shape=jax.ShapeDtypeStruct(o_shape, jnp.float32),
            compiler_params=_PARALLEL,
        )(y2_valid, yds_valid, sc2, sh2, scd, shd)
    else:
        x_id = x_cp.reshape(n, h * w, cpi)           # cpi == cpo here
        out_flat = pl.pallas_call(
            bn2_add_relu_kernel,
            grid=(n,),
            in_specs=[_per_image_spec(y2_valid.shape),
                      _per_image_spec(x_id.shape),
                      _bcast_spec(sc2.shape), _bcast_spec(sh2.shape)],
            out_specs=_per_image_spec(o_shape),
            out_shape=jax.ShapeDtypeStruct(o_shape, jnp.float32),
            compiler_params=_PARALLEL,
        )(y2_valid, x_id, sc2, sh2)

    out = out_flat.reshape(n, ho, wo, cpo)[:, :, :, :cout]
    return jnp.transpose(out, (0, 3, 1, 2))           # back to NCHW


# ---------------------------------------------------------------------------
# Pure-JAX reference (for correctness check)
# ---------------------------------------------------------------------------
def res_basic_block_ref(x_nchw, params, stride=1):
    x = jnp.transpose(x_nchw, (0, 2, 3, 1)).astype(jnp.float32)

    def conv(v, w, s, pad):
        return jax.lax.conv_general_dilated(
            v, w, (s, s), pad, dimension_numbers=("NHWC", "HWIO", "NHWC"))

    def bn(y, g, b):
        mean = jnp.mean(y, axis=(0, 1, 2), keepdims=True)
        var = jnp.mean((y - mean) ** 2, axis=(0, 1, 2), keepdims=True)
        return (y - mean) * jax.lax.rsqrt(var + EPS) * g + b

    cin, cout = x.shape[-1], params["w1"].shape[-1]
    h = jax.nn.relu(bn(conv(x, params["w1"], stride, ((1, 1), (1, 1))),
                       params["g1"], params["b1"]))
    h = bn(conv(h, params["w2"], 1, ((1, 1), (1, 1))), params["g2"], params["b2"])
    if stride != 1 or cin != cout:
        ident = bn(conv(x, params["wd"][None, None], stride, ((0, 0), (0, 0))),
                   params["gd"], params["bd"])
    else:
        ident = x
    return jnp.transpose(jax.nn.relu(h + ident), (0, 3, 1, 2))


# ---------------------------------------------------------------------------
if __name__ == "__main__":
    def make_params(key, cin, cout, with_ds):
        ks = jax.random.split(key, 3)
        p = {
            "w1": jax.random.normal(ks[0], (3, 3, cin, cout), jnp.float32) * 0.1,
            "g1": jnp.ones((cout,), jnp.float32),
            "b1": jnp.zeros((cout,), jnp.float32),
            "w2": jax.random.normal(ks[1], (3, 3, cout, cout), jnp.float32) * 0.1,
            "g2": jnp.ones((cout,), jnp.float32),
            "b2": jnp.zeros((cout,), jnp.float32),
        }
        if with_ds:
            p["wd"] = jax.random.normal(ks[2], (cin, cout), jnp.float32) * 0.1
            p["gd"] = jnp.ones((cout,), jnp.float32)
            p["bd"] = jnp.zeros((cout,), jnp.float32)
        return p

    def check(x, params, stride, expect_shape):
        fwd = jax.jit(lambda v: res_basic_block(v, params, stride=stride))
        out = jax.block_until_ready(fwd(x))
        ref = res_basic_block_ref(x, params, stride=stride)
        assert out.shape == expect_shape, out.shape
        ok = bool(jnp.allclose(out, ref, atol=1e-1, rtol=1e-1)
                  and (jnp.mean(jnp.abs(out - ref)) < 5e-2))
        if not ok:
            raise AssertionError(
                "Pallas ResBasicBlock does not match reference "
                f"(max abs err {float(jnp.max(jnp.abs(out - ref))):.4f})")

    key = jax.random.PRNGKey(0)
    k1, k2, k3, k4 = jax.random.split(key, 4)

    # 1) stride-2 block with channel change -> downsample (1x1 conv + BN) path
    N, Cin, Cout, H, W = 2, 4, 8, 16, 16
    x1 = jax.random.normal(k1, (N, Cin, H, W), jnp.float32)
    p1 = make_params(k2, Cin, Cout, with_ds=True)
    check(x1, p1, stride=2, expect_shape=(N, Cout, H // 2, W // 2))

    # 2) stride-1 block, in_channels == out_channels -> plain identity path
    C = 8
    x2 = jax.random.normal(k3, (N, C, H, W), jnp.float32)
    p2 = make_params(k4, C, C, with_ds=False)
    check(x2, p2, stride=1, expect_shape=(N, C, H, W))

    print("KERNEL_OK")
</pallas_src>

<mosaic_0001>
module attributes {stable_mosaic.version = 11 : i64} {
  func.func @conv1_ds_stats_kernel(%arg0: i32, %arg1: memref<1x90x512xbf16, #tpu.memory_space<vmem>>, %arg2: memref<9x128x128xbf16, #tpu.memory_space<vmem>>, %arg3: memref<128x128xbf16, #tpu.memory_space<vmem>>, %arg4: memref<72x1xf32, #tpu.memory_space<vmem>>, %arg5: memref<1x72x128xbf16, #tpu.memory_space<vmem>>, %arg6: memref<1x72x128xbf16, #tpu.memory_space<vmem>>, %arg7: memref<1x2x128xf32, #tpu.memory_space<vmem>>, %arg8: memref<1x2x128xf32, #tpu.memory_space<vmem>>) attributes {dimension_semantics = [#tpu.dimension_semantics<parallel>], iteration_bounds = array<i64: 2>, scalar_prefetch = 0 : i64, scratch_operands = 0 : i64, tpu.core_type = #tpu.core_type<tc>, window_params = [{transform_indices = @transform_0, window_bounds = array<i64: 1, 90, 512>}, {pipeline_mode = #tpu.pipeline_mode<synchronous>, transform_indices = @transform_1, window_bounds = array<i64: 9, 128, 128>}, {pipeline_mode = #tpu.pipeline_mode<synchronous>, transform_indices = @transform_2, window_bounds = array<i64: 128, 128>}, {pipeline_mode = #tpu.pipeline_mode<synchronous>, transform_indices = @transform_3, window_bounds = array<i64: 72, 1>}, {transform_indices = @transform_4, window_bounds = array<i64: 1, 72, 128>}, {transform_indices = @transform_5, window_bounds = array<i64: 1, 72, 128>}, {transform_indices = @transform_6, window_bounds = array<i64: 1, 2, 128>}, {transform_indices = @transform_7, window_bounds = array<i64: 1, 2, 128>}]} {
    %c0 = arith.constant 0 : index
    %c0_0 = arith.constant 0 : index
    %0 = vector.load %arg4[%c0, %c0_0] : memref<72x1xf32, #tpu.memory_space<vmem>>, vector<72x1xf32>
    %cst = arith.constant 0.000000e+00 : f32
    %1 = vector.broadcast %cst : f32 to vector<72x128xf32>
    %c0_1 = arith.constant 0 : index
    %c0_2 = arith.constant 0 : index
    %c0_3 = arith.constant 0 : index
    %2 = vector.load %arg1[%c0_1, %c0_2, %c0_3] : memref<1x90x512xbf16, #tpu.memory_space<vmem>>, vector<1x72x128xbf16>
    %3 = vector.shape_cast %2 : vector<1x72x128xbf16> to vector<72x128xbf16>
    %c0_4 = arith.constant 0 : index
    %c0_5 = arith.constant 0 : index
    %c0_6 = arith.constant 0 : index
    %4 = vector.load %arg2[%c0_4, %c0_5, %c0_6] : memref<9x128x128xbf16, #tpu.memory_space<vmem>>, vector<1x128x128xbf16>
    %5 = vector.shape_cast %4 : vector<1x128x128xbf16> to vector<128x128xbf16>
    %cst_7 = arith.constant dense<0.000000e+00> : vector<72x128xf32>
    %6 = tpu.matmul %3, %5, %cst_7 {dimension_numbers = #tpu.dot_dimension_numbers<[1], [0], [0], [1], [0, 0, 1, 1], [], []>} : vector<72x128xbf16>, vector<128x128xbf16>, vector<72x128xf32> -> vector<72x128xf32>
    %7 = arith.addf %1, %6 : vector<72x128xf32>
    %c0_8 = arith.constant 0 : index
    %c0_9 = arith.constant 0 : index
    %c128 = arith.constant 128 : index
    %8 = vector.load %arg1[%c0_8, %c0_9, %c128] : memref<1x90x512xbf16, #tpu.memory_space<vmem>>, vector<1x72x128xbf16>
    %9 = vector.shape_cast %8 : vector<1x72x128xbf16> to vector<72x128xbf16>
    %c1 = arith.constant 1 : index
    %c0_10 = arith.constant 0 : index
    %c0_11 = arith.constant 0 : index
    %10 = vector.load %arg2[%c1, %c0_10, %c0_11] : memref<9x128x128xbf16, #tpu.memory_space<vmem>>, vector<1x128x128xbf16>
    %11 = vector.shape_cast %10 : vector<1x128x128xbf16> to vector<128x128xbf16>
    %cst_12 = arith.constant dense<0.000000e+00> : vector<72x128xf32>
    %12 = tpu.matmul %9, %11, %cst_12 {dimension_numbers = #tpu.dot_dimension_numbers<[1], [0], [0], [1], [0, 0, 1, 1], [], []>} : vector<72x128xbf16>, vector<128x128xbf16>, vector<72x128xf32> -> vector<72x128xf32>
    %13 = arith.addf %7, %12 : vector<72x128xf32>
    %c0_13 = arith.constant 0 : index
    %c1_14 = arith.constant 1 : index
    %c0_15 = arith.constant 0 : index
    %14 = vector.load %arg1[%c0_13, %c1_14, %c0_15] : memref<1x90x512xbf16, #tpu.memory_space<vmem>>, vector<1x72x128xbf16>
    %15 = vector.shape_cast %14 : vector<1x72x128xbf16> to vector<72x128xbf16>
    %c2 = arith.constant 2 : index
    %c0_16 = arith.constant 0 : index
    %c0_17 = arith.constant 0 : index
    %16 = vector.load %arg2[%c2, %c0_16, %c0_17] : memref<9x128x128xbf16, #tpu.memory_space<vmem>>, vector<1x128x128xbf16>
    %17 = vector.shape_cast %16 : vector<1x128x128xbf16> to vector<128x128xbf16>
    %cst_18 = arith.constant dense<0.000000e+00> : vector<72x128xf32>
    %18 = tpu.matmul %15, %17, %cst_18 {dimension_numbers = #tpu.dot_dimension_numbers<[1], [0], [0], [1], [0, 0, 1, 1], [], []>} : vector<72x128xbf16>, vector<128x128xbf16>, vector<72x128xf32> -> vector<72x128xf32>
    %19 = arith.addf %13, %18 : vector<72x128xf32>
    %c0_19 = arith.constant 0 : index
    %c0_20 = arith.constant 0 : index
    %c256 = arith.constant 256 : index
    %20 = vector.load %arg1[%c0_19, %c0_20, %c256] : memref<1x90x512xbf16, #tpu.memory_space<vmem>>, vector<1x72x128xbf16>
    %21 = vector.shape_cast %20 : vector<1x72x128xbf16> to vector<72x128xbf16>
    %c3 = arith.constant 3 : index
    %c0_21 = arith.constant 0 : index
    %c0_22 = arith.constant 0 : index
    %22 = vector.load %arg2[%c3, %c0_21, %c0_22] : memref<9x128x128xbf16, #tpu.memory_space<vmem>>, vector<1x128x128xbf16>
    %23 = vector.shape_cast %22 : vector<1x128x128xbf16> to vector<128x128xbf16>
    %cst_23 = arith.constant dense<0.000000e+00> : vector<72x128xf32>
    %24 = tpu.matmul %21, %23, %cst_23 {dimension_numbers = #tpu.dot_dimension_numbers<[1], [0], [0], [1], [0, 0, 1, 1], [], []>} : vector<72x128xbf16>, vector<128x128xbf16>, vector<72x128xf32> -> vector<72x128xf32>
    %25 = arith.addf %19, %24 : vector<72x128xf32>
    %c0_24 = arith.constant 0 : index
    %c0_25 = arith.constant 0 : index
    %c384 = arith.constant 384 : index
    %26 = vector.load %arg1[%c0_24, %c0_25, %c384] : memref<1x90x512xbf16, #tpu.memory_space<vmem>>, vector<1x72x128xbf16>
    %27 = vector.shape_cast %26 : vector<1x72x128xbf16> to vector<72x128xbf16>
    %c4 = arith.constant 4 : index
    %c0_26 = arith.constant 0 : index
    %c0_27 = arith.constant 0 : index
    %28 = vector.load %arg2[%c4, %c0_26, %c0_27] : memref<9x128x128xbf16, #tpu.memory_space<vmem>>, vector<1x128x128xbf16>
    %29 = vector.shape_cast %28 : vector<1x128x128xbf16> to vector<128x128xbf16>
    %cst_28 = arith.constant dense<0.000000e+00> : vector<72x128xf32>
    %30 = tpu.matmul %27, %29, %cst_28 {dimension_numbers = #tpu.dot_dimension_numbers<[1], [0], [0], [1], [0, 0, 1, 1], [], []>} : vector<72x128xbf16>, vector<128x128xbf16>, vector<72x128xf32> -> vector<72x128xf32>
    %31 = arith.addf %25, %30 : vector<72x128xf32>
    %c0_29 = arith.constant 0 : index
    %c1_30 = arith.constant 1 : index
    %c256_31 = arith.constant 256 : index
    %32 = vector.load %arg1[%c0_29, %c1_30, %c256_31] : memref<1x90x512xbf16, #tpu.memory_space<vmem>>, vector<1x72x128xbf16>
    %33 = vector.shape_cast %32 : vector<1x72x128xbf16> to vector<72x128xbf16>
    %c5 = arith.constant 5 : index
    %c0_32 = arith.constant 0 : index
    %c0_33 = arith.constant 0 : index
    %34 = vector.load %arg2[%c5, %c0_32, %c0_33] : memref<9x128x128xbf16, #tpu.memory_space<vmem>>, vector<1x128x128xbf16>
    %35 = vector.shape_cast %34 : vector<1x128x128xbf16> to vector<128x128xbf16>
    %cst_34 = arith.constant dense<0.000000e+00> : vector<72x128xf32>
    %36 = tpu.matmul %33, %35, %cst_34 {dimension_numbers = #tpu.dot_dimension_numbers<[1], [0], [0], [1], [0, 0, 1, 1], [], []>} : vector<72x128xbf16>, vector<128x128xbf16>, vector<72x128xf32> -> vector<72x128xf32>
    %37 = arith.addf %31, %36 : vector<72x128xf32>
    %c0_35 = arith.constant 0 : index
    %c9 = arith.constant 9 : index
    %c0_36 = arith.constant 0 : index
    %38 = vector.load %arg1[%c0_35, %c9, %c0_36] : memref<1x90x512xbf16, #tpu.memory_space<vmem>>, vector<1x72x128xbf16>
    %39 = vector.shape_cast %38 : vector<1x72x128xbf16> to vector<72x128xbf16>
    %c6 = arith.constant 6 : index
    %c0_37 = arith.constant 0 : index
    %c0_38 = arith.constant 0 : index
    %40 = vector.load %arg2[%c6, %c0_37, %c0_38] : memref<9x128x128xbf16, #tpu.memory_space<vmem>>, vector<1x128x128xbf16>
    %41 = vector.shape_cast %40 : vector<1x128x128xbf16> to vector<128x128xbf16>
    %cst_39 = arith.constant dense<0.000000e+00> : vector<72x128xf32>
    %42 = tpu.matmul %39, %41, %cst_39 {dimension_numbers = #tpu.dot_dimension_numbers<[1], [0], [0], [1], [0, 0, 1, 1], [], []>} : vector<72x128xbf16>, vector<128x128xbf16>, vector<72x128xf32> -> vector<72x128xf32>
    %43 = arith.addf %37, %42 : vector<72x128xf32>
    %c0_40 = arith.constant 0 : index
    %c9_41 = arith.constant 9 : index
    %c128_42 = arith.constant 128 : index
    %44 = vector.load %arg1[%c0_40, %c9_41, %c128_42] : memref<1x90x512xbf16, #tpu.memory_space<vmem>>, vector<1x72x128xbf16>
    %45 = vector.shape_cast %44 : vector<1x72x128xbf16> to vector<72x128xbf16>
    %c7 = arith.constant 7 : index
    %c0_43 = arith.constant 0 : index
    %c0_44 = arith.constant 0 : index
    %46 = vector.load %arg2[%c7, %c0_43, %c0_44] : memref<9x128x128xbf16, #tpu.memory_space<vmem>>, vector<1x128x128xbf16>
    %47 = vector.shape_cast %46 : vector<1x128x128xbf16> to vector<128x128xbf16>
    %cst_45 = arith.constant dense<0.000000e+00> : vector<72x128xf32>
    %48 = tpu.matmul %45, %47, %cst_45 {dimension_numbers = #tpu.dot_dimension_numbers<[1], [0], [0], [1], [0, 0, 1, 1], [], []>} : vector<72x128xbf16>, vector<128x128xbf16>, vector<72x128xf32> -> vector<72x128xf32>
    %49 = arith.addf %43, %48 : vector<72x128xf32>
    %c0_46 = arith.constant 0 : index
    %c10 = arith.constant 10 : index
    %c0_47 = arith.constant 0 : index
    %50 = vector.load %arg1[%c0_46, %c10, %c0_47] : memref<1x90x512xbf16, #tpu.memory_space<vmem>>, vector<1x72x128xbf16>
    %51 = vector.shape_cast %50 : vector<1x72x128xbf16> to vector<72x128xbf16>
    %c8 = arith.constant 8 : index
    %c0_48 = arith.constant 0 : index
    %c0_49 = arith.constant 0 : index
    %52 = vector.load %arg2[%c8, %c0_48, %c0_49] : memref<9x128x128xbf16, #tpu.memory_space<vmem>>, vector<1x128x128xbf16>
    %53 = vector.shape_cast %52 : vector<1x128x128xbf16> to vector<128x128xbf16>
    %cst_50 = arith.constant dense<0.000000e+00> : vector<72x128xf32>
    %54 = tpu.matmul %51, %53, %cst_50 {dimension_numbers = #tpu.dot_dimension_numbers<[1], [0], [0], [1], [0, 0, 1, 1], [], []>} : vector<72x128xbf16>, vector<128x128xbf16>, vector<72x128xf32> -> vector<72x128xf32>
    %55 = arith.addf %49, %54 : vector<72x128xf32>
    %56 = vector.broadcast %0 : vector<72x1xf32> to vector<72x128xf32>
    %57 = arith.mulf %55, %56 : vector<72x128xf32>
    %cst_51 = arith.constant dense<0.000000e+00> : vector<128xf32>
    %58 = vector.multi_reduction <add>, %57, %cst_51 [0] : vector<72x128xf32> to vector<128xf32>
    %59 = vector.shape_cast %58 : vector<128xf32> to vector<1x128xf32>
    %c0_52 = arith.constant 0 : index
    %c0_53 = arith.constant 0 : index
    %c0_54 = arith.constant 0 : index
    %60 = vector.load %arg7[%c0_52, %c0_53, %c0_54] : memref<1x2x128xf32, #tpu.memory_space<vmem>>, vector<1x1x128xf32>
    %61 = vector.shape_cast %60 : vector<1x1x128xf32> to vector<1x128xf32>
    %62 = vector.shape_cast %59 : vector<1x128xf32> to vector<1x1x128xf32>
    tpu.vector_store %arg7[%c0_52, %c0_53, %c0_54], %62 {strides = array<i32>} : memref<1x2x128xf32, #tpu.memory_space<vmem>>, vector<1x1x128xf32>,
    %63 = arith.mulf %57, %55 : vector<72x128xf32>
    %cst_55 = arith.constant dense<0.000000e+00> : vector<128xf32>
    %64 = vector.multi_reduction <add>, %63, %cst_55 [0] : vector<72x128xf32> to vector<128xf32>
    %65 = vector.shape_cast %64 : vector<128xf32> to vector<1x128xf32>
    %c0_56 = arith.constant 0 : index
    %c1_57 = arith.constant 1 : index
    %c0_58 = arith.constant 0 : index
    %66 = vector.load %arg7[%c0_56, %c1_57, %c0_58] : memref<1x2x128xf32, #tpu.memory_space<vmem>>, vector<1x1x128xf32>
    %67 = vector.shape_cast %66 : vector<1x1x128xf32> to vector<1x128xf32>
    %68 = vector.shape_cast %65 : vector<1x128xf32> to vector<1x1x128xf32>
    tpu.vector_store %arg7[%c0_56, %c1_57, %c0_58], %68 {strides = array<i32>} : memref<1x2x128xf32, #tpu.memory_space<vmem>>, vector<1x1x128xf32>,
    %69 = arith.truncf %55 : vector<72x128xf32> to vector<72x128xbf16>
    %c0_59 = arith.constant 0 : index
    %c0_60 = arith.constant 0 : index
    %c0_61 = arith.constant 0 : index
    %70 = vector.load %arg5[%c0_59, %c0_60, %c0_61] : memref<1x72x128xbf16, #tpu.memory_space<vmem>>, vector<1x72x128xbf16>
    %71 = vector.shape_cast %70 : vector<1x72x128xbf16> to vector<72x128xbf16>
    %72 = vector.shape_cast %69 : vector<72x128xbf16> to vector<1x72x128xbf16>
    tpu.vector_store %arg5[%c0_59, %c0_60, %c0_61], %72 {strides = array<i32>} : memref<1x72x128xbf16, #tpu.memory_space<vmem>>, vector<1x72x128xbf16>,
    %c0_62 = arith.constant 0 : index
    %c0_63 = arith.constant 0 : index
    %c384_64 = arith.constant 384 : index
    %73 = vector.load %arg1[%c0_62, %c0_63, %c384_64] : memref<1x90x512xbf16, #tpu.memory_space<vmem>>, vector<1x72x128xbf16>
    %74 = vector.shape_cast %73 : vector<1x72x128xbf16> to vector<72x128xbf16>
    %c0_65 = arith.constant 0 : index
    %c0_66 = arith.constant 0 : index
    %75 = vector.load %arg3[%c0_65, %c0_66] : memref<128x128xbf16, #tpu.memory_space<vmem>>, vector<128x128xbf16>
    %cst_67 = arith.constant dense<0.000000e+00> : vector<72x128xf32>
    %76 = tpu.matmul %74, %75, %cst_67 {dimension_numbers = #tpu.dot_dimension_numbers<[1], [0], [0], [1], [0, 0, 1, 1], [], []>} : vector<72x128xbf16>, vector<128x128xbf16>, vector<72x128xf32> -> vector<72x128xf32>
    %77 = vector.broadcast %0 : vector<72x1xf32> to vector<72x128xf32>
    %78 = arith.mulf %76, %77 : vector<72x128xf32>
    %cst_68 = arith.constant dense<0.000000e+00> : vector<128xf32>
    %79 = vector.multi_reduction <add>, %78, %cst_68 [0] : vector<72x128xf32> to vector<128xf32>
    %80 = vector.shape_cast %79 : vector<128xf32> to vector<1x128xf32>
    %c0_69 = arith.constant 0 : index
    %c0_70 = arith.constant 0 : index
    %c0_71 = arith.constant 0 : index
    %81 = vector.load %arg8[%c0_69, %c0_70, %c0_71] : memref<1x2x128xf32, #tpu.memory_space<vmem>>, vector<1x1x128xf32>
    %82 = vector.shape_cast %81 : vector<1x1x128xf32> to vector<1x128xf32>
    %83 = vector.shape_cast %80 : vector<1x128xf32> to vector<1x1x128xf32>
    tpu.vector_store %arg8[%c0_69, %c0_70, %c0_71], %83 {strides = array<i32>} : memref<1x2x128xf32, #tpu.memory_space<vmem>>, vector<1x1x128xf32>,
    %84 = arith.mulf %78, %76 : vector<72x128xf32>
    %cst_72 = arith.constant dense<0.000000e+00> : vector<128xf32>
    %85 = vector.multi_reduction <add>, %84, %cst_72 [0] : vector<72x128xf32> to vector<128xf32>
    %86 = vector.shape_cast %85 : vector<128xf32> to vector<1x128xf32>
    %c0_73 = arith.constant 0 : index
    %c1_74 = arith.constant 1 : index
    %c0_75 = arith.constant 0 : index
    %87 = vector.load %arg8[%c0_73, %c1_74, %c0_75] : memref<1x2x128xf32, #tpu.memory_space<vmem>>, vector<1x1x128xf32>
    %88 = vector.shape_cast %87 : vector<1x1x128xf32> to vector<1x128xf32>
    %89 = vector.shape_cast %86 : vector<1x128xf32> to vector<1x1x128xf32>
    tpu.vector_store %arg8[%c0_73, %c1_74, %c0_75], %89 {strides = array<i32>} : memref<1x2x128xf32, #tpu.memory_space<vmem>>, vector<1x1x128xf32>,
    %90 = arith.truncf %76 : vector<72x128xf32> to vector<72x128xbf16>
    %c0_76 = arith.constant 0 : index
    %c0_77 = arith.constant 0 : index
    %c0_78 = arith.constant 0 : index
    %91 = vector.load %arg6[%c0_76, %c0_77, %c0_78] : memref<1x72x128xbf16, #tpu.memory_space<vmem>>, vector<1x72x128xbf16>
    %92 = vector.shape_cast %91 : vector<1x72x128xbf16> to vector<72x128xbf16>
    %93 = vector.shape_cast %90 : vector<72x128xbf16> to vector<1x72x128xbf16>
    tpu.vector_store %arg6[%c0_76, %c0_77, %c0_78], %93 {strides = array<i32>} : memref<1x72x128xbf16, #tpu.memory_space<vmem>>, vector<1x72x128xbf16>,
    return
  }
  func.func @transform_0(%arg0: i32) -> (i32, i32, i32) {
    %c0_i32 = arith.constant 0 : i32
    %c0_i32_0 = arith.constant 0 : i32
    %c0_i32_1 = arith.constant 0 : i32
    return %arg0, %c0_i32, %c0_i32_0 : i32, i32, i32
  }
  func.func @transform_1(%arg0: i32) -> (i32, i32, i32) {
    %c0_i32 = arith.constant 0 : i32
    %c0_i32_0 = arith.constant 0 : i32
    %c0_i32_1 = arith.constant 0 : i32
    %c0_i32_2 = arith.constant 0 : i32
    return %c0_i32, %c0_i32_0, %c0_i32_1 : i32, i32, i32
  }
  func.func @transform_2(%arg0: i32) -> (i32, i32) {
    %c0_i32 = arith.constant 0 : i32
    %c0_i32_0 = arith.constant 0 : i32
    %c0_i32_1 = arith.constant 0 : i32
    return %c0_i32, %c0_i32_0 : i32, i32
  }
  func.func @transform_3(%arg0: i32) -> (i32, i32) {
    %c0_i32 = arith.constant 0 : i32
    %c0_i32_0 = arith.constant 0 : i32
    %c0_i32_1 = arith.constant 0 : i32
    return %c0_i32, %c0_i32_0 : i32, i32
  }
  func.func @transform_4(%arg0: i32) -> (i32, i32, i32) {
    %c0_i32 = arith.constant 0 : i32
    %c0_i32_0 = arith.constant 0 : i32
    %c0_i32_1 = arith.constant 0 : i32
    return %arg0, %c0_i32, %c0_i32_0 : i32, i32, i32
  }
  func.func @transform_5(%arg0: i32) -> (i32, i32, i32) {
    %c0_i32 = arith.constant 0 : i32
    %c0_i32_0 = arith.constant 0 : i32
    %c0_i32_1 = arith.constant 0 : i32
    return %arg0, %c0_i32, %c0_i32_0 : i32, i32, i32
  }
  func.func @transform_6(%arg0: i32) -> (i32, i32, i32) {
    %c0_i32 = arith.constant 0 : i32
    %c0_i32_0 = arith.constant 0 : i32
    %c0_i32_1 = arith.constant 0 : i32
    return %arg0, %c0_i32, %c0_i32_0 : i32, i32, i32
  }
  func.func @transform_7(%arg0: i32) -> (i32, i32, i32) {
    %c0_i32 = arith.constant 0 : i32
    %c0_i32_0 = arith.constant 0 : i32
    %c0_i32_1 = arith.constant 0 : i32
    return %arg0, %c0_i32, %c0_i32_0 : i32, i32, i32
  }
}

module attributes {stable_mosaic.version = 11 : i64} {
  func.func @bn_relu_conv2_stats_kernel(%arg0: i32, %arg1: memref<1x110x128xbf16, #tpu.memory_space<vmem>>, %arg2: memref<9x128x128xbf16, #tpu.memory_space<vmem>>, %arg3: memref<1x128xf32, #tpu.memory_space<vmem>>, %arg4: memref<1x128xf32, #tpu.memory_space<vmem>>, %arg5: memref<110x1xf32, #tpu.memory_space<vmem>>, %arg6: memref<80x1xf32, #tpu.memory_space<vmem>>, %arg7: memref<1x80x128xbf16, #tpu.memory_space<vmem>>, %arg8: memref<1x2x128xf32, #tpu.memory_space<vmem>>, %arg9: memref<110x128xbf16, #tpu.memory_space<vmem>>) attributes {dimension_semantics = [#tpu.dimension_semantics<parallel>], iteration_bounds = array<i64: 2>, scalar_prefetch = 0 : i64, scratch_operands = 1 : i64, tpu.core_type = #tpu.core_type<tc>, window_params = [{transform_indices = @transform_0, window_bounds = array<i64: 1, 110, 128>}, {pipeline_mode = #tpu.pipeline_mode<synchronous>, transform_indices = @transform_1, window_bounds = array<i64: 9, 128, 128>}, {pipeline_mode = #tpu.pipeline_mode<synchronous>, transform_indices = @transform_2, window_bounds = array<i64: 1, 128>}, {pipeline_mode = #tpu.pipeline_mode<synchronous>, transform_indices = @transform_3, window_bounds = array<i64: 1, 128>}, {pipeline_mode = #tpu.pipeline_mode<synchronous>, transform_indices = @transform_4, window_bounds = array<i64: 110, 1>}, {pipeline_mode = #tpu.pipeline_mode<synchronous>, transform_indices = @transform_5, window_bounds = array<i64: 80, 1>}, {transform_indices = @transform_6, window_bounds = array<i64: 1, 80, 128>}, {transform_indices = @transform_7, window_bounds = array<i64: 1, 2, 128>}]} {
    %c0 = arith.constant 0 : index
    %c0_0 = arith.constant 0 : index
    %c0_1 = arith.constant 0 : index
    %0 = vector.load %arg1[%c0, %c0_0, %c0_1] : memref<1x110x128xbf16, #tpu.memory_space<vmem>>, vector<1x110x128xbf16>
    %1 = vector.shape_cast %0 : vector<1x110x128xbf16> to vector<110x128xbf16>
    %2 = arith.extf %1 : vector<110x128xbf16> to vector<110x128xf32>
    %c0_2 = arith.constant 0 : index
    %c0_3 = arith.constant 0 : index
    %3 = vector.load %arg3[%c0_2, %c0_3] : memref<1x128xf32, #tpu.memory_space<vmem>>, vector<1x128xf32>
    %4 = vector.broadcast %3 : vector<1x128xf32> to vector<110x128xf32>
    %5 = arith.mulf %2, %4 : vector<110x128xf32>
    %c0_4 = arith.constant 0 : index
    %c0_5 = arith.constant 0 : index
    %6 = vector.load %arg4[%c0_4, %c0_5] : memref<1x128xf32, #tpu.memory_space<vmem>>, vector<1x128xf32>
    %7 = vector.broadcast %6 : vector<1x128xf32> to vector<110x128xf32>
    %8 = arith.addf %5, %7 : vector<110x128xf32>
    %cst = arith.constant 0.000000e+00 : f32
    %9 = vector.broadcast %cst : f32 to vector<110x128xf32>
    %10 = arith.maximumf %8, %9 : vector<110x128xf32>
    %c0_6 = arith.constant 0 : index
    %c0_7 = arith.constant 0 : index
    %11 = vector.load %arg5[%c0_6, %c0_7] : memref<110x1xf32, #tpu.memory_space<vmem>>, vector<110x1xf32>
    %12 = vector.broadcast %11 : vector<110x1xf32> to vector<110x128xf32>
    %13 = arith.mulf %10, %12 : vector<110x128xf32>
    %14 = arith.truncf %13 : vector<110x128xf32> to vector<110x128xbf16>
    %c0_8 = arith.constant 0 : index
    %c0_9 = arith.constant 0 : index
    %15 = vector.load %arg9[%c0_8, %c0_9] : memref<110x128xbf16, #tpu.memory_space<vmem>>, vector<110x128xbf16>
    tpu.vector_store %arg9[%c0_8, %c0_9], %14 {strides = array<i32>} : memref<110x128xbf16, #tpu.memory_space<vmem>>, vector<110x128xbf16>,
    %cst_10 = arith.constant 0.000000e+00 : f32
    %16 = vector.broadcast %cst_10 : f32 to vector<80x128xf32>
    %c0_11 = arith.constant 0 : index
    %c0_12 = arith.constant 0 : index
    %17 = vector.load %arg9[%c0_11, %c0_12] : memref<110x128xbf16, #tpu.memory_space<vmem>>, vector<80x128xbf16>
    %c0_13 = arith.constant 0 : index
    %c0_14 = arith.constant 0 : index
    %c0_15 = arith.constant 0 : index
    %18 = vector.load %arg2[%c0_13, %c0_14, %c0_15] : memref<9x128x128xbf16, #tpu.memory_space<vmem>>, vector<1x128x128xbf16>
    %19 = vector.shape_cast %18 : vector<1x128x128xbf16> to vector<128x128xbf16>
    %cst_16 = arith.constant dense<0.000000e+00> : vector<80x128xf32>
    %20 = tpu.matmul %17, %19, %cst_16 {dimension_numbers = #tpu.dot_dimension_numbers<[1], [0], [0], [1], [0, 0, 1, 1], [], []>} : vector<80x128xbf16>, vector<128x128xbf16>, vector<80x128xf32> -> vector<80x128xf32>
    %21 = arith.addf %16, %20 : vector<80x128xf32>
    %c1 = arith.constant 1 : index
    %c0_17 = arith.constant 0 : index
    %22 = vector.load %arg9[%c1, %c0_17] : memref<110x128xbf16, #tpu.memory_space<vmem>>, vector<80x128xbf16>
    %c1_18 = arith.constant 1 : index
    %c0_19 = arith.constant 0 : index
    %c0_20 = arith.constant 0 : index
    %23 = vector.load %arg2[%c1_18, %c0_19, %c0_20] : memref<9x128x128xbf16, #tpu.memory_space<vmem>>, vector<1x128x128xbf16>
    %24 = vector.shape_cast %23 : vector<1x128x128xbf16> to vector<128x128xbf16>
    %cst_21 = arith.constant dense<0.000000e+00> : vector<80x128xf32>
    %25 = tpu.matmul %22, %24, %cst_21 {dimension_numbers = #tpu.dot_dimension_numbers<[1], [0], [0], [1], [0, 0, 1, 1], [], []>} : vector<80x128xbf16>, vector<128x128xbf16>, vector<80x128xf32> -> vector<80x128xf32>
    %26 = arith.addf %21, %25 : vector<80x128xf32>
    %c2 = arith.constant 2 : index
    %c0_22 = arith.constant 0 : index
    %27 = vector.load %arg9[%c2, %c0_22] : memref<110x128xbf16, #tpu.memory_space<vmem>>, vector<80x128xbf16>
    %c2_23 = arith.constant 2 : index
    %c0_24 = arith.constant 0 : index
    %c0_25 = arith.constant 0 : index
    %28 = vector.load %arg2[%c2_23, %c0_24, %c0_25] : memref<9x128x128xbf16, #tpu.memory_space<vmem>>, vector<1x128x128xbf16>
    %29 = vector.shape_cast %28 : vector<1x128x128xbf16> to vector<128x128xbf16>
    %cst_26 = arith.constant dense<0.000000e+00> : vector<80x128xf32>
    %30 = tpu.matmul %27, %29, %cst_26 {dimension_numbers = #tpu.dot_dimension_numbers<[1], [0], [0], [1], [0, 0, 1, 1], [], []>} : vector<80x128xbf16>, vector<128x128xbf16>, vector<80x128xf32> -> vector<80x128xf32>
    %31 = arith.addf %26, %30 : vector<80x128xf32>
    %c10 = arith.constant 10 : index
    %c0_27 = arith.constant 0 : index
    %32 = vector.load %arg9[%c10, %c0_27] : memref<110x128xbf16, #tpu.memory_space<vmem>>, vector<80x128xbf16>
    %c3 = arith.constant 3 : index
    %c0_28 = arith.constant 0 : index
    %c0_29 = arith.constant 0 : index
    %33 = vector.load %arg2[%c3, %c0_28, %c0_29] : memref<9x128x128xbf16, #tpu.memory_space<vmem>>, vector<1x128x128xbf16>
    %34 = vector.shape_cast %33 : vector<1x128x128xbf16> to vector<128x128xbf16>
    %cst_30 = arith.constant dense<0.000000e+00> : vector<80x128xf32>
    %35 = tpu.matmul %32, %34, %cst_30 {dimension_numbers = #tpu.dot_dimension_numbers<[1], [0], [0], [1], [0, 0, 1, 1], [], []>} : vector<80x128xbf16>, vector<128x128xbf16>, vector<80x128xf32> -> vector<80x128xf32>
    %36 = arith.addf %31, %35 : vector<80x128xf32>
    %c11 = arith.constant 11 : index
    %c0_31 = arith.constant 0 : index
    %37 = vector.load %arg9[%c11, %c0_31] : memref<110x128xbf16, #tpu.memory_space<vmem>>, vector<80x128xbf16>
    %c4 = arith.constant 4 : index
    %c0_32 = arith.constant 0 : index
    %c0_33 = arith.constant 0 : index
    %38 = vector.load %arg2[%c4, %c0_32, %c0_33] : memref<9x128x128xbf16, #tpu.memory_space<vmem>>, vector<1x128x128xbf16>
    %39 = vector.shape_cast %38 : vector<1x128x128xbf16> to vector<128x128xbf16>
    %cst_34 = arith.constant dense<0.000000e+00> : vector<80x128xf32>
    %40 = tpu.matmul %37, %39, %cst_34 {dimension_numbers = #tpu.dot_dimension_numbers<[1], [0], [0], [1], [0, 0, 1, 1], [], []>} : vector<80x128xbf16>, vector<128x128xbf16>, vector<80x128xf32> -> vector<80x128xf32>
    %41 = arith.addf %36, %40 : vector<80x128xf32>
    %c12 = arith.constant 12 : index
    %c0_35 = arith.constant 0 : index
    %42 = vector.load %arg9[%c12, %c0_35] : memref<110x128xbf16, #tpu.memory_space<vmem>>, vector<80x128xbf16>
    %c5 = arith.constant 5 : index
    %c0_36 = arith.constant 0 : index
    %c0_37 = arith.constant 0 : index
    %43 = vector.load %arg2[%c5, %c0_36, %c0_37] : memref<9x128x128xbf16, #tpu.memory_space<vmem>>, vector<1x128x128xbf16>
    %44 = vector.shape_cast %43 : vector<1x128x128xbf16> to vector<128x128xbf16>
    %cst_38 = arith.constant dense<0.000000e+00> : vector<80x128xf32>
    %45 = tpu.matmul %42, %44, %cst_38 {dimension_numbers = #tpu.dot_dimension_numbers<[1], [0], [0], [1], [0, 0, 1, 1], [], []>} : vector<80x128xbf16>, vector<128x128xbf16>, vector<80x128xf32> -> vector<80x128xf32>
    %46 = arith.addf %41, %45 : vector<80x128xf32>
    %c20 = arith.constant 20 : index
    %c0_39 = arith.constant 0 : index
    %47 = vector.load %arg9[%c20, %c0_39] : memref<110x128xbf16, #tpu.memory_space<vmem>>, vector<80x128xbf16>
    %c6 = arith.constant 6 : index
    %c0_40 = arith.constant 0 : index
    %c0_41 = arith.constant 0 : index
    %48 = vector.load %arg2[%c6, %c0_40, %c0_41] : memref<9x128x128xbf16, #tpu.memory_space<vmem>>, vector<1x128x128xbf16>
    %49 = vector.shape_cast %48 : vector<1x128x128xbf16> to vector<128x128xbf16>
    %cst_42 = arith.constant dense<0.000000e+00> : vector<80x128xf32>
    %50 = tpu.matmul %47, %49, %cst_42 {dimension_numbers = #tpu.dot_dimension_numbers<[1], [0], [0], [1], [0, 0, 1, 1], [], []>} : vector<80x128xbf16>, vector<128x128xbf16>, vector<80x128xf32> -> vector<80x128xf32>
    %51 = arith.addf %46, %50 : vector<80x128xf32>
    %c21 = arith.constant 21 : index
    %c0_43 = arith.constant 0 : index
    %52 = vector.load %arg9[%c21, %c0_43] : memref<110x128xbf16, #tpu.memory_space<vmem>>, vector<80x128xbf16>
    %c7 = arith.constant 7 : index
    %c0_44 = arith.constant 0 : index
    %c0_45 = arith.constant 0 : index
    %53 = vector.load %arg2[%c7, %c0_44, %c0_45] : memref<9x128x128xbf16, #tpu.memory_space<vmem>>, vector<1x128x128xbf16>
    %54 = vector.shape_cast %53 : vector<1x128x128xbf16> to vector<128x128xbf16>
    %cst_46 = arith.constant dense<0.000000e+00> : vector<80x128xf32>
    %55 = tpu.matmul %52, %54, %cst_46 {dimension_numbers = #tpu.dot_dimension_numbers<[1], [0], [0], [1], [0, 0, 1, 1], [], []>} : vector<80x128xbf16>, vector<128x128xbf16>, vector<80x128xf32> -> vector<80x128xf32>
    %56 = arith.addf %51, %55 : vector<80x128xf32>
    %c22 = arith.constant 22 : index
    %c0_47 = arith.constant 0 : index
    %57 = vector.load %arg9[%c22, %c0_47] : memref<110x128xbf16, #tpu.memory_space<vmem>>, vector<80x128xbf16>
    %c8 = arith.constant 8 : index
    %c0_48 = arith.constant 0 : index
    %c0_49 = arith.constant 0 : index
    %58 = vector.load %arg2[%c8, %c0_48, %c0_49] : memref<9x128x128xbf16, #tpu.memory_space<vmem>>, vector<1x128x128xbf16>
    %59 = vector.shape_cast %58 : vector<1x128x128xbf16> to vector<128x128xbf16>
    %cst_50 = arith.constant dense<0.000000e+00> : vector<80x128xf32>
    %60 = tpu.matmul %57, %59, %cst_50 {dimension_numbers = #tpu.dot_dimension_numbers<[1], [0], [0], [1], [0, 0, 1, 1], [], []>} : vector<80x128xbf16>, vector<128x128xbf16>, vector<80x128xf32> -> vector<80x128xf32>
    %61 = arith.addf %56, %60 : vector<80x128xf32>
    %c0_51 = arith.constant 0 : index
    %c0_52 = arith.constant 0 : index
    %62 = vector.load %arg6[%c0_51, %c0_52] : memref<80x1xf32, #tpu.memory_space<vmem>>, vector<80x1xf32>
    %63 = vector.broadcast %62 : vector<80x1xf32> to vector<80x128xf32>
    %64 = arith.mulf %61, %63 : vector<80x128xf32>
    %cst_53 = arith.constant dense<0.000000e+00> : vector<128xf32>
    %65 = vector.multi_reduction <add>, %64, %cst_53 [0] : vector<80x128xf32> to vector<128xf32>
    %66 = vector.shape_cast %65 : vector<128xf32> to vector<1x128xf32>
    %c0_54 = arith.constant 0 : index
    %c0_55 = arith.constant 0 : index
    %c0_56 = arith.constant 0 : index
    %67 = vector.load %arg8[%c0_54, %c0_55, %c0_56] : memref<1x2x128xf32, #tpu.memory_space<vmem>>, vector<1x1x128xf32>
    %68 = vector.shape_cast %67 : vector<1x1x128xf32> to vector<1x128xf32>
    %69 = vector.shape_cast %66 : vector<1x128xf32> to vector<1x1x128xf32>
    tpu.vector_store %arg8[%c0_54, %c0_55, %c0_56], %69 {strides = array<i32>} : memref<1x2x128xf32, #tpu.memory_space<vmem>>, vector<1x1x128xf32>,
    %70 = arith.mulf %64, %61 : vector<80x128xf32>
    %cst_57 = arith.constant dense<0.000000e+00> : vector<128xf32>
    %71 = vector.multi_reduction <add>, %70, %cst_57 [0] : vector<80x128xf32> to vector<128xf32>
    %72 = vector.shape_cast %71 : vector<128xf32> to vector<1x128xf32>
    %c0_58 = arith.constant 0 : index
    %c1_59 = arith.constant 1 : index
    %c0_60 = arith.constant 0 : index
    %73 = vector.load %arg8[%c0_58, %c1_59, %c0_60] : memref<1x2x128xf32, #tpu.memory_space<vmem>>, vector<1x1x128xf32>
    %74 = vector.shape_cast %73 : vector<1x1x128xf32> to vector<1x128xf32>
    %75 = vector.shape_cast %72 : vector<1x128xf32> to vector<1x1x128xf32>
    tpu.vector_store %arg8[%c0_58, %c1_59, %c0_60], %75 {strides = array<i32>} : memref<1x2x128xf32, #tpu.memory_space<vmem>>, vector<1x1x128xf32>,
    %76 = arith.truncf %61 : vector<80x128xf32> to vector<80x128xbf16>
    %c0_61 = arith.constant 0 : index
    %c0_62 = arith.constant 0 : index
    %c0_63 = arith.constant 0 : index
    %77 = vector.load %arg7[%c0_61, %c0_62, %c0_63] : memref<1x80x128xbf16, #tpu.memory_space<vmem>>, vector<1x80x128xbf16>
    %78 = vector.shape_cast %77 : vector<1x80x128xbf16> to vector<80x128xbf16>
    %79 = vector.shape_cast %76 : vector<80x128xbf16> to vector<1x80x128xbf16>
    tpu.vector_store %arg7[%c0_61, %c0_62, %c0_63], %79 {strides = array<i32>} : memref<1x80x128xbf16, #tpu.memory_space<vmem>>, vector<1x80x128xbf16>,
    return
  }
  func.func @transform_0(%arg0: i32) -> (i32, i32, i32) {
    %c0_i32 = arith.constant 0 : i32
    %c0_i32_0 = arith.constant 0 : i32
    %c0_i32_1 = arith.constant 0 : i32
    return %arg0, %c0_i32, %c0_i32_0 : i32, i32, i32
  }
  func.func @transform_1(%arg0: i32) -> (i32, i32, i32) {
    %c0_i32 = arith.constant 0 : i32
    %c0_i32_0 = arith.constant 0 : i32
    %c0_i32_1 = arith.constant 0 : i32
    %c0_i32_2 = arith.constant 0 : i32
    return %c0_i32, %c0_i32_0, %c0_i32_1 : i32, i32, i32
  }
  func.func @transform_2(%arg0: i32) -> (i32, i32) {
    %c0_i32 = arith.constant 0 : i32
    %c0_i32_0 = arith.constant 0 : i32
    %c0_i32_1 = arith.constant 0 : i32
    return %c0_i32, %c0_i32_0 : i32, i32
  }
  func.func @transform_3(%arg0: i32) -> (i32, i32) {
    %c0_i32 = arith.constant 0 : i32
    %c0_i32_0 = arith.constant 0 : i32
    %c0_i32_1 = arith.constant 0 : i32
    return %c0_i32, %c0_i32_0 : i32, i32
  }
  func.func @transform_4(%arg0: i32) -> (i32, i32) {
    %c0_i32 = arith.constant 0 : i32
    %c0_i32_0 = arith.constant 0 : i32
    %c0_i32_1 = arith.constant 0 : i32
    return %c0_i32, %c0_i32_0 : i32, i32
  }
  func.func @transform_5(%arg0: i32) -> (i32, i32) {
    %c0_i32 = arith.constant 0 : i32
    %c0_i32_0 = arith.constant 0 : i32
    %c0_i32_1 = arith.constant 0 : i32
    return %c0_i32, %c0_i32_0 : i32, i32
  }
  func.func @transform_6(%arg0: i32) -> (i32, i32, i32) {
    %c0_i32 = arith.constant 0 : i32
    %c0_i32_0 = arith.constant 0 : i32
    %c0_i32_1 = arith.constant 0 : i32
    return %arg0, %c0_i32, %c0_i32_0 : i32, i32, i32
  }
  func.func @transform_7(%arg0: i32) -> (i32, i32, i32) {
    %c0_i32 = arith.constant 0 : i32
    %c0_i32_0 = arith.constant 0 : i32
    %c0_i32_1 = arith.constant 0 : i32
    return %arg0, %c0_i32, %c0_i32_0 : i32, i32, i32
  }
}

module attributes {stable_mosaic.version = 11 : i64} {
  func.func @bn2_dsbn_add_relu_kernel(%arg0: i32, %arg1: memref<1x64x128xbf16, #tpu.memory_space<vmem>>, %arg2: memref<1x64x128xbf16, #tpu.memory_space<vmem>>, %arg3: memref<1x128xf32, #tpu.memory_space<vmem>>, %arg4: memref<1x128xf32, #tpu.memory_space<vmem>>, %arg5: memref<1x128xf32, #tpu.memory_space<vmem>>, %arg6: memref<1x128xf32, #tpu.memory_space<vmem>>, %arg7: memref<1x64x128xf32, #tpu.memory_space<vmem>>) attributes {dimension_semantics = [#tpu.dimension_semantics<parallel>], iteration_bounds = array<i64: 2>, scalar_prefetch = 0 : i64, scratch_operands = 0 : i64, tpu.core_type = #tpu.core_type<tc>, window_params = [{transform_indices = @transform_0, window_bounds = array<i64: 1, 64, 128>}, {transform_indices = @transform_1, window_bounds = array<i64: 1, 64, 128>}, {pipeline_mode = #tpu.pipeline_mode<synchronous>, transform_indices = @transform_2, window_bounds = array<i64: 1, 128>}, {pipeline_mode = #tpu.pipeline_mode<synchronous>, transform_indices = @transform_3, window_bounds = array<i64: 1, 128>}, {pipeline_mode = #tpu.pipeline_mode<synchronous>, transform_indices = @transform_4, window_bounds = array<i64: 1, 128>}, {pipeline_mode = #tpu.pipeline_mode<synchronous>, transform_indices = @transform_5, window_bounds = array<i64: 1, 128>}, {transform_indices = @transform_6, window_bounds = array<i64: 1, 64, 128>}]} {
    %c0 = arith.constant 0 : index
    %c0_0 = arith.constant 0 : index
    %c0_1 = arith.constant 0 : index
    %0 = vector.load %arg1[%c0, %c0_0, %c0_1] : memref<1x64x128xbf16, #tpu.memory_space<vmem>>, vector<1x64x128xbf16>
    %1 = vector.shape_cast %0 : vector<1x64x128xbf16> to vector<64x128xbf16>
    %2 = arith.extf %1 : vector<64x128xbf16> to vector<64x128xf32>
    %c0_2 = arith.constant 0 : index
    %c0_3 = arith.constant 0 : index
    %3 = vector.load %arg3[%c0_2, %c0_3] : memref<1x128xf32, #tpu.memory_space<vmem>>, vector<1x128xf32>
    %4 = vector.broadcast %3 : vector<1x128xf32> to vector<64x128xf32>
    %5 = arith.mulf %2, %4 : vector<64x128xf32>
    %c0_4 = arith.constant 0 : index
    %c0_5 = arith.constant 0 : index
    %6 = vector.load %arg4[%c0_4, %c0_5] : memref<1x128xf32, #tpu.memory_space<vmem>>, vector<1x128xf32>
    %7 = vector.broadcast %6 : vector<1x128xf32> to vector<64x128xf32>
    %8 = arith.addf %5, %7 : vector<64x128xf32>
    %c0_6 = arith.constant 0 : index
    %c0_7 = arith.constant 0 : index
    %c0_8 = arith.constant 0 : index
    %9 = vector.load %arg2[%c0_6, %c0_7, %c0_8] : memref<1x64x128xbf16, #tpu.memory_space<vmem>>, vector<1x64x128xbf16>
    %10 = vector.shape_cast %9 : vector<1x64x128xbf16> to vector<64x128xbf16>
    %11 = arith.extf %10 : vector<64x128xbf16> to vector<64x128xf32>
    %c0_9 = arith.constant 0 : index
    %c0_10 = arith.constant 0 : index
    %12 = vector.load %arg5[%c0_9, %c0_10] : memref<1x128xf32, #tpu.memory_space<vmem>>, vector<1x128xf32>
    %13 = vector.broadcast %12 : vector<1x128xf32> to vector<64x128xf32>
    %14 = arith.mulf %11, %13 : vector<64x128xf32>
    %c0_11 = arith.constant 0 : index
    %c0_12 = arith.constant 0 : index
    %15 = vector.load %arg6[%c0_11, %c0_12] : memref<1x128xf32, #tpu.memory_space<vmem>>, vector<1x128xf32>
    %16 = vector.broadcast %15 : vector<1x128xf32> to vector<64x128xf32>
    %17 = arith.addf %14, %16 : vector<64x128xf32>
    %18 = arith.addf %8, %17 : vector<64x128xf32>
    %cst = arith.constant 0.000000e+00 : f32
    %19 = vector.broadcast %cst : f32 to vector<64x128xf32>
    %20 = arith.maximumf %18, %19 : vector<64x128xf32>
    %c0_13 = arith.constant 0 : index
    %c0_14 = arith.constant 0 : index
    %c0_15 = arith.constant 0 : index
    %21 = vector.load %arg7[%c0_13, %c0_14, %c0_15] : memref<1x64x128xf32, #tpu.memory_space<vmem>>, vector<1x64x128xf32>
    %22 = vector.shape_cast %21 : vector<1x64x128xf32> to vector<64x128xf32>
    %23 = vector.shape_cast %20 : vector<64x128xf32> to vector<1x64x128xf32>
    tpu.vector_store %arg7[%c0_13, %c0_14, %c0_15], %23 {strides = array<i32>} : memref<1x64x128xf32, #tpu.memory_space<vmem>>, vector<1x64x128xf32>,
    return
  }
  func.func @transform_0(%arg0: i32) -> (i32, i32, i32) {
    %c0_i32 = arith.constant 0 : i32
    %c0_i32_0 = arith.constant 0 : i32
    %c0_i32_1 = arith.constant 0 : i32
    return %arg0, %c0_i32, %c0_i32_0 : i32, i32, i32
  }
  func.func @transform_1(%arg0: i32) -> (i32, i32, i32) {
    %c0_i32 = arith.constant 0 : i32
    %c0_i32_0 = arith.constant 0 : i32
    %c0_i32_1 = arith.constant 0 : i32
    return %arg0, %c0_i32, %c0_i32_0 : i32, i32, i32
  }
  func.func @transform_2(%arg0: i32) -> (i32, i32) {
    %c0_i32 = arith.constant 0 : i32
    %c0_i32_0 = arith.constant 0 : i32
    %c0_i32_1 = arith.constant 0 : i32
    return %c0_i32, %c0_i32_0 : i32, i32
  }
  func.func @transform_3(%arg0: i32) -> (i32, i32) {
    %c0_i32 = arith.constant 0 : i32
    %c0_i32_0 = arith.constant 0 : i32
    %c0_i32_1 = arith.constant 0 : i32
    return %c0_i32, %c0_i32_0 : i32, i32
  }
  func.func @transform_4(%arg0: i32) -> (i32, i32) {
    %c0_i32 = arith.constant 0 : i32
    %c0_i32_0 = arith.constant 0 : i32
    %c0_i32_1 = arith.constant 0 : i32
    return %c0_i32, %c0_i32_0 : i32, i32
  }
  func.func @transform_5(%arg0: i32) -> (i32, i32) {
    %c0_i32 = arith.constant 0 : i32
    %c0_i32_0 = arith.constant 0 : i32
    %c0_i32_1 = arith.constant 0 : i32
    return %c0_i32, %c0_i32_0 : i32, i32
  }
  func.func @transform_6(%arg0: i32) -> (i32, i32, i32) {
    %c0_i32 = arith.constant 0 : i32
    %c0_i32_0 = arith.constant 0 : i32
    %c0_i32_1 = arith.constant 0 : i32
    return %arg0, %c0_i32, %c0_i32_0 : i32, i32, i32
  }
}

</mosaic_0001>

<bundles_post_ra>
// kernel: _lambda_.5
= control target key start
LH: loop header
LB: loop body
LE: loop exit
PB: predicated region body
PF: predicated region fallthrough
CT: control target
= control target key end

     0   :  { %s564_s21 = smov 0   ;;  %s662_s0 = inlined_call_operand.vmem [shape: bf16[2,64,128], index: 0, kind: input, shape index: {}]   ;;  %s663_s1 = inlined_call_operand.vmem [shape: bf16[2,64,128], index: 1, kind: input, shape index: {}]   ;;  %s664_s2 = inlined_call_operand.vmem [shape: f32[1,128], index: 2, kind: input, shape index: {}]   ;;  %s665_s3 = inlined_call_operand.vmem [shape: f32[1,128], index: 3, kind: input, shape index: {}]   ;;  %s666_s4 = inlined_call_operand.vmem [shape: f32[1,128], index: 4, kind: input, shape index: {}]   ;;  %s667_s5 = inlined_call_operand.vmem [shape: f32[1,128], index: 5, kind: input, shape index: {}]   ;;  %s668_s6 = inlined_call_operand.vmem [shape: f32[2,64,128], index: 6, kind: output, shape index: {}]  }
   0x1 LB: > { %s455_s22 = sadd.s32 4294967295, %s527_s21   ;;  %p459_p0 = scmp.ge.s32.totalorder %s527_s21, 1  ;;  %s527_s21 = sphi %s564_s21, %s16_s21  }
   0x2   : > { %p222_p1 = scmp.lt.s32.totalorder %s527_s21, 3 }
   0x4   : > { %p223_p2 = pnand %p459_p0, %p222_p1 }
   0x5   : > { %p257_p3 = scmp.lt.s32.totalorder (!%p223_p2), %s455_s22, 1  ;;  %v588_v0 = vld [vmem:[%s664_s2] ss:$0 sm:$0xff] (!%p223_p2) }
   0x6   : > { %226 = sbr.rel (%p223_p2) target bundleno = 39 (0x27), region = 44  ;;  %v593_v1 = vld [vmem:[%s666_s4] ss:$0 sm:$0xff] (!%p223_p2) }
   0x7   : > { %v602_v10 = vld [vmem:[%s665_s3] ss:$0 sm:$0xff] (!%p223_p2) }
   0x8   : > { %v607_v11 = vld [vmem:[%s667_s5] ss:$0 sm:$0xff] (!%p223_p2) }
   0xd   : > { %s670_s22 = smov (!%p257_p3, %s455_s22), 1 }
   0xe   : > { %s472_s23 = sshll.u32 %s670_s22, 5  ;;  %s474_s14 = sshll.u32 %s670_s22, 6 }
   0xf   : > { %s578_s26 = scalar_lea.vmem %s662_s0, %s472_s23  ;;  %s583_s29 = scalar_lea.vmem %s663_s1, %s472_s23 }
  0x10   : > { %v476_v2 = vld [vmem:[%s578_s26] sm:$0xff]   ;;  %v507_v4 = vld [vmem:[%s578_s26 + $0x8] sm:$0xff]   ;;  %v508_v24 = vld [vmem:[%s578_s26 + $0x10] sm:$0xff]   ;;  %s631_s17 = scalar_lea.vmem %s668_s6, %s474_s14 }
  0x11   : > { %v492_v3 = vld [vmem:[%s583_s29] sm:$0xff]   ;;  %v477_v5 = vunpack.c.l.bf16 %v476_v2  ;;  %v478_v7 = vunpack.c.h.bf16 %v476_v2  ;;  %v510_v9 = vld [vmem:[%s583_s29 + $0x8] sm:$0xff]   ;;  %v481_v12 = vunpack.c.l.bf16 %v507_v4  ;;  %v482_v14 = vunpack.c.h.bf16 %v507_v4  ;;  %v511_v25 = vld [vmem:[%s583_s29 + $0x10] sm:$0xff]  }
  0x12   : > { %v493_v6 = vunpack.c.l.bf16 %v492_v3  ;;  %v494_v8 = vunpack.c.h.bf16 %v492_v3  ;;  %v497_v13 = vunpack.c.l.bf16 %v510_v9  ;;  %v498_v15 = vunpack.c.h.bf16 %v510_v9  ;;  %v509_v42 = vld [vmem:[%s578_s26 + $0x18] sm:$0xff]  }
  0x13   : > { %v295_v16 = vmul.f32 %v477_v5, %v588_v0  ;;  %v296_v18 = vmul.f32 %v478_v7, %v588_v0  ;;  %v297_v20 = vmul.f32 %v481_v12, %v588_v0  ;;  %v298_v22 = vmul.f32 %v482_v14, %v588_v0  ;;  %v512_v43 = vld [vmem:[%s583_s29 + $0x18] sm:$0xff]  }
  0x14   : > { %v341_v17 = vmul.f32 %v493_v6, %v593_v1  ;;  %v342_v19 = vmul.f32 %v494_v8, %v593_v1  ;;  %v343_v21 = vmul.f32 %v497_v13, %v593_v1  ;;  %v344_v23 = vmul.f32 %v498_v15, %v593_v1 }
  0x15   : > { %v310_v26 = vadd.f32 %v602_v10, %v295_v16  ;;  %v311_v28 = vadd.f32 %v602_v10, %v296_v18  ;;  %v312_v30 = vadd.f32 %v602_v10, %v297_v20  ;;  %v313_v32 = vadd.f32 %v602_v10, %v298_v22 }
  0x16   : > { %v356_v27 = vadd.f32 %v607_v11, %v341_v17  ;;  %v357_v29 = vadd.f32 %v607_v11, %v342_v19  ;;  %v358_v31 = vadd.f32 %v607_v11, %v343_v21  ;;  %v359_v33 = vadd.f32 %v607_v11, %v344_v23 }
  0x17   : > { %v485_v36 = vunpack.c.l.bf16 %v508_v24  ;;  %v501_v37 = vunpack.c.l.bf16 %v511_v25  ;;  %v486_v40 = vunpack.c.h.bf16 %v508_v24  ;;  %v502_v41 = vunpack.c.h.bf16 %v511_v25 }
  0x18   : > { %v364_v34 = vadd.f32 %v356_v27, %v310_v26  ;;  %v365_v35 = vadd.f32 %v357_v29, %v311_v28  ;;  %v366_v38 = vadd.f32 %v358_v31, %v312_v30  ;;  %v367_v39 = vadd.f32 %v359_v33, %v313_v32 }
  0x19   : > { %v299_v46 = vmul.f32 %v485_v36, %v588_v0  ;;  %v345_v47 = vmul.f32 %v501_v37, %v593_v1  ;;  %v300_v50 = vmul.f32 %v486_v40, %v588_v0  ;;  %v346_v51 = vmul.f32 %v502_v41, %v593_v1 }
  0x1a   : > { %v372_v44 = vmax.f32 %v364_v34, 0.0  ;;  %v373_v45 = vmax.f32 %v365_v35, 0.0  ;;  %v374_v48 = vmax.f32 %v366_v38, 0.0  ;;  %v375_v49 = vmax.f32 %v367_v39, 0.0 }
  0x1b   : > { %v314_v52 = vadd.f32 %v602_v10, %v299_v46  ;;  %v360_v53 = vadd.f32 %v607_v11, %v345_v47  ;;  %v489_v54 = vunpack.c.l.bf16 %v509_v42  ;;  %v505_v55 = vunpack.c.l.bf16 %v512_v43 }
  0x1c   : > { %380 = vst [vmem:[%s631_s17] sm:$0xff] %v372_v44  ;;  %381 = vst [vmem:[%s631_s17 + $0x8] sm:$0xff] %v373_v45  ;;  %v315_v56 = vadd.f32 %v602_v10, %v300_v50  ;;  %v361_v57 = vadd.f32 %v607_v11, %v346_v51  ;;  %v490_v58 = vunpack.c.h.bf16 %v509_v42  ;;  %v506_v59 = vunpack.c.h.bf16 %v512_v43 }
  0x1d   : > { %382 = vst [vmem:[%s631_s17 + $0x10] sm:$0xff] %v374_v48  ;;  %383 = vst [vmem:[%s631_s17 + $0x18] sm:$0xff] %v375_v49  ;;  %v368_v60 = vadd.f32 %v360_v53, %v314_v52  ;;  %v301_v61 = vmul.f32 %v489_v54, %v588_v0  ;;  %v347_v62 = vmul.f32 %v505_v55, %v593_v1 }
  0x1e   : > { %v369_v63 = vadd.f32 %v361_v57, %v315_v56  ;;  %v302_v2 = vmul.f32 %v490_v58, %v588_v0  ;;  %v348_v3 = vmul.f32 %v506_v59, %v593_v1 }
  0x1f   : > { %v376_v4 = vmax.f32 %v368_v60, 0.0  ;;  %v316_v5 = vadd.f32 %v602_v10, %v301_v61  ;;  %v362_v6 = vadd.f32 %v607_v11, %v347_v62 }
  0x20   : > { %v377_v7 = vmax.f32 %v369_v63, 0.0  ;;  %v317_v8 = vadd.f32 %v602_v10, %v302_v2  ;;  %v363_v9 = vadd.f32 %v607_v11, %v348_v3 }
  0x21   : > { %384 = vst [vmem:[%s631_s17 + $0x20] sm:$0xff] %v376_v4  ;;  %v370_v12 = vadd.f32 %v362_v6, %v316_v5 }
  0x22   : > { %385 = vst [vmem:[%s631_s17 + $0x28] sm:$0xff] %v377_v7  ;;  %v371_v13 = vadd.f32 %v363_v9, %v317_v8 }
  0x23   : > { %v378_v14 = vmax.f32 %v370_v12, 0.0 }
  0x24   : > { %v379_v15 = vmax.f32 %v371_v13, 0.0 }
  0x25   : > { %386 = vst [vmem:[%s631_s17 + $0x30] sm:$0xff] %v378_v14 }
  0x26   : > { %387 = vst [vmem:[%s631_s17 + $0x38] sm:$0xff] %v379_v15 }
  0x27 PF: > { %s16_s21 = sadd.s32 1, %s527_s21  }
  0x28   : > { %p13_p4 = scmp.ge.s32.totalorder %s16_s21, 4  }
  0x2a   :  { %15 = sbr.rel (!%p13_p4) target bundleno = 1 (0x1), region = 77 }

// kernel: _lambda_.3
= control target key start
LH: loop header
LB: loop body
LE: loop exit
PB: predicated region body
PF: predicated region fallthrough
CT: control target
= control target key end

     0   :  { %s3836_s24 = smov 0   ;;  %s4464_s0 = inlined_call_operand.vmem [shape: bf16[2,90,512], index: 0, kind: input, shape index: {}]   ;;  %s4465_s1 = inlined_call_operand.vmem [shape: bf16[9,128,128], index: 1, kind: input, shape index: {}]   ;;  %s4466_s2 = inlined_call_operand.vmem [shape: bf16[128,128], index: 2, kind: input, shape index: {}]   ;;  %s4467_s3 = inlined_call_operand.vmem [shape: f32[72,1], index: 3, kind: input, shape index: {}]   ;;  %s4468_s4 = inlined_call_operand.vmem [shape: bf16[2,72,128], index: 4, kind: output, shape index: {0}]   ;;  %s4469_s5 = inlined_call_operand.vmem [shape: bf16[2,72,128], index: 5, kind: output, shape index: {1}]   ;;  %s4470_s6 = inlined_call_operand.vmem [shape: f32[2,2,128], index: 6, kind: output, shape index: {2}]   ;;  %s4471_s7 = inlined_call_operand.vmem [shape: f32[2,2,128], index: 7, kind: output, shape index: {3}]  }
   0x1 LB: > { %s2657_s25 = sadd.s32 4294967295, %s3791_s24   ;;  %p2661_p0 = scmp.ge.s32.totalorder %s3791_s24, 1  ;;  %s3791_s24 = sphi %s3836_s24, %s18_s24  }
   0x2   : > { %p244_p1 = scmp.lt.s32.totalorder %s3791_s24, 3 }
   0x4   : > { %p245_p2 = pnand %p2661_p0, %p244_p1 }
   0x5   : > { %v3659_v0 = vld [vmem:[%s4465_s1 + $0x40] sm:$0xff] (!%p245_p2)   ;;  %v3793_v1 = vmov (!%p245_p2), 0.0   ;;  %v3661_v3 = vld [vmem:[%s4465_s1 + $0x48] sm:$0xff] (!%p245_p2)   ;;  %vm3794_vm0 = vmmov (!%p245_p2), 0   ;;  %p289_p3 = scmp.lt.s32.totalorder (!%p245_p2), %s2657_s25, 1  ;;  %v3663_v5 = vld [vmem:[%s4465_s1 + $0x50] sm:$0xff] (!%p245_p2)  }
   0x6   : > { %248 = sbr.rel (%p245_p2) target bundleno = 464 (0x1d0), region = 36  ;;  %3135 = vmatprep.subr.bf16.mxu1 (!%p245_p2), %v3793_v1  ;;  %3279 = vmatprep.subr.bf16.mxu0 (!%p245_p2), %v3793_v1  ;;  %v3660_v2 = vld [vmem:[%s4465_s1 + $0x100] sm:$0xff] (!%p245_p2)   ;;  %v3662_v4 = vld [vmem:[%s4465_s1 + $0x108] sm:$0xff] (!%p245_p2)   ;;  %v3664_v6 = vld [vmem:[%s4465_s1 + $0x110] sm:$0xff] (!%p245_p2)   ;;  %vm721_vm1 = vsmask.f32 (!%p245_p2), 7424 }
   0x7   : > { %3136 = vmatpush3.bf16.msra.mxu1 (!%p245_p2), %v3659_v0  ;;  %3151 = vmatprep.mubr.msk.bf16.mxu1 (!%p245_p2), %vm3794_vm0, %v3793_v1  ;;  %v3665_v7 = vld [vmem:[%s4465_s1 + $0x58] sm:$0xff] (!%p245_p2)   ;;  %v3667_v9 = vld [vmem:[%s4465_s1 + $0x60] sm:$0xff] (!%p245_p2)   ;;  %v3669_v11 = vld [vmem:[%s4465_s1 + $0x68] sm:$0xff] (!%p245_p2)   ;;  %vm1957_vm2 = vcmask (!%p245_p2), 1046528  }
   0x8   : > { %3280 = vmatpush3.bf16.msra.mxu0 (!%p245_p2), %v3660_v2  ;;  %3137 = vmatprep.subr.bf16.mxu1 (!%p245_p2), %v3793_v1  ;;  %v3666_v8 = vld [vmem:[%s4465_s1 + $0x118] sm:$0xff] (!%p245_p2)   ;;  %v3668_v10 = vld [vmem:[%s4465_s1 + $0x120] sm:$0xff] (!%p245_p2)   ;;  %v3670_v12 = vld [vmem:[%s4465_s1 + $0x128] sm:$0xff] (!%p245_p2)  }
   0x9   : > { %3281 = vmatprep.subr.bf16.mxu0 (!%p245_p2), %v3793_v1  ;;  %3295 = vmatprep.mubr.msk.bf16.mxu0 (!%p245_p2), %vm3794_vm0, %v3793_v1  ;;  %v3671_v13 = vld [vmem:[%s4465_s1 + $0x70] sm:$0xff] (!%p245_p2)   ;;  %v3673_v15 = vld [vmem:[%s4465_s1 + $0x78] sm:$0xff] (!%p245_p2)   ;;  %v3678_v19 = vld [vmem:[%s4465_s1] sm:$0xff] (!%p245_p2)  }
   0xa   : > { %v3672_v14 = vld [vmem:[%s4465_s1 + $0x130] sm:$0xff] (!%p245_p2)   ;;  %v3674_v16 = vld [vmem:[%s4465_s1 + $0x138] sm:$0xff] (!%p245_p2)   ;;  %v3677_v20 = vld [vmem:[%s4465_s1 + $0x140] sm:$0xff] (!%p245_p2)  }
   0xb   : > { %3138 = vmatpush3.bf16.msra.mxu1 (!%p245_p2), %v3661_v3  ;;  %v3681_v21 = vld [vmem:[%s4465_s1 + $0x8] sm:$0xff] (!%p245_p2)   ;;  %v3684_v25 = vld [vmem:[%s4465_s1 + $0x10] sm:$0xff] (!%p245_p2)   ;;  %v3687_v27 = vld [vmem:[%s4465_s1 + $0x158] sm:$0xff] (!%p245_p2)  }
   0xc   : > { %3282 = vmatpush3.bf16.msra.mxu0 (!%p245_p2), %v3662_v4  ;;  %3139 = vmatprep.subr.bf16.mxu1 (!%p245_p2), %v3793_v1  ;;  %v3679_v22 = vld [vmem:[%s4465_s1 + $0x148] sm:$0xff] (!%p245_p2)   ;;  %v3683_v26 = vld [vmem:[%s4465_s1 + $0x150] sm:$0xff] (!%p245_p2)   ;;  %v3688_v28 = vld [vmem:[%s4465_s1 + $0x18] sm:$0xff] (!%p245_p2)  }
   0xd   : > { %s4473_s25 = smov (!%p289_p3, %s2657_s25), 1  ;;  %3283 = vmatprep.subr.bf16.mxu0 %v3793_v1  ;;  %v3689_v31 = vld [vmem:[%s4465_s1 + $0x160] sm:$0xff]   ;;  %v3693_v33 = vld [vmem:[%s4465_s1 + $0x168] sm:$0xff]   ;;  %v3695_v37 = vld [vmem:[%s4465_s1 + $0x170] sm:$0xff]  }
   0xe   : > { %s3644_s19 = smul.u32 192, %s4473_s25  ;;  %v3690_v32 = vld [vmem:[%s4465_s1 + $0x20] sm:$0xff]   ;;  %v3694_v34 = vld [vmem:[%s4465_s1 + $0x28] sm:$0xff]   ;;  %v3698_v39 = vld [vmem:[%s4465_s1 + $0x30] sm:$0xff]   ;;  %s2665_s10 = sshll.u32 %s4473_s25, 1 }
   0xf   : > { %3140 = vmatpush3.bf16.msra.mxu1 %v3663_v5  ;;  %v3699_v42 = vld [vmem:[%s4465_s1 + $0x178] sm:$0xff]   ;;  %v3705_v53 = vld [vmem:[%s4465_s1 + $0x80] sm:$0xff]   ;;  %v3706_v58 = vld [vmem:[%s4465_s1 + $0x188] sm:$0xff]   ;;  %s311_s13 = scalar_lea.vmem %s4471_s7, %s2665_s10 }
  0x10   : > { %3284 = vmatpush3.bf16.msra.mxu0 %v3664_v6  ;;  %3141 = vmatprep.subr.bf16.mxu1 %v3793_v1  ;;  %s3893_s28 = scalar_lea.vmem %s4464_s0, %s3644_s19  ;;  %v3700_v44 = vld [vmem:[%s4465_s1 + $0x38] sm:$0xff]   ;;  %v3704_v56 = vld [vmem:[%s4465_s1 + $0x180] sm:$0xff]   ;;  %v3708_v59 = vld [vmem:[%s4465_s1 + $0x88] sm:$0xff]  }
  0x11   : > { %3285 = vmatprep.subr.bf16.mxu0 %v3793_v1  ;;  %v3675_v17 = vld [vmem:[%s3893_s28 + $0x4] ss:$16 sps:$4 sm:$0xff]   ;;  %v3676_v18 = vld [vmem:[%s3893_s28 + $0xc] ss:$16 sps:$4 sm:$0xff]   ;;  %v3702_v38 = vld [vmem:[%s3893_s28 + $0x8] ss:$16 sps:$4 sm:$0xff]  }
  0x12   : > { %v3680_v23 = vld [vmem:[%s3893_s28 + $0x24] ss:$16 sps:$4 sm:$0xff]   ;;  %v3682_v24 = vld [vmem:[%s3893_s28 + $0x2c] ss:$16 sps:$4 sm:$0xff]   ;;  %v3703_v40 = vld [vmem:[%s3893_s28 + $0x28] ss:$16 sps:$4 sm:$0xff]  }
  0x13   : > { %3142 = vmatpush3.bf16.msra.mxu1 %v3665_v7  ;;  %v3685_v29 = vld [vmem:[%s3893_s28 + $0x44] ss:$16 sps:$4 sm:$0xff]   ;;  %v3686_v30 = vld [vmem:[%s3893_s28 + $0x4c] ss:$16 sps:$4 sm:$0xff]   ;;  %v1316_v43 = vshll.u32 %v3702_v38, 16  ;;  %v1314_v46 = vshrl.u32 %v3702_v38, 16 }
  0x14   : > { %3286 = vmatpush3.bf16.msra.mxu0 %v3666_v8  ;;  %3143 = vmatprep.subr.bf16.mxu1 %v3793_v1  ;;  %v3691_v35 = vld [vmem:[%s3893_s28 + $0x64] ss:$16 sps:$4 sm:$0xff]   ;;  %v3692_v36 = vld [vmem:[%s3893_s28 + $0x6c] ss:$16 sps:$4 sm:$0xff]   ;;  %v1321_v48 = vshll.u32 %v3703_v40, 16  ;;  %v1325_v57 = vshrl.u32 %v3703_v40, 16 }
  0x15   : > { %3287 = vmatprep.subr.bf16.mxu0 %v3793_v1  ;;  %v3696_v41 = vld [vmem:[%s3893_s28 + $0x84] ss:$0 sps:$4 sm:$0xff]   ;;  %v3697_v45 = vld [vmem:[%s3893_s28 + $0x8c] ss:$0 sps:$4 sm:$0xff]   ;;  %v1318_v47 = vrot.slane %v1316_v43, 1  ;;  %v3711_v0 = vld [vmem:[%s4465_s1 + $0x90] sm:$0xff]  }
  0x16   : > { %v3709_v49 = vld [vmem:[%s3893_s28 + $0x48] ss:$16 sps:$4 sm:$0xff]   ;;  %v1323_v51 = vrot.slane %v1321_v48, 1  ;;  %v3701_v52 = vld [vmem:[%s3893_s28] ss:$16 sps:$4 sm:$0xff]  }
  0x17   : > { %3144 = vmatpush3.bf16.msra.mxu1 %v3667_v9  ;;  %v1319_v50 = vor.u32 %v1318_v47, %v1314_v46  ;;  %v1329_v54 = vshll.u32 %v3709_v49, 16  ;;  %v3713_v62 = vld [vmem:[%s3893_s28 + $0x68] ss:$16 sps:$4 sm:$0xff]   ;;  %v3707_v63 = vld [vmem:[%s3893_s28 + $0x20] ss:$16 sps:$4 sm:$0xff]   ;;  %v1333_v4 = vshrl.u32 %v3709_v49, 16 }
  0x18   : > { %3288 = vmatpush3.bf16.msra.mxu0 %v3668_v10  ;;  %3145 = vmatprep.subr.bf16.mxu1 %v3793_v1  ;;  %v1327_v61 = vor.u32 %v1325_v57, %v1323_v51  ;;  %v3710_v3 = vld [vmem:[%s4465_s1 + $0x190] sm:$0xff]   ;;  %v1337_v5 = vshll.u32 %v3713_v62, 16  ;;  %v4051_v6 = vld [vmem:[%s3893_s28 + $0x88] ss:$16 sps:$4 sm:$0x1f]  }
  0x19   : > { %3289 = vmatprep.subr.bf16.mxu0 %v3793_v1  ;;  %v1324_v55 = vsel %vm721_vm1, %v1319_v50, %v1323_v51  ;;  %v1331_v60 = vrot.slane %v1329_v54, 1  ;;  %v3715_v7 = vld [vmem:[%s4465_s1 + $0x98] sm:$0xff]   ;;  %v3723_v38 = vld [vmem:[%s3893_s28 + $0x80] ss:$0 sps:$4 sm:$0xff]  }
  0x1a   : > { %v1339_v9 = vrot.slane %v1337_v5, 1  ;;  %v3714_v10 = vld [vmem:[%s4465_s1 + $0x198] sm:$0xff]   ;;  %v4141_v51 = vld [vmem:[%s3893_s28 + $0x90] ss:$16 sps:$4 sm:$0x1f]   ;;  %v3735_v5 = vld [vmem:[%s4465_s1 + $0xc8] sm:$0xff]  }
  0x1b   : > { %3146 = vmatpush3.bf16.msra.mxu1 %v3669_v11  ;;  %v1332_v2 = vsel %vm721_vm1, %v1327_v61, %v1331_v60  ;;  %v1335_v8 = vor.u32 %v1333_v4, %v1331_v60  ;;  %v3712_v11 = vld [vmem:[%s3893_s28 + $0x40] ss:$16 sps:$4 sm:$0xff]   ;;  %v3726_v40 = vld [vmem:[%s4465_s1 + $0xb8] sm:$0xff]  }
  0x1c   : > { %3290 = vmatpush3.bf16.msra.mxu0 %v3670_v12  ;;  %3147 = vmatprep.subr.bf16.mxu1 %v3793_v1  ;;  %v3716_v12 = vld [vmem:[%s4465_s1 + $0x1a0] sm:$0xff]  }
  0x1d   : > { %3291 = vmatprep.subr.bf16.mxu0 %v3793_v1  ;;  %v3732_v60 = vld [vmem:[%s4465_s1 + $0xc0] sm:$0xff]  }
  0x1f   : > { %3148 = vmatpush3.bf16.msra.mxu1 %v3671_v13  ;;  %v1345_v13 = vshll.u32 %v4051_v6, 16 }
  0x20   : > { %3292 = vmatpush3.bf16.msra.mxu0 %v3672_v14  ;;  %3149 = vmatprep.subr.bf16.mxu1 %v3793_v1  ;;  %v1340_v14 = vsel %vm721_vm1, %v1335_v8, %v1339_v9  ;;  %v3733_v8 = vld [vmem:[%s4465_s1 + $0x1c8] sm:$0xff]  }
  0x21   : > { %3293 = vmatprep.subr.bf16.mxu0 %v3793_v1 }
  0x23   : > { %3150 = vmatpush3.bf16.msra.mxu1 %v3673_v15  ;;  %v3717_v15 = vld [vmem:[%s4465_s1 + $0xa0] sm:$0xff]  }
  0x24   : > { %3294 = vmatpush3.bf16.msra.mxu0 %v3674_v16  ;;  %3171 = vmatprep.subr.bf16.mxu1 %v3793_v1  ;;  %v1341_v16 = vshrl.u32 %v3713_v62, 16 }
  0x25   : > { %3315 = vmatprep.subr.bf16.mxu0 %v3793_v1 }
  0x26   : > { %3152 = vmatmul.mubr.bf16.vlgmr.msra.gmra.mrb[0].mxu1 %v3675_v17  ;;  %v3720_v17 = vld [vmem:[%s4465_s1 + $0x1a8] sm:$0xff]  }
  0x27   : > { %3296 = vmatmul.mubr.bf16.vlgmr.msra.gmra.mrb[0].mxu0 %v3676_v18  ;;  %3172 = vmatpush3.bf16.msra.mxu1 %v3678_v19  ;;  %v3721_v18 = vld [vmem:[%s4465_s1 + $0xa8] sm:$0xff]   ;;  %v1347_v19 = vrot.slane %v1345_v13, 1 }
  0x28   : > { %3316 = vmatpush3.bf16.msra.mxu0 %v3677_v20  ;;  %3155 = vmatprep.mubr.msk.bf16.mxu1 %vm3794_vm0, %v3793_v1  ;;  %v1349_v20 = vshrl.u32 %v4051_v6, 16 }
  0x29   : > { %3317 = vmatprep.subr.bf16.mxu0 %v3793_v1  ;;  %3173 = vmatprep.subr.bf16.mxu1 %v3793_v1 }
  0x2a   : > { %3299 = vmatprep.mubr.msk.bf16.mxu0 %vm3794_vm0, %v3793_v1  ;;  %v1351_v48 = vor.u32 %v1349_v20, %v1347_v19  ;;  %v4195_v20 = vld [vmem:[%s3893_s28 + $0x80] ss:$16 sps:$4 sm:$0x1f]  }
  0x2b   : > { %3174 = vmatpush3.bf16.msra.mxu1 %v3681_v21  ;;  %v3727_v21 = vld [vmem:[%s3893_s28] ss:$16 sps:$4 sm:$0xff]  }
  0x2c   : > { %3318 = vmatpush3.bf16.msra.mxu0 %v3679_v22  ;;  %3175 = vmatprep.subr.bf16.mxu1 %v3793_v1  ;;  %v3718_v22 = vld [vmem:[%s3893_s28 + $0x60] ss:$16 sps:$4 sm:$0xff]  }
  0x2d   : > { %3319 = vmatprep.subr.bf16.mxu0 %v3793_v1 }
  0x2e   : > { %3156 = vmatmul.mubr.bf16.gmra.mrb[4].mxu1 %v3680_v23  ;;  %v1343_v23 = vor.u32 %v1341_v16, %v1339_v9 }
  0x2f   : > { %3300 = vmatmul.mubr.bf16.gmra.mrb[4].mxu0 %v3682_v24  ;;  %3176 = vmatpush3.bf16.msra.mxu1 %v3684_v25  ;;  %v1486_v24 = vld [vmem:[%s3893_s28 + $0x10] sm:$0xf]  ;;  %v4092_v25 = vld [vmem:[%s3893_s28 + $0x20] sm:$0xf] }
  0x30   : > { %3320 = vmatpush3.bf16.msra.mxu0 %v3683_v26  ;;  %3159 = vmatprep.mubr.msk.bf16.mxu1 %vm3794_vm0, %v3793_v1  ;;  %v3722_v26 = vld [vmem:[%s4465_s1 + $0x1b0] sm:$0xff]  }
  0x31   : > { %3303 = vmatprep.mubr.msk.bf16.mxu0 %vm3794_vm0, %v3793_v1  ;;  %3321 = vmatprep.subr.bf16.mxu0 %v3793_v1 }
  0x32   : > { %3177 = vmatprep.subr.bf16.mxu1 %v3793_v1 }
  0x33   : > { %3178 = vmatpush3.bf16.msra.mxu1 %v3688_v28  ;;  %v3724_v28 = vld [vmem:[%s4465_s1 + $0xb0] sm:$0xff]  }
  0x34   : > { %3322 = vmatpush3.bf16.msra.mxu0 %v3687_v27  ;;  %3179 = vmatprep.subr.bf16.mxu1 %v3793_v1  ;;  %v4099_v27 = vld [vmem:[%s3893_s28 + $0x30] ss:$16 sps:$4 sm:$0xff]  }
  0x35   : > { %3323 = vmatprep.subr.bf16.mxu0 %v3793_v1  ;;  %v1546_v47 = vshll.u32 %v4099_v27, 16 }
  0x36   : > { %3160 = vmatmul.mubr.bf16.gmra.mrb[8].mxu1 %v3685_v29  ;;  %v4105_v29 = vld [vmem:[%s3893_s28 + $0x50] ss:$16 sps:$4 sm:$0xff]  }
  0x37   : > { %3304 = vmatmul.mubr.bf16.gmra.mrb[8].mxu0 %v3686_v30  ;;  %3163 = vmatprep.mubr.msk.bf16.mxu1 %vm3794_vm0, %v3793_v1  ;;  %v1348_v30 = vsel %vm721_vm1, %v1343_v23, %v1347_v19  ;;  %v1548_v57 = vrot.slane %v1546_v47, 1  ;;  %v3742_v19 = vld [vmem:[%s4465_s1 + $0xd8] sm:$0xff]   ;;  %v3748_v47 = vld [vmem:[%s4465_s1 + $0xe8] sm:$0xff]  }
  0x38   : > { %3324 = vmatpush3.bf16.msra.mxu0 %v3689_v31  ;;  %3180 = vmatpush3.bf16.msra.mxu1 %v3690_v32  ;;  %v3728_v31 = vld [vmem:[%s3893_s28 + $0x20] ss:$16 sps:$4 sm:$0xff]   ;;  %v725_v32 = vshll.u32 %v3727_v21, 16 }
  0x39   : > { %3307 = vmatprep.mubr.msk.bf16.mxu0 %vm3794_vm0, %v3793_v1  ;;  %3325 = vmatprep.subr.bf16.mxu0 %v3793_v1  ;;  %v734_v61 = vshrl.u32 %v3728_v31, 16 }
  0x3a   : > { %3181 = vmatprep.subr.bf16.mxu1 %v3793_v1 }
  0x3c   : > { %3326 = vmatpush3.bf16.msra.mxu0 %v3693_v33  ;;  %3182 = vmatpush3.bf16.msra.mxu1 %v3694_v34  ;;  %v2841_v33 = vcombine.low %v1486_v24, %v4092_v25  ;;  %v1959_v34 = vrot.slane %v4099_v27, 1 }
  0x3d   : > { %3327 = vmatprep.subr.bf16.mxu0 %v3793_v1  ;;  %3183 = vmatprep.subr.bf16.mxu1 %v3793_v1 }
  0x3e   : > { %3164 = vmatmul.mubr.bf16.gmra.mrb[12].mxu1 %v3691_v35  ;;  %v1961_v35 = vrot.slane %v4105_v29, 1  ;;  %v1539_v46 = vshrl.u32 %v2841_v33, 16 }
  0x3f   : > { %3308 = vmatmul.mubr.bf16.gmra.mrb[12].mxu0 %v3692_v36  ;;  %3167 = vmatprep.mubr.msk.bf16.mxu1 %vm3794_vm0, %v3793_v1  ;;  %v4115_v36 = vld [vmem:[%s3893_s28 + $0x70] ss:$16 sps:$4 sm:$0xff]  }
  0x40   : > { %3311 = vmatprep.mubr.msk.bf16.mxu0 %vm3794_vm0, %v3793_v1  ;;  %3328 = vmatpush3.bf16.msra.mxu0 %v3695_v37  ;;  %v4122_v37 = vsel %vm1957_vm2, %v1959_v34, %v1961_v35  ;;  %v1963_v43 = vrot.slane %v4115_v36, 1 }
  0x41   : > { %3184 = vmatpush3.bf16.msra.mxu1 %v3698_v39  ;;  %3329 = vmatprep.subr.bf16.mxu0 %v3793_v1  ;;  %v3725_v39 = vld [vmem:[%s4465_s1 + $0x1b8] sm:$0xff]  }
  0x42   : > { %3185 = vmatprep.subr.bf16.mxu1 %v3793_v1  ;;  %v4138_v49 = vsel %vm1957_vm2, %v1961_v35, %v1963_v43 }
  0x44   : > { %3330 = vmatpush3.bf16.msra.mxu0 %v3699_v42  ;;  %v723_v42 = vshrl.u32 %v3727_v21, 16 }
  0x45   : > { %3186 = vmatpush3.bf16.msra.mxu1 %v3700_v44  ;;  %3351 = vmatprep.subr.bf16.mxu0 %v3793_v1  ;;  %v727_v44 = vrot.slane %v725_v32, 1  ;;  %v3795_v32 = vmov 0  }
  0x46   : > { %3168 = vmatmul.mubr.bf16.gmra.mrb[16].mxu1 %v3696_v41  ;;  %3207 = vmatprep.subr.bf16.mxu1 %v3793_v1  ;;  %v1541_v41 = vshll.u32 %v2841_v33, 16 }
  0x47   : > { %3312 = vmatmul.mubr.bf16.gmra.mrb[16].mxu0 %v3697_v45  ;;  %3187 = vmatprep.mubr.msk.bf16.mxu1 %vm3794_vm0, %v3793_v1  ;;  %v730_v45 = vshll.u32 %v3728_v31, 16  ;;  %v3744_v31 = vld [vmem:[%s4465_s1 + $0xe0] sm:$0xff]  }
  0x48   : > { %3331 = vmatprep.mubr.msk.bf16.mxu0 %vm3794_vm0, %v3793_v1  ;;  %v1543_v50 = vrot.slane %v1541_v41, 1  ;;  %3657 = vset.pattern.permute.xlu0 %v3795_v32  ;;  %v1566_v41 = vshrl.u32 %v4115_v36, 16 }
  0x49   : > { %v732_v54 = vrot.slane %v730_v45, 1  ;;  %3658 = vset.pattern.permute.xlu1 %v3795_v32 }
  0x4b   : > { %v736_v6 = vor.u32 %v734_v61, %v732_v54  ;;  %v316_v61 = vld [vmem:[%s4467_s3 + $0x18] sm:$0xff] }
  0x4e   : > { %3188 = vmatmul.mubr.bf16.vlgmr.msra.gmra.mrb[0].mxu1 %v3701_v52  ;;  %v3734_v52 = vld [vmem:[%s3893_s28 + $0x40] ss:$16 sps:$4 sm:$0xff]  }
  0x4f   : > { %3332 = vmatmul.mubr.bf16.vlgmr.msra.gmra.mrb[0].mxu0 %v1324_v55  ;;  %3208 = vmatpush3.bf16.msra.mxu1 %v3705_v53  ;;  %v728_v53 = vor.u32 %v727_v44, %v723_v42  ;;  %v1965_v55 = vrot.slane %v4141_v51, 1  ;;  %v738_v62 = vshll.u32 %v3734_v52, 16  ;;  %v1570_v42 = vshll.u32 %v4141_v51, 16 }
  0x50   : > { %3352 = vmatpush3.bf16.msra.mxu0 %v3704_v56  ;;  %3191 = vmatprep.mubr.msk.bf16.mxu1 %vm3794_vm0, %v3793_v1  ;;  %v1544_v56 = vor.u32 %v1543_v50, %v1539_v46 }
  0x51   : > { %3353 = vmatprep.subr.bf16.mxu0 %v3793_v1  ;;  %3209 = vmatprep.subr.bf16.mxu1 %v3793_v1  ;;  %v740_v4 = vrot.slane %v738_v62, 1  ;;  %v3751_v62 = vld [vmem:[%s4465_s1 + $0x1f8] sm:$0xff]  }
  0x52   : > { %3335 = vmatprep.mubr.msk.bf16.mxu0 %vm3794_vm0, %v3793_v1 }
  0x53   : > { %3210 = vmatpush3.bf16.msra.mxu1 %v3708_v59  ;;  %v3731_v59 = vld [vmem:[%s4465_s1 + $0x1c0] sm:$0xff]   ;;  %v741_v13 = vsel %vm721_vm1, %v736_v6, %v740_v4 }
  0x54   : > { %3354 = vmatpush3.bf16.msra.mxu0 %v3706_v58  ;;  %3211 = vmatprep.subr.bf16.mxu1 %v3793_v1  ;;  %v4154_v58 = vsel %vm1957_vm2, %v1963_v43, %v1965_v55 }
  0x55   : > { %3355 = vmatprep.subr.bf16.mxu0 %v3793_v1 }
  0x56   : > { %3192 = vmatmul.mubr.bf16.gmra.mrb[4].mxu1 %v3707_v63  ;;  %v733_v63 = vsel %vm721_vm1, %v728_v53, %v732_v54  ;;  %v3749_v54 = vld [vmem:[%s4465_s1 + $0x1f0] sm:$0xff]  }
  0x57   : > { %3336 = vmatmul.mubr.bf16.gmra.mrb[4].mxu0 %v1332_v2  ;;  %3212 = vmatpush3.bf16.msra.mxu1 %v3711_v0  ;;  %v1550_v0 = vshrl.u32 %v4099_v27, 16  ;;  %v1554_v2 = vshll.u32 %v4105_v29, 16  ;;  %v1572_v27 = vrot.slane %v1570_v42, 1 }
  0x58   : > { %3356 = vmatpush3.bf16.msra.mxu0 %v3710_v3  ;;  %3195 = vmatprep.mubr.msk.bf16.mxu1 %vm3794_vm0, %v3793_v1  ;;  %v1549_v3 = vsel %vm721_vm1, %v1544_v56, %v1548_v57  ;;  %v3754_v56 = vld [vmem:[%s3893_s28 + $0x14] ss:$16 sps:$4 sm:$0xff]  }
  0x59   : > { %3339 = vmatprep.mubr.msk.bf16.mxu0 %vm3794_vm0, %v3793_v1  ;;  %3357 = vmatprep.subr.bf16.mxu0 %v3793_v1  ;;  %v1552_v9 = vor.u32 %v1550_v0, %v1548_v57  ;;  %v3750_v57 = vld [vmem:[%s4465_s1 + $0xf0] sm:$0xff]   ;;  %v1766_v0 = vshll.u32 %v3754_v56, 16  ;;  %v1764_v6 = vshrl.u32 %v3754_v56, 16 }
  0x5a   : > { %3213 = vmatprep.subr.bf16.mxu1 %v3793_v1 }
  0x5b   : > { %3214 = vmatpush3.bf16.msra.mxu1 %v3715_v7  ;;  %v3739_v7 = vld [vmem:[%s3893_s28 + $0x60] ss:$16 sps:$4 sm:$0xff]  }
  0x5c   : > { %3358 = vmatpush3.bf16.msra.mxu0 %v3714_v10  ;;  %3215 = vmatprep.subr.bf16.mxu1 %v3793_v1  ;;  %v1556_v10 = vrot.slane %v1554_v2, 1  ;;  %v750_v35 = vshrl.u32 %v3739_v7, 16  ;;  %v319_v2 = vld [vmem:[%s4467_s3 + $0x30] sm:$0xff] }
  0x5d   : > { %3359 = vmatprep.subr.bf16.mxu0 %v3793_v1 }
  0x5e   : > { %3196 = vmatmul.mubr.bf16.gmra.mrb[8].mxu1 %v3712_v11  ;;  %v3738_v11 = vld [vmem:[%s4465_s1 + $0xd0] sm:$0xff]   ;;  %v1557_v16 = vsel %vm721_vm1, %v1552_v9, %v1556_v10  ;;  %v318_v9 = vld [vmem:[%s4467_s3 + $0x28] sm:$0xff] }
  0x5f   : > { %3340 = vmatmul.mubr.bf16.gmra.mrb[8].mxu0 %v1340_v14  ;;  %3199 = vmatprep.mubr.msk.bf16.mxu1 %vm3794_vm0, %v3793_v1  ;;  %v742_v14 = vshrl.u32 %v3734_v52, 16  ;;  %v317_v52 = vld [vmem:[%s4467_s3 + $0x20] sm:$0xff] }
  0x60   : > { %3360 = vmatpush3.bf16.msra.mxu0 %v3716_v12  ;;  %3216 = vmatpush3.bf16.msra.mxu1 %v3717_v15  ;;  %v3737_v12 = vld [vmem:[%s4465_s1 + $0x1d0] sm:$0xff]   ;;  %v746_v15 = vshll.u32 %v3739_v7, 16  ;;  %v1768_v7 = vrot.slane %v1766_v0, 1  ;;  %v3782_v0 = vld [vmem:[%s3893_s28 + $0x4c] ss:$16 sps:$4 sm:$0xff]  }
  0x61   : > { %3343 = vmatprep.mubr.msk.bf16.mxu0 %vm3794_vm0, %v3793_v1  ;;  %3361 = vmatprep.subr.bf16.mxu0 %v3793_v1  ;;  %v744_v21 = vor.u32 %v742_v14, %v740_v4  ;;  %v320_v14 = vld [vmem:[%s4467_s3 + $0x38] sm:$0xff] }
  0x62   : > { %3217 = vmatprep.subr.bf16.mxu1 %v3793_v1 }
  0x64   : > { %3362 = vmatpush3.bf16.msra.mxu0 %v3720_v17  ;;  %3218 = vmatpush3.bf16.msra.mxu1 %v3721_v18  ;;  %v1558_v17 = vshrl.u32 %v4105_v29, 16  ;;  %v1562_v18 = vshll.u32 %v4115_v36, 16  ;;  %v314_v36 = vld [vmem:[%s4467_s3 + $0x8] sm:$0xff] }
  0x65   : > { %3363 = vmatprep.subr.bf16.mxu0 %v3793_v1  ;;  %3219 = vmatprep.subr.bf16.mxu1 %v3793_v1 }
  0x66   : > { %3200 = vmatmul.mubr.bf16.gmra.mrb[12].mxu1 %v3718_v22  ;;  %v748_v22 = vrot.slane %v746_v15, 1  ;;  %v1560_v23 = vor.u32 %v1558_v17, %v1556_v10  ;;  %v1564_v24 = vrot.slane %v1562_v18, 1  ;;  %v321_v10 = vld [vmem:[%s4467_s3 + $0x40] sm:$0xff]  ;;  %v3753_v15 = vld [vmem:[%s3893_s28 + $0x8] ss:$16 sps:$4 sm:$0xff]  }
  0x67   : > { %3344 = vmatmul.mubr.bf16.gmra.mrb[12].mxu0 %v1348_v30  ;;  %3203 = vmatprep.mubr.msk.bf16.mxu1 %vm3794_vm0, %v3793_v1  ;;  %v3743_v30 = vld [vmem:[%s4465_s1 + $0x1e0] sm:$0xff]  }
  0x68   : > { %3347 = vmatprep.mubr.msk.bf16.mxu0 %vm3794_vm0, %v3793_v1  ;;  %3364 = vmatpush3.bf16.msra.mxu0 %v3722_v26  ;;  %v3741_v26 = vld [vmem:[%s4465_s1 + $0x1d8] sm:$0xff]   ;;  %v749_v33 = vsel %vm721_vm1, %v744_v21, %v748_v22  ;;  %v752_v44 = vor.u32 %v750_v35, %v748_v22  ;;  %v1568_v46 = vor.u32 %v1566_v41, %v1564_v24  ;;  %v3756_v18 = vld [vmem:[%s4465_s1 + $0x200] sm:$0xff]   ;;  %v3761_v21 = vld [vmem:[%s4466_s2 + $0x8] sm:$0xff]  }
  0x69   : > { %3220 = vmatpush3.bf16.msra.mxu1 %v3724_v28  ;;  %3365 = vmatprep.subr.bf16.mxu0 %v3793_v1  ;;  %v1936_v28 = vld [vmem:[%s3893_s28 + $0x10] sm:$0xe]  ;;  %v3758_v22 = vld [vmem:[%s4465_s1 + $0x208] sm:$0xff]   ;;  %v3767_v35 = vld [vmem:[%s4466_s2 + $0x18] sm:$0xff]  }
  0x6a   : > { %3221 = vmatprep.subr.bf16.mxu1 %v3793_v1  ;;  %v2899_v29 = vcombine.low %v1936_v28, %v4092_v25  ;;  %v313_v25 = vld [vmem:[%s4467_s3] sm:$0xff]  ;;  %v1573_v53 = vsel %vm721_vm1, %v1568_v46, %v1572_v27  ;;  %v3759_v28 = vld [vmem:[%s3893_s28 + $0x28] ss:$16 sps:$4 sm:$0xff]  }
  0x6b   : > { %2103 = vperm.xlu0 %3657, %v313_v25   ;;  %v3766_v25 = vld [vmem:[%s4465_s1 + $0x218] sm:$0xff]   ;;  %v3769_v46 = vld [vmem:[%s4466_s2 + $0x20] sm:$0xff]  }
  0x6c   : > { %3366 = vmatpush3.bf16.msra.mxu0 %v3725_v39  ;;  %v1958_v39 = vrot.slane %v2899_v29, 1  ;;  %v3763_v29 = vld [vmem:[%s4466_s2 + $0x10] sm:$0xff]   ;;  %v3764_v41 = vld [vmem:[%s3893_s28 + $0x48] ss:$16 sps:$4 sm:$0xff]  }
  0x6d   : > { %3222 = vmatpush3.bf16.msra.mxu1 %v3726_v40  ;;  %3387 = vmatprep.subr.bf16.mxu0 %v3793_v1  ;;  %v1565_v40 = vsel %vm721_vm1, %v1560_v23, %v1564_v24 }
  0x6e   : > { %3204 = vmatmul.mubr.bf16.gmra.mrb[16].mxu1 %v3723_v38  ;;  %3243 = vmatprep.subr.bf16.mxu1 %v3793_v1  ;;  %v754_v38 = vshll.u32 %v4195_v20, 16  ;;  %v4227_v43 = vsel %vm1957_vm2, %v1958_v39, %v1959_v34  ;;  %v3747_v34 = vld [vmem:[%s4465_s1 + $0x1e8] sm:$0xff]  }
  0x6f   : > { %3348 = vmatmul.mubr.bf16.gmra.mrb[16].mxu0 %v1351_v48  ;;  %3223 = vmatprep.mubr.msk.bf16.mxu1 %vm3794_vm0, %v3793_v1  ;;  %v315_v48 = vld [vmem:[%s4467_s3 + $0x10] sm:$0xff] }
  0x70   : > { %3367 = vmatprep.mubr.msk.bf16.mxu0 %vm3794_vm0, %v3793_v1  ;;  %v756_v45 = vrot.slane %v754_v38, 1  ;;  %2108 = vperm.xlu0 %3657, %v314_v36  }
  0x71   : > { %2113 = vperm.xlu1 %3658, %v315_v48   ;;  %v3773_v48 = vld [vmem:[%s4466_s2 + $0x28] sm:$0xff]  }
  0x72   : > { %v757_v50 = vsel %vm721_vm1, %v752_v44, %v756_v45  ;;  %v3768_v44 = vld [vmem:[%s4465_s1 + $0x220] sm:$0xff]  }
  0x74   : > { %2123 = vperm.xlu0 %3657, %v317_v52  }
  0x75   : > { %2118 = vperm.xlu1 %3658, %v316_v61  }
  0x76   : > { %3224 = vmatmul.mubr.bf16.vlgmr.msra.gmra.mrb[0].mxu1 %v733_v63  ;;  %v3755_v63 = vld [vmem:[%s3893_s28 + $0x34] ss:$16 sps:$4 sm:$0xff]  }
  0x77   : > { %3368 = vmatmul.mubr.bf16.vlgmr.msra.gmra.mrb[0].mxu0 %v1549_v3  ;;  %3244 = vmatpush3.bf16.msra.mxu1 %v3732_v60  ;;  %v1574_v60 = vshrl.u32 %v4141_v51, 16  ;;  %v3752_v3 = vld [vmem:[%s4465_s1 + $0xf8] sm:$0xff]  }
  0x78   : > { %3388 = vmatpush3.bf16.msra.mxu0 %v3731_v59  ;;  %3227 = vmatprep.mubr.msk.bf16.mxu1 %vm3794_vm0, %v3793_v1  ;;  %v758_v59 = vshrl.u32 %v4195_v20, 16 }
  0x79   : > { %3389 = vmatprep.subr.bf16.mxu0 %v3793_v1  ;;  %3245 = vmatprep.subr.bf16.mxu1 %v3793_v1 }
  0x7a   : > { %3371 = vmatprep.mubr.msk.bf16.mxu0 %vm3794_vm0, %v3793_v1  ;;  %v760_v4 = vor.u32 %v758_v59, %v756_v45  ;;  %2133 = vperm.xlu0 %3657, %v319_v2   ;;  %v3778_v59 = vld [vmem:[%s4466_s2 + $0x38] sm:$0xff]  }
  0x7b   : > { %3246 = vmatpush3.bf16.msra.mxu1 %v3735_v5  ;;  %v1576_v5 = vor.u32 %v1574_v60, %v1572_v27  ;;  %2128 = vperm.xlu1 %3658, %v318_v9   ;;  %v3775_v60 = vld [vmem:[%s3893_s28 + $0x88] ss:$0 sps:$4 sm:$0xff]  }
  0x7c   : > { %3390 = vmatpush3.bf16.msra.mxu0 %v3733_v8  ;;  %3247 = vmatprep.subr.bf16.mxu1 %v3793_v1  ;;  %v1771_v8 = vshll.u32 %v3755_v63, 16 }
  0x7d   : > { %3391 = vmatprep.subr.bf16.mxu0 %v3793_v1 }
  0x7e   : > { %3228 = vmatmul.mubr.bf16.gmra.mrb[4].mxu1 %v741_v13  ;;  %v3760_v13 = vld [vmem:[%s3893_s28 + $0x54] ss:$16 sps:$4 sm:$0xff]   ;;  %2143 = vperm.xlu0 %3657, %v321_v10  }
  0x7f   : > { %3372 = vmatmul.mubr.bf16.gmra.mrb[4].mxu0 %v1557_v16  ;;  %3248 = vmatpush3.bf16.msra.mxu1 %v3738_v11  ;;  %v1769_v11 = vor.u32 %v1768_v7, %v1764_v6  ;;  %v3757_v16 = vld [vmem:[%s4466_s2] sm:$0xff]   ;;  %v1779_v20 = vshll.u32 %v3760_v13, 16  ;;  %v1783_v32 = vshrl.u32 %v3760_v13, 16 }
  0x80   : > { %3392 = vmatpush3.bf16.msra.mxu0 %v3737_v12  ;;  %3231 = vmatprep.mubr.msk.bf16.mxu1 %vm3794_vm0, %v3793_v1  ;;  %v1773_v12 = vrot.slane %v1771_v8, 1 }
  0x81   : > { %3375 = vmatprep.mubr.msk.bf16.mxu0 %vm3794_vm0, %v3793_v1  ;;  %3393 = vmatprep.subr.bf16.mxu0 %v3793_v1  ;;  %v1781_v24 = vrot.slane %v1779_v20, 1 }
  0x82   : > { %3249 = vmatprep.subr.bf16.mxu1 %v3793_v1  ;;  %v1774_v17 = vsel %vm721_vm1, %v1769_v11, %v1773_v12  ;;  %2138 = vperm.xlu1 %3658, %v320_v14  }
  0x83   : > { %3250 = vmatpush3.bf16.msra.mxu1 %v3742_v19  ;;  %v1775_v19 = vshrl.u32 %v3755_v63, 16  ;;  %v1785_v38 = vor.u32 %v1783_v32, %v1781_v24  ;;  %v3781_v63 = vld [vmem:[%s3893_s28 + $0x2c] ss:$16 sps:$4 sm:$0xff]  }
  0x84   : > { %3394 = vmatpush3.bf16.msra.mxu0 %v3741_v26  ;;  %3251 = vmatprep.subr.bf16.mxu1 %v3793_v1  ;;  %v3765_v26 = vld [vmem:[%s3893_s28 + $0x74] ss:$16 sps:$4 sm:$0xff]  }
  0x85   : > { %3395 = vmatprep.subr.bf16.mxu0 %v3793_v1  ;;  %v1777_v23 = vor.u32 %v1775_v19, %v1773_v12  ;;  %v1791_v45 = vshrl.u32 %v3765_v26, 16 }
  0x86   : > { %3232 = vmatmul.mubr.bf16.gmra.mrb[8].mxu1 %v749_v33  ;;  %v1787_v33 = vshll.u32 %v3765_v26, 16 }
  0x87   : > { %3376 = vmatmul.mubr.bf16.gmra.mrb[8].mxu0 %v1565_v40  ;;  %3235 = vmatprep.mubr.msk.bf16.mxu1 %vm3794_vm0, %v3793_v1  ;;  %v3771_v40 = vld [vmem:[%s3893_s28 + $0x94] ss:$16 sps:$4 sm:$0x1f]  }
  0x88   : > { %3396 = vmatpush3.bf16.msra.mxu0 %v3743_v30  ;;  %3252 = vmatpush3.bf16.msra.mxu1 %v3744_v31  ;;  %v1782_v30 = vsel %vm721_vm1, %v1777_v23, %v1781_v24  ;;  %v3762_v31 = vld [vmem:[%s4465_s1 + $0x210] sm:$0xff]   ;;  %v1789_v39 = vrot.slane %v1787_v33, 1  ;;  %v1795_v36 = vshll.u32 %v3771_v40, 16  ;;  %v1799_v56 = vshrl.u32 %v3771_v40, 16 }
  0x89   : > { %3379 = vmatprep.mubr.msk.bf16.mxu0 %vm3794_vm0, %v3793_v1  ;;  %3397 = vmatprep.subr.bf16.mxu0 %v3793_v1 }
  0x8a   : > { %3253 = vmatprep.subr.bf16.mxu1 %v3793_v1  ;;  %v1790_v42 = vsel %vm721_vm1, %v1785_v38, %v1789_v39  ;;  %v1793_v27 = vor.u32 %v1791_v45, %v1789_v39 }
  0x8c   : > { %3398 = vmatpush3.bf16.msra.mxu0 %v3747_v34  ;;  %3254 = vmatpush3.bf16.msra.mxu1 %v3748_v47  ;;  %v1797_v34 = vrot.slane %v1795_v36, 1  ;;  %v3772_v47 = vld [vmem:[%s4465_s1 + $0x228] sm:$0xff]  }
  0x8d   : > { %3399 = vmatprep.subr.bf16.mxu0 %v3793_v1  ;;  %3255 = vmatprep.subr.bf16.mxu1 %v3793_v1 }
  0x8e   : > { %3236 = vmatmul.mubr.bf16.gmra.mrb[12].mxu1 %v757_v50  ;;  %v3770_v50 = vld [vmem:[%s3893_s28 + $0x68] ss:$16 sps:$4 sm:$0xff]   ;;  %v1798_v52 = vsel %vm721_vm1, %v1793_v27, %v1797_v34  ;;  %v1801_v61 = vor.u32 %v1799_v56, %v1797_v34 }
  0x8f   : > { %3380 = vmatmul.mubr.bf16.gmra.mrb[12].mxu0 %v1573_v53  ;;  %3239 = vmatprep.mubr.msk.bf16.mxu1 %vm3794_vm0, %v3793_v1  ;;  %v3774_v53 = vld [vmem:[%s4465_s1 + $0x230] sm:$0xff]  }
  0x90   : > { %3383 = vmatprep.mubr.msk.bf16.mxu0 %vm3794_vm0, %v3793_v1  ;;  %3400 = vmatpush3.bf16.msra.mxu0 %v3749_v54  ;;  %v3776_v54 = vld [vmem:[%s4466_s2 + $0x30] sm:$0xff]  }
  0x91   : > { %3256 = vmatpush3.bf16.msra.mxu1 %v3750_v57  ;;  %3401 = vmatprep.subr.bf16.mxu0 %v3793_v1  ;;  %v3777_v57 = vld [vmem:[%s4465_s1 + $0x238] sm:$0xff]  }
  0x92   : > { %3257 = vmatprep.subr.bf16.mxu1 %v3793_v1 }
  0x94   : > { %3402 = vmatpush3.bf16.msra.mxu0 %v3751_v62  ;;  %v3780_v62 = vld [vmem:[%s3893_s28 + $0xc] ss:$16 sps:$4 sm:$0xff]  }
  0x95   : > { %3258 = vmatpush3.bf16.msra.mxu1 %v3752_v3  ;;  %3423 = vmatprep.subr.bf16.mxu0 %v3793_v1 }
  0x96   : > { %3240 = vmatmul.mubr.bf16.gmra.mrb[16].mxu1 %v760_v4  ;;  %3459 = vmatprep.subr.bf16.mxu1 %v3793_v1 }
  0x97   : > { %3384 = vmatmul.mubr.bf16.gmra.mrb[16].mxu0 %v1576_v5  ;;  %3259 = vmatprep.mubr.msk.bf16.mxu1 %vm3794_vm0, %v3793_v1 }
  0x98   : > { %3403 = vmatprep.mubr.msk.bf16.mxu0 %vm3794_vm0, %v3793_v1 }
  0x9e   : > { %3260 = vmatmul.mubr.bf16.vlgmr.msra.gmra.mrb[0].mxu1 %v3753_v15 }
  0x9f   : > { %3404 = vmatmul.mubr.bf16.vlgmr.msra.gmra.mrb[0].mxu0 %v1774_v17  ;;  %3460 = vmatpush3.bf16.msra.mxu1 %v3757_v16 }
  0xa0   : > { %3424 = vmatpush3.bf16.msra.mxu0 %v3756_v18  ;;  %3263 = vmatprep.mubr.msk.bf16.mxu1 %vm3794_vm0, %v3793_v1 }
  0xa1   : > { %3425 = vmatprep.subr.bf16.mxu0 %v3793_v1  ;;  %3407 = vmatprep.mubr.msk.bf16.mxu0 %vm3794_vm0, %v3793_v1 }
  0xa2   : > { %3461 = vmatprep.subr.bf16.mxu1 %v3793_v1 }
  0xa3   : > { %3462 = vmatpush3.bf16.msra.mxu1 %v3761_v21 }
  0xa4   : > { %3426 = vmatpush3.bf16.msra.mxu0 %v3758_v22  ;;  %3463 = vmatprep.subr.bf16.mxu1 %v3793_v1 }
  0xa5   : > { %3427 = vmatprep.subr.bf16.mxu0 %v3793_v1 }
  0xa6   : > { %3264 = vmatmul.mubr.bf16.gmra.mrb[4].mxu1 %v3759_v28 }
  0xa7   : > { %3408 = vmatmul.mubr.bf16.gmra.mrb[4].mxu0 %v1782_v30  ;;  %3464 = vmatpush3.bf16.msra.mxu1 %v3763_v29 }
  0xa8   : > { %3428 = vmatpush3.bf16.msra.mxu0 %v3762_v31  ;;  %3267 = vmatprep.mubr.msk.bf16.mxu1 %vm3794_vm0, %v3793_v1 }
  0xa9   : > { %3411 = vmatprep.mubr.msk.bf16.mxu0 %vm3794_vm0, %v3793_v1  ;;  %3429 = vmatprep.subr.bf16.mxu0 %v3793_v1 }
  0xaa   : > { %3465 = vmatprep.subr.bf16.mxu1 %v3793_v1 }
  0xab   : > { %3466 = vmatpush3.bf16.msra.mxu1 %v3767_v35 }
  0xac   : > { %3430 = vmatpush3.bf16.msra.mxu0 %v3766_v25  ;;  %3467 = vmatprep.subr.bf16.mxu1 %v3793_v1 }
  0xad   : > { %3431 = vmatprep.subr.bf16.mxu0 %v3793_v1 }
  0xae   : > { %3268 = vmatmul.mubr.bf16.gmra.mrb[8].mxu1 %v3764_v41 }
  0xaf   : > { %3412 = vmatmul.mubr.bf16.gmra.mrb[8].mxu0 %v1790_v42  ;;  %3271 = vmatprep.mubr.msk.bf16.mxu1 %vm3794_vm0, %v3793_v1 }
  0xb0   : > { %3432 = vmatpush3.bf16.msra.mxu0 %v3768_v44  ;;  %3415 = vmatprep.mubr.msk.bf16.mxu0 %vm3794_vm0, %v3793_v1 }
  0xb1   : > { %3468 = vmatpush3.bf16.msra.mxu1 %v3769_v46  ;;  %3433 = vmatprep.subr.bf16.mxu0 %v3793_v1 }
  0xb2   : > { %3469 = vmatprep.subr.bf16.mxu1 %v3793_v1 }
  0xb4   : > { %3434 = vmatpush3.bf16.msra.mxu0 %v3772_v47 }
  0xb5   : > { %3470 = vmatpush3.bf16.msra.mxu1 %v3773_v48  ;;  %3435 = vmatprep.subr.bf16.mxu0 %v3793_v1 }
  0xb6   : > { %3272 = vmatmul.mubr.bf16.gmra.mrb[12].mxu1 %v3770_v50  ;;  %3471 = vmatprep.subr.bf16.mxu1 %v3793_v1 }
  0xb7   : > { %3416 = vmatmul.mubr.bf16.gmra.mrb[12].mxu0 %v1798_v52  ;;  %3275 = vmatprep.mubr.msk.bf16.mxu1 %vm3794_vm0, %v3793_v1 }
  0xb8   : > { %3419 = vmatprep.mubr.msk.bf16.mxu0 %vm3794_vm0, %v3793_v1  ;;  %3436 = vmatpush3.bf16.msra.mxu0 %v3774_v53 }
  0xb9   : > { %3472 = vmatpush3.bf16.msra.mxu1 %v3776_v54  ;;  %3437 = vmatprep.subr.bf16.mxu0 %v3793_v1 }
  0xba   : > { %3473 = vmatprep.subr.bf16.mxu1 %v3793_v1 }
  0xbc   : > { %3438 = vmatpush3.bf16.msra.mxu0 %v3777_v57 }
  0xbd   : > { %3474 = vmatpush3.bf16.msra.mxu1 %v3778_v59 }
  0xbe   : > { %3276 = vmatmul.mubr.bf16.gmra.mrb[16].mxu1 %v3775_v60 }
  0xbf   : > { %3420 = vmatmul.mubr.bf16.gmra.mrb[16].mxu0 %v1801_v61  ;;  %3475 = vmatprep.mubr.msk.bf16.mxu1 %vm3794_vm0, %v3793_v1 }
  0xc0   : > { %3439 = vmatprep.mubr.msk.bf16.mxu0 %vm3794_vm0, %v3793_v1 }
  0xc6   : > { %3476 = vmatmul.mubr.bf16.vlgmr.msra.gmra.mrb[20].mxu1 %v3780_v62 }
  0xc7   : > { %3440 = vmatmul.mubr.bf16.vlgmr.msra.gmra.mrb[0].mxu0 %v4227_v43  ;;  %3479 = vmatprep.mubr.msk.bf16.mxu1 %vm3794_vm0, %v3793_v1  ;;  %v3783_v43 = vld [vmem:[%s3893_s28 + $0x6c] ss:$16 sps:$4 sm:$0xff]  }
  0xc8   : > { %3443 = vmatprep.mubr.msk.bf16.mxu0 %vm3794_vm0, %v3793_v1 }
  0xce   : > { %3480 = vmatmul.mubr.bf16.gmra.mrb[24].mxu1 %v3781_v63 }
  0xcf   : > { %3444 = vmatmul.mubr.bf16.gmra.mrb[4].mxu0 %v4122_v37  ;;  %3483 = vmatprep.mubr.msk.bf16.mxu1 %vm3794_vm0, %v3793_v1  ;;  %v3784_v37 = vld [vmem:[%s3893_s28 + $0x8c] ss:$0 sps:$4 sm:$0xff]   ;;  %s3645_s28 = smul.u32 36, %s4473_s25  ;;  %s307_s25 = scalar_lea.vmem %s4470_s6, %s2665_s10 }
  0xd0   : > { %3447 = vmatprep.mubr.msk.bf16.mxu0 %vm3794_vm0, %v3793_v1 }
  0xd1   : > { %s4432_s29 = scalar_lea.vmem %s4469_s5, %s3645_s28  ;;  %s4437_s9 = scalar_lea.vmem %s4468_s4, %s3645_s28 }
  0xd6   : > { %3484 = vmatmul.mubr.bf16.gmra.mrb[28].mxu1 %v3782_v0 }
  0xd7   : > { %3448 = vmatmul.mubr.bf16.gmra.mrb[8].mxu0 %v4138_v49  ;;  %3487 = vmatprep.mubr.msk.bf16.mxu1 %vm3794_vm0, %v3793_v1 }
  0xd8   : > { %3451 = vmatprep.mubr.msk.bf16.mxu0 %vm3794_vm0, %v3793_v1 }
  0xde   : > { %3488 = vmatmul.mubr.bf16.gmra.mrb[32].mxu1 %v3783_v43 }
  0xdf   : > { %3452 = vmatmul.mubr.bf16.gmra.mrb[12].mxu0 %v4154_v58  ;;  %3491 = vmatprep.mubr.msk.bf16.mxu1 %vm3794_vm0, %v3793_v1 }
  0xe0   : > { %3455 = vmatprep.mubr.msk.bf16.mxu0 %vm3794_vm0, %v3793_v1 }
  0xe6   : > { %3492 = vmatmul.mubr.bf16.gmra.mrb[36].mxu1 %v3784_v37 }
  0xe7   : > { %3456 = vmatmul.mubr.bf16.gmra.mrb[16].mxu0 %v1965_v55 }
  0xea   : > { %v2104_v15 = vpop.permute.xlu0 %2103 }
  0xef   : > { %v2109_v18 = vpop.permute.xlu0 %2108 }
  0xf0   : > { %v2114_v20 = vpop.permute.xlu1 %2113 }
  0xf4   : > { %v2119_v34 = vpop.permute.xlu1 %2118 }
 0x171   : > { %v1031_v49 = vpop.f32.mrb[0].mxu1 }
 0x172   : > { %v3261_v2 = vpop.f32.mrb[1].mxu1 }
 0x173   : > { %v1034_v3 = vpop.f32.mrb[2].mxu1 }
 0x174   : > { %v3262_v4 = vpop.f32.mrb[3].mxu1 }
 0x179   : > { %v1039_v5 = vpop.f32.mrb[4].mxu1 }
 0x17a   : > { %v3265_v6 = vpop.f32.mrb[5].mxu1 }
 0x17b   : > { %v1042_v7 = vpop.f32.mrb[6].mxu1 }
 0x17c   : > { %v3266_v58 = vpop.f32.mrb[7].mxu1 }
 0x181   : > { %v4418_v8 = vpop.f32.mrb[8].mxu1 }
 0x182   : > { %v3269_v9 = vpop.f32.mrb[9].mxu1 }
 0x183   : > { %v4420_v10 = vpop.f32.mrb[10].mxu1  ;;  %v2124_v9 = vpop.permute.xlu0 %2123 }
 0x184   : > { %v3270_v1 = vpop.f32.mrb[11].mxu1 }
 0x189   : > { %v4422_v11 = vpop.f32.mrb[12].mxu1 }
 0x18a   : > { %v3273_v12 = vpop.f32.mrb[13].mxu1 }
 0x18b   : > { %v4424_v51 = vpop.f32.mrb[14].mxu1 }
 0x18c   : > { %v3274_v55 = vpop.f32.mrb[15].mxu1 }
 0x191   : > { %v4426_v13 = vpop.f32.mrb[16].mxu1 }
 0x192   : > { %v3277_v14 = vpop.f32.mrb[17].mxu1 }
 0x193   : > { %v1066_v16 = vpop.f32.mrb[18].mxu1 }
 0x194   : > { %v3278_v17 = vpop.f32.mrb[19].mxu1  ;;  %v2129_v16 = vpop.permute.xlu1 %2128 }
 0x199   : > { %v2375_v19 = vpop.f32.mrb[20].mxu1 }
 0x19a   : > { %v2054_v21 = vpop.f32.mrb[0].mxu0  ;;  %v2413_v22 = vmul.f32 %v2375_v19, %v2104_v15  ;;  %v3477_v23 = vpop.f32.mrb[21].mxu1 }
 0x19b   : > { %v3495_v24 = vadd.f32 %v2054_v21, %v1031_v49  ;;  %v3441_v26 = vpop.f32.mrb[1].mxu0  ;;  %v2378_v28 = vpop.f32.mrb[22].mxu1 }
 0x19c   : > { %v2057_v29 = vpop.f32.mrb[2].mxu0  ;;  %v2414_v30 = vmul.f32 %v2378_v28, %v2109_v18  ;;  %v2982_v31 = vpack.c.bf16 %v2378_v28, %v2375_v19  ;;  %v3478_v32 = vpop.f32.mrb[23].mxu1  ;;  %v2437_v39 = vmul.f32 %v2413_v22, %v2375_v19 }
 0x19d   : > { %v2146_v33 = vmul.f32 %v3495_v24, %v2104_v15  ;;  %v3496_v35 = vadd.f32 %v2057_v29, %v1034_v3  ;;  %v3442_v38 = vpop.f32.mrb[3].mxu0 }
 0x19e   : > { %v2422_v25 = vadd.f32 %v2414_v30, %v2413_v22  ;;  %v2438_v40 = vmul.f32 %v2414_v30, %v2378_v28  ;;  %2983 = vst [vmem:[%s4432_s29] sm:$0xff] %v2982_v31  }
 0x19f   : > { %v2147_v41 = vmul.f32 %v3496_v35, %v2109_v18  ;;  %v2962_v42 = vpack.c.bf16 %v3496_v35, %v3495_v24  ;;  %v2170_v45 = vmul.f32 %v3495_v24, %v2146_v33 }
 0x1a0   : > { %v2446_v44 = vadd.f32 %v2438_v40, %v2437_v39 }
 0x1a1   : > { %v2155_v36 = vadd.f32 %v2147_v41, %v2146_v33  ;;  %v2171_v46 = vmul.f32 %v3496_v35, %v2147_v41  ;;  %2963 = vst [vmem:[%s4437_s9] sm:$0xff] %v2962_v42   ;;  %v2383_v27 = vpop.f32.mrb[24].mxu1  ;;  %v2134_v42 = vpop.permute.xlu0 %2133 }
 0x1a2   : > { %v2062_v47 = vpop.f32.mrb[4].mxu0  ;;  %v2415_v48 = vmul.f32 %v2383_v27, %v2114_v20  ;;  %v3481_v50 = vpop.f32.mrb[25].mxu1 }
 0x1a3   : > { %v2179_v52 = vadd.f32 %v2171_v46, %v2170_v45  ;;  %v3497_v53 = vadd.f32 %v2062_v47, %v1039_v5  ;;  %v3445_v54 = vpop.f32.mrb[5].mxu0  ;;  %v2386_v56 = vpop.f32.mrb[26].mxu1 }
 0x1a4   : > { %v2423_v57 = vadd.f32 %v2422_v25, %v2415_v48  ;;  %v2439_v59 = vmul.f32 %v2415_v48, %v2383_v27  ;;  %v2065_v60 = vpop.f32.mrb[6].mxu0  ;;  %v2416_v61 = vmul.f32 %v2386_v56, %v2119_v34  ;;  %v2987_v62 = vpack.c.bf16 %v2386_v56, %v2383_v27  ;;  %v3482_v63 = vpop.f32.mrb[27].mxu1 }
 0x1a5   : > { %v2148_v0 = vmul.f32 %v3497_v53, %v2114_v20  ;;  %v3498_v43 = vadd.f32 %v2065_v60, %v1042_v7  ;;  %v3446_v37 = vpop.f32.mrb[7].mxu0  ;;  %v2139_v27 = vpop.permute.xlu1 %2138 }
 0x1a6   : > { %v2447_v49 = vadd.f32 %v2446_v44, %v2439_v59  ;;  %v2424_v2 = vadd.f32 %v2423_v57, %v2416_v61  ;;  %v2440_v3 = vmul.f32 %v2416_v61, %v2386_v56  ;;  %3002 = vst [vmem:[%s4432_s29 + $0x8] sm:$0xff] %v2987_v62  }
 0x1a7   : > { %v2156_v4 = vadd.f32 %v2155_v36, %v2148_v0  ;;  %v2172_v6 = vmul.f32 %v3497_v53, %v2148_v0  ;;  %v2149_v58 = vmul.f32 %v3498_v43, %v2119_v34  ;;  %v2967_v5 = vpack.c.bf16 %v3498_v43, %v3497_v53 }
 0x1a8   : > { %v2448_v1 = vadd.f32 %v2447_v49, %v2440_v3 }
 0x1a9   : > { %v2180_v12 = vadd.f32 %v2179_v52, %v2172_v6  ;;  %v2157_v55 = vadd.f32 %v2156_v4, %v2149_v58  ;;  %v2173_v14 = vmul.f32 %v3498_v43, %v2149_v58  ;;  %2999 = vst [vmem:[%s4437_s9 + $0x8] sm:$0xff] %v2967_v5   ;;  %v2391_v15 = vpop.f32.mrb[28].mxu1  ;;  %v2144_v5 = vpop.permute.xlu0 %2143 }
 0x1aa   : > { %v2070_v17 = vpop.f32.mrb[8].mxu0  ;;  %v2417_v18 = vmul.f32 %v2391_v15, %v2124_v9  ;;  %v3485_v7 = vpop.f32.mrb[29].mxu1 }
 0x1ab   : > { %v2181_v19 = vadd.f32 %v2180_v12, %v2173_v14  ;;  %v3499_v20 = vadd.f32 %v2070_v17, %v4418_v8  ;;  %v3449_v21 = vpop.f32.mrb[9].mxu0  ;;  %v2394_v22 = vpop.f32.mrb[30].mxu1 }
 0x1ac   : > { %v2425_v23 = vadd.f32 %v2424_v2, %v2417_v18  ;;  %v2441_v24 = vmul.f32 %v2417_v18, %v2391_v15  ;;  %v2073_v26 = vpop.f32.mrb[10].mxu0  ;;  %v2418_v28 = vmul.f32 %v2394_v22, %v2129_v16  ;;  %v2992_v29 = vpack.c.bf16 %v2394_v22, %v2391_v15  ;;  %v3486_v30 = vpop.f32.mrb[31].mxu1 }
 0x1ad   : > { %v2150_v31 = vmul.f32 %v3499_v20, %v2124_v9  ;;  %v3500_v32 = vadd.f32 %v2073_v26, %v4420_v10  ;;  %v3450_v33 = vpop.f32.mrb[11].mxu0 }
 0x1ae   : > { %v2449_v35 = vadd.f32 %v2448_v1, %v2441_v24  ;;  %v2426_v38 = vadd.f32 %v2425_v23, %v2418_v28  ;;  %v2442_v39 = vmul.f32 %v2418_v28, %v2394_v22  ;;  %3003 = vst [vmem:[%s4432_s29 + $0x10] sm:$0xff] %v2992_v29  }
 0x1af   : > { %v2158_v25 = vadd.f32 %v2157_v55, %v2150_v31  ;;  %v2174_v40 = vmul.f32 %v3499_v20, %v2150_v31  ;;  %v2151_v8 = vmul.f32 %v3500_v32, %v2129_v16  ;;  %v2972_v41 = vpack.c.bf16 %v3500_v32, %v3499_v20 }
 0x1b0   : > { %v2450_v44 = vadd.f32 %v2449_v35, %v2442_v39 }
 0x1b1   : > { %v2182_v45 = vadd.f32 %v2181_v19, %v2174_v40  ;;  %v2159_v36 = vadd.f32 %v2158_v25, %v2151_v8  ;;  %v2175_v46 = vmul.f32 %v3500_v32, %v2151_v8  ;;  %3000 = vst [vmem:[%s4437_s9 + $0x10] sm:$0xff] %v2972_v41   ;;  %v2399_v34 = vpop.f32.mrb[32].mxu1 }
 0x1b2   : > { %v2078_v47 = vpop.f32.mrb[12].mxu0  ;;  %v2419_v48 = vmul.f32 %v2399_v34, %v2134_v42  ;;  %v3489_v10 = vpop.f32.mrb[33].mxu1 }
 0x1b3   : > { %v2183_v50 = vadd.f32 %v2182_v45, %v2175_v46  ;;  %v3501_v52 = vadd.f32 %v2078_v47, %v4422_v11  ;;  %v3453_v53 = vpop.f32.mrb[13].mxu0  ;;  %v2402_v54 = vpop.f32.mrb[34].mxu1 }
 0x1b4   : > { %v2427_v56 = vadd.f32 %v2426_v38, %v2419_v48  ;;  %v2443_v57 = vmul.f32 %v2419_v48, %v2399_v34  ;;  %v2081_v59 = vpop.f32.mrb[14].mxu0  ;;  %v2420_v60 = vmul.f32 %v2402_v54, %v2139_v27  ;;  %v2997_v61 = vpack.c.bf16 %v2402_v54, %v2399_v34  ;;  %v3490_v62 = vpop.f32.mrb[35].mxu1 }
 0x1b5   : > { %v2152_v63 = vmul.f32 %v3501_v52, %v2134_v42  ;;  %v3502_v0 = vadd.f32 %v2081_v59, %v4424_v51  ;;  %v3454_v43 = vpop.f32.mrb[15].mxu0 }
 0x1b6   : > { %v2451_v37 = vadd.f32 %v2450_v44, %v2443_v57  ;;  %v2428_v49 = vadd.f32 %v2427_v56, %v2420_v60  ;;  %v2444_v2 = vmul.f32 %v2420_v60, %v2402_v54  ;;  %3004 = vst [vmem:[%s4432_s29 + $0x18] sm:$0xff] %v2997_v61  }
 0x1b7   : > { %v2160_v3 = vadd.f32 %v2159_v36, %v2152_v63  ;;  %v2176_v4 = vmul.f32 %v3501_v52, %v2152_v63  ;;  %v2153_v11 = vmul.f32 %v3502_v0, %v2139_v27  ;;  %v2977_v6 = vpack.c.bf16 %v3502_v0, %v3501_v52 }
 0x1b8   : > { %v2452_v58 = vadd.f32 %v2451_v37, %v2444_v2 }
 0x1b9   : > { %v2184_v9 = vadd.f32 %v2183_v50, %v2176_v4  ;;  %v2161_v1 = vadd.f32 %v2160_v3, %v2153_v11  ;;  %v2177_v12 = vmul.f32 %v3502_v0, %v2153_v11  ;;  %3001 = vst [vmem:[%s4437_s9 + $0x18] sm:$0xff] %v2977_v6   ;;  %v2407_v55 = vpop.f32.mrb[36].mxu1 }
 0x1ba   : > { %v2086_v14 = vpop.f32.mrb[16].mxu0  ;;  %v2421_v15 = vmul.f32 %v2407_v55, %v2144_v5  ;;  %v2958_v51 = vpack.c.bf16 %v2407_v55, %v2407_v55  ;;  %v3493_v16 = vpop.f32.mrb[37].mxu1 }
 0x1bb   : > { %v2185_v17 = vadd.f32 %v2184_v9, %v2177_v12  ;;  %v3503_v18 = vadd.f32 %v2086_v14, %v4426_v13  ;;  %v3457_v7 = vpop.f32.mrb[17].mxu0  ;;  %v2410_v19 = vpop.f32.mrb[38].mxu1 }
 0x1bc   : > { %v2429_v20 = vadd.f32 %v2428_v49, %v2421_v15  ;;  %v2445_v21 = vmul.f32 %v2421_v15, %v2407_v55  ;;  %2506 = vst [vmem:[%s4432_s29 + $0x20] sm:$0xf] %v2958_v51  ;;  %v2089_v22 = vpop.f32.mrb[18].mxu0  ;;  %v3494_v23 = vpop.f32.mrb[39].mxu1 }
 0x1bd   : > { %v2154_v24 = vmul.f32 %v3503_v18, %v2144_v5  ;;  %v2949_v26 = vpack.c.bf16 %v3503_v18, %v3503_v18  ;;  %v3458_v28 = vpop.f32.mrb[19].mxu0 }
 0x1be   : > { %v2430_v29 = vrot.slane %v2429_v20, 4  ;;  %v2453_v30 = vadd.f32 %v2452_v58, %v2445_v21 }
 0x1bf   : > { %v2162_v31 = vadd.f32 %v2161_v1, %v2154_v24  ;;  %v2178_v32 = vmul.f32 %v3503_v18, %v2154_v24  ;;  %2239 = vst [vmem:[%s4437_s9 + $0x20] sm:$0xf] %v2949_v26 }
 0x1c0   : > { %v2431_v33 = vadd.f32 %v2430_v29, %v2429_v20  ;;  %v2454_v35 = vrot.slane %v2453_v30, 4 }
 0x1c1   : > { %v2163_v38 = vrot.slane %v2162_v31, 4  ;;  %v2186_v13 = vadd.f32 %v2185_v17, %v2178_v32 }
 0x1c2   : > { %v2432_v39 = vrot.slane %v2431_v33, 2  ;;  %v2455_v25 = vadd.f32 %v2454_v35, %v2453_v30 }
 0x1c3   : > { %v2164_v40 = vadd.f32 %v2163_v38, %v2162_v31  ;;  %v2187_v8 = vrot.slane %v2186_v13, 4 }
 0x1c4   : > { %v2433_v41 = vadd.f32 %v2432_v39, %v2431_v33  ;;  %v2456_v42 = vrot.slane %v2455_v25, 2 }
 0x1c5   : > { %v2165_v44 = vrot.slane %v2164_v40, 2  ;;  %v2188_v45 = vadd.f32 %v2187_v8, %v2186_v13 }
 0x1c6   : > { %v2434_v36 = vrot.slane %v2433_v41, 1  ;;  %v2457_v46 = vadd.f32 %v2456_v42, %v2455_v25 }
 0x1c7   : > { %v2166_v27 = vadd.f32 %v2165_v44, %v2164_v40  ;;  %v2189_v34 = vrot.slane %v2188_v45, 2 }
 0x1c8   : > { %v2435_v47 = vadd.f32 %v2434_v36, %v2433_v41  ;;  %v2458_v48 = vrot.slane %v2457_v46, 1 }
 0x1c9   : > { %v2167_v10 = vrot.slane %v2166_v27, 1  ;;  %v2190_v50 = vadd.f32 %v2189_v34, %v2188_v45 }
 0x1ca   : > { %2436 = vst [vmem:[%s311_s13] sm:$0x1] %v2435_v47  ;;  %v2459_v52 = vadd.f32 %v2458_v48, %v2457_v46 }
 0x1cb   : > { %v2168_v53 = vadd.f32 %v2167_v10, %v2166_v27  ;;  %v2191_v54 = vrot.slane %v2190_v50, 1 }
 0x1cc   : > { %2460 = vst [vmem:[%s311_s13 + $0x1] sm:$0x1] %v2459_v52 }
 0x1cd   : > { %2169 = vst [vmem:[%s307_s25] sm:$0x1] %v2168_v53  ;;  %v2192_v56 = vadd.f32 %v2191_v54, %v2190_v50 }
 0x1cf   : > { %2193 = vst [vmem:[%s307_s25 + $0x1] sm:$0x1] %v2192_v56 }
 0x1d0 PF: > { %s18_s24 = sadd.s32 1, %s3791_s24  }
 0x1d1   : > { %p15_p4 = scmp.ge.s32.totalorder %s18_s24, 4  }
 0x1d3   :  { %17 = sbr.rel (!%p15_p4) target bundleno = 1 (0x1), region = 110 }

// kernel: _lambda_.4
= control target key start
LH: loop header
LB: loop body
LE: loop exit
PB: predicated region body
PF: predicated region fallthrough
CT: control target
= control target key end

     0   :  { %s3635_s24 = smov 0   ;;  %s4394_s0 = inlined_call_operand.vmem [shape: bf16[2,110,128], index: 0, kind: input, shape index: {}]   ;;  %s4395_s1 = inlined_call_operand.vmem [shape: bf16[9,128,128], index: 1, kind: input, shape index: {}]   ;;  %s4396_s2 = inlined_call_operand.vmem [shape: f32[1,128], index: 2, kind: input, shape index: {}]   ;;  %s4397_s3 = inlined_call_operand.vmem [shape: f32[1,128], index: 3, kind: input, shape index: {}]   ;;  %s4398_s4 = inlined_call_operand.vmem [shape: f32[110,1], index: 4, kind: input, shape index: {}]   ;;  %s4399_s5 = inlined_call_operand.vmem [shape: f32[80,1], index: 5, kind: input, shape index: {}]   ;;  %s4400_s6 = inlined_call_operand.vmem [shape: bf16[2,80,128], index: 6, kind: output, shape index: {0}]   ;;  %s4401_s7 = inlined_call_operand.vmem [shape: f32[2,2,128], index: 7, kind: output, shape index: {1}]  }
   0x1 LB: > { %s2495_s25 = sadd.s32 4294967295, %s3590_s24   ;;  %p2499_p0 = scmp.ge.s32.totalorder %s3590_s24, 1  ;;  %s3590_s24 = sphi %s3635_s24, %s18_s24  }
   0x2   : > { %p240_p1 = scmp.lt.s32.totalorder %s3590_s24, 3 }
   0x4   : > { %p241_p2 = pnand %p2499_p0, %p240_p1 }
   0x5   : > { %v377_v0 = vld [vmem:[%s4398_s4 + $0x10] sm:$0xff] (!%p241_p2)  ;;  %v375_v1 = vld [vmem:[%s4398_s4] sm:$0xff] (!%p241_p2)  ;;  %v3592_v2 = vmov (!%p241_p2), 0   ;;  %v378_v3 = vld [vmem:[%s4398_s4 + $0x18] sm:$0xff] (!%p241_p2)  ;;  %v3593_v5 = vmov (!%p241_p2), 0.0   ;;  %vm3594_vm0 = vmmov (!%p241_p2), 0  }
   0x6   : > { %244 = sbr.rel (%p241_p2) target bundleno = 582 (0x246), region = 44  ;;  %3488 = vset.pattern.permute.xlu1 (!%p241_p2), %v3592_v2  ;;  %3487 = vset.pattern.permute.xlu0 (!%p241_p2), %v3592_v2  ;;  %v376_v4 = vld [vmem:[%s4398_s4 + $0x8] sm:$0xff] (!%p241_p2)  ;;  %v379_v7 = vld [vmem:[%s4398_s4 + $0x20] sm:$0xff] (!%p241_p2)  ;;  %v382_v10 = vld [vmem:[%s4398_s4 + $0x38] sm:$0xff] (!%p241_p2)  ;;  %p276_p3 = scmp.lt.s32.totalorder (!%p241_p2), %s2495_s25, 1  ;;  %vm933_vm3 = vcmask (!%p241_p2), 1046528  }
   0x7   : > { %401 = vperm.xlu1 (!%p241_p2), %3488, %v377_v0   ;;  %391 = vperm.xlu0 (!%p241_p2), %3487, %v375_v1   ;;  %v380_v6 = vld [vmem:[%s4398_s4 + $0x28] sm:$0xff] (!%p241_p2)  ;;  %v3489_v8 = vld [vmem:[%s4395_s1 + $0x40] sm:$0xff] (!%p241_p2)   ;;  %v381_v11 = vld [vmem:[%s4398_s4 + $0x30] sm:$0xff] (!%p241_p2)  ;;  %vm615_vm1 = vsmask.f32 (!%p241_p2), 7424  ;;  %vm2099_vm4 = vcmask (!%p241_p2), 1044480  }
   0x8   : > { %2988 = vmatprep.subr.bf16.mxu1 (!%p241_p2), %v3593_v5  ;;  %3132 = vmatprep.subr.bf16.mxu0 (!%p241_p2), %v3593_v5  ;;  %v3490_v9 = vld [vmem:[%s4395_s1 + $0x100] sm:$0xff] (!%p241_p2)   ;;  %v3491_v12 = vld [vmem:[%s4395_s1 + $0x48] sm:$0xff] (!%p241_p2)   ;;  %v3493_v16 = vld [vmem:[%s4395_s1 + $0x50] sm:$0xff] (!%p241_p2)   ;;  %vm1305_vm2 = vsmask.f32 (!%p241_p2), 6400  ;;  %vm1516_vm5 = vcmask (!%p241_p2), 1045504  }
   0x9   : > { %2989 = vmatpush3.bf16.msra.mxu1 (!%p241_p2), %v3489_v8  ;;  %3133 = vmatpush3.bf16.msra.mxu0 (!%p241_p2), %v3490_v9  ;;  %v384_v13 = vld [vmem:[%s4398_s4 + $0x48] sm:$0xff] (!%p241_p2)  ;;  %v383_v14 = vld [vmem:[%s4398_s4 + $0x40] sm:$0xff] (!%p241_p2)  ;;  %v3494_v17 = vld [vmem:[%s4395_s1 + $0x110] sm:$0xff] (!%p241_p2)   ;;  %vm1888_vm6 = vsmask.f32 (!%p241_p2), 5376 }
   0xa   : > { %2990 = vmatprep.subr.bf16.mxu1 (!%p241_p2), %v3593_v5  ;;  %3134 = vmatprep.subr.bf16.mxu0 (!%p241_p2), %v3593_v5  ;;  %v3492_v15 = vld [vmem:[%s4395_s1 + $0x108] sm:$0xff] (!%p241_p2)   ;;  %v386_v18 = vld [vmem:[%s4398_s4 + $0x58] sm:$0xff] (!%p241_p2)  ;;  %v385_v19 = vld [vmem:[%s4398_s4 + $0x50] sm:$0xff] (!%p241_p2) }
   0xb   : > { %406 = vperm.xlu1 (!%p241_p2), %3488, %v378_v3   ;;  %396 = vperm.xlu0 (!%p241_p2), %3487, %v376_v4   ;;  %v3495_v20 = vld [vmem:[%s4395_s1 + $0x58] sm:$0xff] (!%p241_p2)   ;;  %v2247_v22 = vld [vmem:[%s4399_s5] sm:$0xff] (!%p241_p2)  ;;  %v2249_v26 = vld [vmem:[%s4399_s5 + $0x10] sm:$0xff] (!%p241_p2) }
   0xc   : > { %v3496_v21 = vld [vmem:[%s4395_s1 + $0x118] sm:$0xff] (!%p241_p2)   ;;  %v387_v23 = vld [vmem:[%s4398_s4 + $0x60] sm:$0xff] (!%p241_p2)  ;;  %v2248_v27 = vld [vmem:[%s4399_s5 + $0x8] sm:$0xff] (!%p241_p2)  ;;  %3004 = vmatprep.mubr.msk.bf16.mxu1 (!%p241_p2), %vm3594_vm0, %v3593_v5  ;;  %3148 = vmatprep.mubr.msk.bf16.mxu0 (!%p241_p2), %vm3594_vm0, %v3593_v5 }
   0xd   : > { %2991 = vmatpush3.bf16.msra.mxu1 %v3491_v12  ;;  %3135 = vmatpush3.bf16.msra.mxu0 %v3492_v15  ;;  %v3497_v24 = vld [vmem:[%s4395_s1 + $0x60] sm:$0xff]   ;;  %v3499_v28 = vld [vmem:[%s4395_s1 + $0x68] sm:$0xff]   ;;  %v2250_v31 = vld [vmem:[%s4399_s5 + $0x18] sm:$0xff]  ;;  %s4403_s25 = smov (!%p276_p3, %s2495_s25), 1 }
   0xe   : > { %2992 = vmatprep.subr.bf16.mxu1 %v3593_v5  ;;  %3136 = vmatprep.subr.bf16.mxu0 %v3593_v5  ;;  %v3498_v25 = vld [vmem:[%s4395_s1 + $0x120] sm:$0xff]   ;;  %v3500_v29 = vld [vmem:[%s4395_s1 + $0x128] sm:$0xff]   ;;  %v3501_v32 = vld [vmem:[%s4395_s1 + $0x70] sm:$0xff]   ;;  %s3474_s20 = smul.u32 56, %s4403_s25  ;;  %s2502_s18 = sshll.u32 %s4403_s25, 1 }
   0xf   : > { %416 = vperm.xlu1 %3488, %v380_v6   ;;  %411 = vperm.xlu0 %3487, %v379_v7   ;;  %v2251_v30 = vld [vmem:[%s4399_s5 + $0x20] sm:$0xff]  ;;  %v3502_v33 = vld [vmem:[%s4395_s1 + $0x130] sm:$0xff]   ;;  %v2252_v35 = vld [vmem:[%s4399_s5 + $0x28] sm:$0xff]  ;;  %s3475_s14 = smul.u32 40, %s4403_s25  ;;  %s289_s21 = scalar_lea.vmem %s4401_s7, %s2502_s18 }
  0x10   : > { %v2253_v34 = vld [vmem:[%s4399_s5 + $0x30] sm:$0xff]  ;;  %v3503_v36 = vld [vmem:[%s4395_s1 + $0x78] sm:$0xff]   ;;  %v2255_v38 = vld [vmem:[%s4399_s5 + $0x40] sm:$0xff]  ;;  %s3795_s23 = scalar_lea.vmem %s4394_s0, %s3474_s20 }
  0x11   : > { %2993 = vmatpush3.bf16.msra.mxu1 %v3493_v16  ;;  %3137 = vmatpush3.bf16.msra.mxu0 %v3494_v17  ;;  %v3506_v37 = vld [vmem:[%s4395_s1 + $0x138] sm:$0xff]   ;;  %v388_v40 = vld [vmem:[%s4398_s4 + $0x68] sm:$0x3f]  ;;  %v2779_v43 = vld [vmem:[%s3795_s23] sm:$0xff]   ;;  %s4366_s17 = scalar_lea.vmem %s4400_s6, %s3475_s14 }
  0x12   : > { %2994 = vmatprep.subr.bf16.mxu1 %v3593_v5  ;;  %3138 = vmatprep.subr.bf16.mxu0 %v3593_v5  ;;  %v2254_v39 = vld [vmem:[%s4399_s5 + $0x38] sm:$0xff]  ;;  %v2256_v41 = vld [vmem:[%s4399_s5 + $0x48] sm:$0xff]  ;;  %v2858_v44 = vld [vmem:[%s3795_s23 + $0x10] sm:$0xff]   ;;  %v2780_v46 = vunpack.c.l.bf16 %v2779_v43  ;;  %v2781_v48 = vunpack.c.h.bf16 %v2779_v43 }
  0x13   : > { %426 = vperm.xlu1 %3488, %v382_v10   ;;  %421 = vperm.xlu0 %3487, %v381_v11   ;;  %v2857_v42 = vld [vmem:[%s3795_s23 + $0x8] sm:$0xff]   ;;  %v3803_v49 = vld [vmem:[%s4396_s2] ss:$0 sm:$0xff]  ;;  %v2789_v50 = vunpack.c.h.bf16 %v2858_v44  ;;  %v2788_v51 = vunpack.c.l.bf16 %v2858_v44  ;;  %v2859_v52 = vld [vmem:[%s3795_s23 + $0x18] sm:$0xff]  }
  0x14   : > { %v2784_v45 = vunpack.c.l.bf16 %v2857_v42  ;;  %v2785_v47 = vunpack.c.h.bf16 %v2857_v42  ;;  %v326_v54 = vmul.f32 %v2780_v46, %v3803_v49  ;;  %v327_v56 = vmul.f32 %v2781_v48, %v3803_v49  ;;  %v3813_v57 = vld [vmem:[%s4397_s3] ss:$0 sm:$0xff]  ;;  %v2861_v12 = vld [vmem:[%s3795_s23 + $0x28] sm:$0xff]  }
  0x15   : > { %2995 = vmatpush3.bf16.msra.mxu1 %v3495_v20  ;;  %3139 = vmatpush3.bf16.msra.mxu0 %v3496_v21  ;;  %v331_v58 = vmul.f32 %v2789_v50, %v3803_v49  ;;  %v330_v59 = vmul.f32 %v2788_v51, %v3803_v49  ;;  %v2793_v60 = vunpack.c.h.bf16 %v2859_v52  ;;  %v2792_v61 = vunpack.c.l.bf16 %v2859_v52  ;;  %v2860_v2 = vld [vmem:[%s3795_s23 + $0x20] sm:$0xff]  }
  0x16   : > { %2996 = vmatprep.subr.bf16.mxu1 %v3593_v5  ;;  %3140 = vmatprep.subr.bf16.mxu0 %v3593_v5  ;;  %v328_v53 = vmul.f32 %v2784_v45, %v3803_v49  ;;  %v329_v55 = vmul.f32 %v2785_v47, %v3803_v49  ;;  %v347_v63 = vadd.f32 %v3813_v57, %v326_v54  ;;  %v2797_v10 = vunpack.c.h.bf16 %v2860_v2 }
  0x17   : > { %436 = vperm.xlu1 %3488, %v384_v13   ;;  %431 = vperm.xlu0 %3487, %v383_v14   ;;  %v348_v1 = vadd.f32 %v3813_v57, %v327_v56  ;;  %v352_v3 = vadd.f32 %v3813_v57, %v331_v58  ;;  %v351_v4 = vadd.f32 %v3813_v57, %v330_v59  ;;  %v2796_v11 = vunpack.c.l.bf16 %v2860_v2 }
  0x18   : > { %v349_v62 = vadd.f32 %v3813_v57, %v328_v53  ;;  %v350_v0 = vadd.f32 %v3813_v57, %v329_v55  ;;  %v333_v6 = vmul.f32 %v2793_v60, %v3803_v49  ;;  %v332_v9 = vmul.f32 %v2792_v61, %v3803_v49 }
  0x19   : > { %2997 = vmatpush3.bf16.msra.mxu1 %v3497_v24  ;;  %3141 = vmatpush3.bf16.msra.mxu0 %v3498_v25  ;;  %v361_v14 = vmax.f32 %v347_v63, 0.0  ;;  %v362_v16 = vmax.f32 %v348_v1, 0.0  ;;  %v366_v17 = vmax.f32 %v352_v3, 0.0  ;;  %v2801_v20 = vunpack.c.h.bf16 %v2861_v12 }
  0x1a   : > { %2998 = vmatprep.subr.bf16.mxu1 %v3593_v5  ;;  %3142 = vmatprep.subr.bf16.mxu0 %v3593_v5  ;;  %v363_v13 = vmax.f32 %v349_v62, 0.0  ;;  %v364_v15 = vmax.f32 %v350_v0, 0.0  ;;  %v335_v24 = vmul.f32 %v2797_v10, %v3803_v49  ;;  %v334_v25 = vmul.f32 %v2796_v11, %v3803_v49 }
  0x1b   : > { %446 = vperm.xlu1 %3488, %v386_v18   ;;  %441 = vperm.xlu0 %3487, %v385_v19   ;;  %v365_v18 = vmax.f32 %v351_v4, 0.0  ;;  %v354_v19 = vadd.f32 %v3813_v57, %v333_v6 }
  0x1c   : > { %v355_v43 = vadd.f32 %v3813_v57, %v334_v25 }
  0x1d   : > { %2999 = vmatpush3.bf16.msra.mxu1 %v3499_v28  ;;  %3143 = vmatpush3.bf16.msra.mxu0 %v3500_v29 }
  0x1e   : > { %3000 = vmatprep.subr.bf16.mxu1 %v3593_v5  ;;  %3144 = vmatprep.subr.bf16.mxu0 %v3593_v5  ;;  %v369_v54 = vmax.f32 %v355_v43, 0.0 }
  0x1f   : > { %2259 = vperm.xlu1 %3488, %v2247_v22   ;;  %451 = vperm.xlu0 %3487, %v387_v23   ;;  %v353_v23 = vadd.f32 %v3813_v57, %v332_v9 }
  0x21   : > { %3001 = vmatpush3.bf16.msra.mxu1 %v3501_v32  ;;  %3145 = vmatpush3.bf16.msra.mxu0 %v3502_v33 }
  0x22   : > { %3002 = vmatprep.subr.bf16.mxu1 %v3593_v5  ;;  %3146 = vmatprep.subr.bf16.mxu0 %v3593_v5 }
  0x23   : > { %2269 = vperm.xlu1 %3488, %v2249_v26   ;;  %2264 = vperm.xlu0 %3487, %v2248_v27   ;;  %v2800_v26 = vunpack.c.l.bf16 %v2861_v12 }
  0x25   : > { %3003 = vmatpush3.bf16.msra.mxu1 %v3503_v36  ;;  %3147 = vmatpush3.bf16.msra.mxu0 %v3506_v37  ;;  %v368_v37 = vmax.f32 %v354_v19, 0.0  ;;  %v336_v44 = vmul.f32 %v2800_v26, %v3803_v49  ;;  %v3511_v26 = vld [vmem:[%s4395_s1] sm:$0xff]  }
  0x26   : > { %3168 = vmatprep.subr.bf16.mxu0 %v3593_v5  ;;  %3024 = vmatprep.subr.bf16.mxu1 %v3593_v5 }
  0x27   : > { %2279 = vperm.xlu1 %3488, %v2251_v30   ;;  %2274 = vperm.xlu0 %3487, %v2250_v31   ;;  %v303_v31 = vld [vmem:[%s3795_s23 + $0x30] sm:$0xf]  ;;  %v357_v55 = vadd.f32 %v3813_v57, %v336_v44 }
  0x29   : > { %v371_v2 = vmax.f32 %v357_v55, 0.0 }
  0x2b   : > { %2289 = vperm.xlu1 %3488, %v2253_v34   ;;  %2284 = vperm.xlu0 %3487, %v2252_v35   ;;  %v337_v34 = vmul.f32 %v2801_v20, %v3803_v49 }
  0x2d   : > { %v358_v46 = vadd.f32 %v3813_v57, %v337_v34 }
  0x2f   : > { %2299 = vperm.xlu1 %3488, %v2255_v38   ;;  %2294 = vperm.xlu0 %3487, %v2254_v39   ;;  %v367_v38 = vmax.f32 %v353_v23, 0.0  ;;  %v356_v39 = vadd.f32 %v3813_v57, %v335_v24  ;;  %v372_v58 = vmax.f32 %v358_v46, 0.0 }
  0x31   : > { %v370_v50 = vmax.f32 %v356_v39, 0.0  ;;  %v3509_v39 = vld [vmem:[%s4395_s1 + $0x140] sm:$0xff]  }
  0x33   : > { %456 = vperm.xlu1 %3488, %v388_v40   ;;  %2304 = vperm.xlu0 %3487, %v2256_v41   ;;  %v317_v40 = vunpack.c.l.bf16 %v303_v31 }
  0x35   : > { %v338_v51 = vmul.f32 %v3803_v49, %v317_v40  ;;  %v3514_v40 = vld [vmem:[%s4395_s1 + $0x8] sm:$0xff]  }
  0x37   : > { %v359_v61 = vadd.f32 %v3813_v57, %v338_v51 }
  0x39   : > { %v373_v11 = vmax.f32 %v359_v61, 0.0 }
  0x86   : > { %v402_v7 = vpop.permute.xlu1 %401  ;;  %v392_v8 = vpop.permute.xlu0 %391 }
  0x87   : > { %v461_v27 = vmul.f32 %v402_v7, %v363_v13  ;;  %v459_v28 = vmul.f32 %v392_v8, %v361_v14 }
  0x8a   : > { %v407_v21 = vpop.permute.xlu1 %406  ;;  %v397_v22 = vpop.permute.xlu0 %396 }
  0x8b   : > { %v462_v29 = vmul.f32 %v407_v21, %v364_v15  ;;  %v460_v30 = vmul.f32 %v397_v22, %v362_v16 }
  0x8d   : > { %v2810_v32 = vpack.c.bf16 %v462_v29, %v461_v27  ;;  %v2805_v33 = vpack.c.bf16 %v460_v30, %v459_v28 }
  0x8e   : > { %v417_v35 = vpop.permute.xlu1 %416  ;;  %v412_v36 = vpop.permute.xlu0 %411 }
  0x8f   : > { %2862 = vst [vmem:[#allocation2 + $0x8] sm:$0xff] %v2810_v32   ;;  %2806 = vst [vmem:[#allocation2] sm:$0xff] %v2805_v33   ;;  %v464_v41 = vmul.f32 %v417_v35, %v366_v17  ;;  %v463_v42 = vmul.f32 %v412_v36, %v365_v18 }
  0x91   : > { %v2815_v45 = vpack.c.bf16 %v464_v41, %v463_v42 }
  0x92   : > { %v427_v47 = vpop.permute.xlu1 %426  ;;  %v422_v48 = vpop.permute.xlu0 %421 }
  0x93   : > { %2863 = vst [vmem:[#allocation2 + $0x10] sm:$0xff] %v2815_v45   ;;  %v466_v52 = vmul.f32 %v427_v47, %v368_v37  ;;  %v465_v53 = vmul.f32 %v422_v48, %v367_v38 }
  0x95   : > { %v2820_v56 = vpack.c.bf16 %v466_v52, %v465_v53  ;;  %v3512_v53 = vld [vmem:[%s4395_s1 + $0x148] sm:$0xff]  }
  0x96   : > { %v437_v59 = vpop.permute.xlu1 %436  ;;  %v432_v60 = vpop.permute.xlu0 %431  ;;  %v543_v62 = vld [vmem:[#allocation2] sm:$0xf]  ;;  %v3840_v63 = vld [vmem:[#allocation2 + $0x4] sm:$0xf]  ;;  %v3845_v3 = vld [vmem:[#allocation2 + $0x8] sm:$0xff]  }
  0x97   : > { %2864 = vst [vmem:[#allocation2 + $0x18] sm:$0xff] %v2820_v56   ;;  %v468_v0 = vmul.f32 %v437_v59, %v370_v50  ;;  %v467_v1 = vmul.f32 %v432_v60, %v369_v54  ;;  %v3843_v49 = vcombine.low %v543_v62, %v3840_v63  ;;  %v1081_v4 = vld [vmem:[#allocation2 + $0x4] sm:$0xe]  ;;  %v3847_v6 = vld [vmem:[#allocation2 + $0x8] sm:$0xf]  ;;  %v624_v57 = vshll.u32 %v3845_v3, 16 }
  0x98   : > { %v3852_v12 = vcombine.low %v1081_v4, %v3847_v6  ;;  %v628_v46 = vshrl.u32 %v3845_v3, 16  ;;  %v912_v56 = vld [vmem:[#allocation2] sm:$0xe]  ;;  %v3517_v60 = vld [vmem:[%s4395_s1 + $0x10] sm:$0xff]  }
  0x99   : > { %v2825_v7 = vpack.c.bf16 %v468_v0, %v467_v1  ;;  %v619_v8 = vshll.u32 %v3843_v49, 16  ;;  %v617_v16 = vshrl.u32 %v3843_v49, 16  ;;  %v626_v25 = vrot.slane %v624_v57, 1  ;;  %v3515_v1 = vld [vmem:[%s4395_s1 + $0x150] sm:$0xff]  }
  0x9a   : > { %v447_v9 = vpop.permute.xlu1 %446  ;;  %v442_v10 = vpop.permute.xlu0 %441  ;;  %v3854_v13 = vld [vmem:[#allocation2 + $0xc] sm:$0xff]   ;;  %v1307_v19 = vshrl.u32 %v3852_v12, 16  ;;  %v1310_v20 = vshll.u32 %v3852_v12, 16 }
  0x9b   : > { %2865 = vst [vmem:[#allocation2 + $0x20] sm:$0xff] %v2825_v7   ;;  %v470_v14 = vmul.f32 %v447_v9, %v372_v58  ;;  %v469_v15 = vmul.f32 %v442_v10, %v371_v2  ;;  %v621_v17 = vrot.slane %v619_v8, 1  ;;  %v3857_v18 = vld [vmem:[#allocation2 + $0x10] sm:$0xff]   ;;  %v1315_v21 = vshrl.u32 %v3854_v13, 16  ;;  %v3520_v7 = vld [vmem:[%s4395_s1 + $0x18] sm:$0xff]  }
  0x9c   : > { %v1318_v22 = vshll.u32 %v3854_v13, 16  ;;  %v1309_v29 = vrot.slane %v1307_v19, 1  ;;  %v1312_v30 = vrot.slane %v1310_v20, 2  ;;  %v632_v35 = vshll.u32 %v3857_v18, 16 }
  0x9d   : > { %v2830_v23 = vpack.c.bf16 %v470_v14, %v469_v15  ;;  %v622_v24 = vor.u32 %v621_v17, %v617_v16  ;;  %v1317_v31 = vrot.slane %v1315_v21, 1  ;;  %v630_v54 = vor.u32 %v628_v46, %v626_v25  ;;  %v3518_v15 = vld [vmem:[%s4395_s1 + $0x158] sm:$0xff]  }
  0x9e   : > { %v3866_v27 = vpop.permute.xlu1 %2259  ;;  %v452_v28 = vpop.permute.xlu0 %451  ;;  %v1320_v32 = vrot.slane %v1318_v22, 2  ;;  %v3870_v36 = vld [vmem:[#allocation2 + $0x14] sm:$0xff]   ;;  %v1313_v37 = vor.u32 %v1312_v30, %v1309_v29  ;;  %v634_v48 = vrot.slane %v632_v35, 1  ;;  %v2573_v2 = vcombine.low %v912_v56, %v3840_v63  ;;  %v3523_v22 = vld [vmem:[%s4395_s1 + $0x20] sm:$0xff]  }
  0x9f   : > { %2866 = vst [vmem:[#allocation2 + $0x28] sm:$0xff] %v2830_v23   ;;  %v471_v33 = vmul.f32 %v452_v28, %v373_v11  ;;  %v627_v34 = vsel %vm615_vm1, %v622_v24, %v626_v25  ;;  %v1324_v42 = vshrl.u32 %v3870_v36, 16  ;;  %v1327_v43 = vshll.u32 %v3870_v36, 16  ;;  %v3889_v52 = vld [vmem:[#allocation2 + $0x18] sm:$0xff]  }
  0xa0   : > { %3005 = vmatmul.mubr.bf16.vlgmr.msra.gmra.mrb[0].mxu1 %v627_v34  ;;  %v1321_v38 = vor.u32 %v1320_v32, %v1317_v31  ;;  %v635_v62 = vsel %vm615_vm1, %v630_v54, %v634_v48  ;;  %v640_v0 = vshll.u32 %v3889_v52, 16  ;;  %v636_v63 = vshrl.u32 %v3857_v18, 16  ;;  %v3522_v31 = vld [vmem:[%s4395_s1 + $0x160] sm:$0xff]   ;;  %v3528_v54 = vld [vmem:[%s4395_s1 + $0x30] sm:$0xff]  }
  0xa1   : > { %v2766_v41 = vpack.c.bf16 %v471_v33, %v471_v33  ;;  %3008 = vmatprep.mubr.msk.bf16.mxu1 %vm3594_vm0, %v3593_v5  ;;  %3025 = vmatpush3.bf16.msra.mxu1 %v3511_v26  ;;  %v1326_v50 = vrot.slane %v1324_v42, 1  ;;  %v1329_v51 = vrot.slane %v1327_v43, 2  ;;  %v934_v16 = vrot.slane %v2573_v2, 1 }
  0xa2   : > { %v3882_v44 = vpop.permute.xlu1 %2269  ;;  %v1322_v45 = vsel %vm1305_vm2, %v1313_v37, %v1321_v38  ;;  %3026 = vmatprep.subr.bf16.mxu1 %v3593_v5  ;;  %v3887_v47 = vld [vmem:[#allocation2 + $0x1c] sm:$0xff]   ;;  %v642_v11 = vrot.slane %v640_v0, 1  ;;  %v935_v17 = vrot.slane %v3845_v3, 1  ;;  %v638_v19 = vor.u32 %v636_v63, %v634_v48 }
  0xa3   : > { %541 = vst [vmem:[#allocation2 + $0x30] sm:$0xf] %v2766_v41  ;;  %3149 = vmatmul.mubr.bf16.vlgmr.msra.gmra.mrb[0].mxu0 %v1322_v45  ;;  %v1333_v55 = vshrl.u32 %v3887_v47, 16  ;;  %v1330_v59 = vor.u32 %v1329_v51, %v1326_v50  ;;  %v1336_v61 = vshll.u32 %v3887_v47, 16  ;;  %v3924_v14 = vld [vmem:[#allocation2 + $0x20] sm:$0xff]   ;;  %v937_v29 = vrot.slane %v3857_v18, 1 }
  0xa4   : > { %3169 = vmatpush3.bf16.msra.mxu0 %v3509_v39  ;;  %3152 = vmatprep.mubr.msk.bf16.mxu0 %vm3594_vm0, %v3593_v5  ;;  %v3941_v25 = vsel %vm933_vm3, %v934_v16, %v935_v17  ;;  %v643_v26 = vsel %vm615_vm1, %v638_v19, %v642_v11  ;;  %v648_v28 = vshll.u32 %v3924_v14, 16  ;;  %v939_v30 = vrot.slane %v3889_v52, 1  ;;  %v3526_v45 = vld [vmem:[%s4395_s1 + $0x168] sm:$0xff]   ;;  %v3532_v16 = vld [vmem:[%s4395_s1 + $0x178] sm:$0xff]  }
  0xa5   : > { %3170 = vmatprep.subr.bf16.mxu0 %v3593_v5  ;;  %3027 = vmatpush3.bf16.msra.mxu1 %v3514_v40  ;;  %v1335_v4 = vrot.slane %v1333_v55, 1  ;;  %v1331_v57 = vsel %vm1305_vm2, %v1321_v38, %v1330_v59  ;;  %v1338_v9 = vrot.slane %v1336_v61, 2  ;;  %v3955_v32 = vsel %vm933_vm3, %v935_v17, %v937_v29  ;;  %v3525_v38 = vld [vmem:[%s4395_s1 + $0x28] sm:$0xff]   ;;  %v4015_v17 = vld [vmem:[#allocation2 + $0x10] sm:$0xff]  }
  0xa6   : > { %v3898_v58 = vpop.permute.xlu1 %2279  ;;  %3028 = vmatprep.subr.bf16.mxu1 %v3593_v5  ;;  %v3920_v10 = vld [vmem:[#allocation2 + $0x24] sm:$0xff]   ;;  %v3961_v39 = vld [vmem:[#allocation2 + $0x2c] ss:$0 sps:$4 sm:$0x33]   ;;  %v3966_v40 = vsel %vm933_vm3, %v937_v29, %v939_v30  ;;  %v644_v41 = vshrl.u32 %v3889_v52, 16  ;;  %v650_v42 = vrot.slane %v648_v28, 1 }
  0xa7   : > { %v1339_v21 = vor.u32 %v1338_v9, %v1335_v4  ;;  %v1342_v23 = vshrl.u32 %v3920_v10, 16  ;;  %v1345_v24 = vshll.u32 %v3920_v10, 16  ;;  %v3970_v43 = vld [vmem:[#allocation2 + $0x28] ss:$0 sps:$4 sm:$0x11]   ;;  %v1137_v46 = vrot.slane %v3852_v12, 1 }
  0xa8   : > { %3009 = vmatmul.mubr.bf16.gmra.mrb[4].mxu1 %v635_v62  ;;  %3171 = vmatpush3.bf16.msra.mxu0 %v3512_v53  ;;  %v1138_v48 = vrot.slane %v3854_v13, 1  ;;  %v646_v50 = vor.u32 %v644_v41, %v642_v11  ;;  %v1140_v51 = vrot.slane %v3870_v36, 1  ;;  %v1351_v55 = vshrl.u32 %v3961_v39, 16  ;;  %v3529_v62 = vld [vmem:[%s4395_s1 + $0x170] sm:$0xff]   ;;  %v3531_v9 = vld [vmem:[%s4395_s1 + $0x38] sm:$0xff]  }
  0xa9   : > { %3172 = vmatprep.subr.bf16.mxu0 %v3593_v5  ;;  %3012 = vmatprep.mubr.msk.bf16.mxu1 %vm3594_vm0, %v3593_v5  ;;  %v1340_v34 = vsel %vm1305_vm2, %v1330_v59, %v1339_v21  ;;  %v1344_v35 = vrot.slane %v1342_v23, 1  ;;  %v1347_v37 = vrot.slane %v1345_v24, 2  ;;  %v1354_v56 = vshll.u32 %v3961_v39, 16  ;;  %v2078_v24 = vld [vmem:[#allocation2 + $0x8] sm:$0x8] }
  0xaa   : > { %v3917_v8 = vpop.permute.xlu1 %2289  ;;  %3029 = vmatpush3.bf16.msra.mxu1 %v3517_v60  ;;  %v3987_v59 = vsel %vm933_vm3, %v1137_v46, %v1138_v48  ;;  %v651_v12 = vsel %vm615_vm1, %v646_v50, %v650_v42  ;;  %v656_v60 = vshll.u32 %v3970_v43, 16  ;;  %v3993_v61 = vsel %vm933_vm3, %v1138_v48, %v1140_v51  ;;  %v3535_v48 = vld [vmem:[%s4395_s1 + $0x80] sm:$0xff]  }
  0xab   : > { %3153 = vmatmul.mubr.bf16.gmra.mrb[4].mxu0 %v1331_v57  ;;  %3030 = vmatprep.subr.bf16.mxu1 %v3593_v5  ;;  %v1348_v53 = vor.u32 %v1347_v37, %v1344_v35  ;;  %v1142_v0 = vrot.slane %v3887_v47, 1  ;;  %v1144_v2 = vrot.slane %v3920_v10, 1  ;;  %v1356_v57 = vrot.slane %v1354_v56, 2  ;;  %v1495_v37 = vld [vmem:[#allocation2 + $0x4] sm:$0xc]  ;;  %v3538_v56 = vld [vmem:[%s4395_s1 + $0x190] sm:$0xff]  }
  0xac   : > { %3173 = vmatpush3.bf16.msra.mxu0 %v3515_v1  ;;  %3156 = vmatprep.mubr.msk.bf16.mxu0 %vm3594_vm0, %v3593_v5  ;;  %v3579_v1 = vld [vmem:[#allocation2 + $0x2c] ss:$0 sps:$4 sm:$0x11]   ;;  %v652_v11 = vshrl.u32 %v3924_v14, 16  ;;  %v2653_v46 = vcombine.low %v1495_v37, %v3847_v6  ;;  %v1518_v50 = vrot.slane %v3854_v13, 2  ;;  %v1520_v13 = vrot.slane %v3870_v36, 2 }
  0xad   : > { %3174 = vmatprep.subr.bf16.mxu0 %v3593_v5  ;;  %v1349_v4 = vsel %vm1305_vm2, %v1339_v21, %v1348_v53  ;;  %v4008_v63 = vsel %vm933_vm3, %v1140_v51, %v1142_v0  ;;  %v4018_v19 = vsel %vm933_vm3, %v1142_v0, %v1144_v2  ;;  %v4022_v21 = vld [vmem:[#allocation2 + $0xc] sm:$0xf]  ;;  %v1146_v23 = vrot.slane %v3579_v1, 1  ;;  %v3542_v0 = vld [vmem:[%s4395_s1 + $0x1a0] sm:$0xff]   ;;  %v3558_v37 = vld [vmem:[%s4395_s1 + $0x1d0] sm:$0xff]  }
  0xae   : > { %v3933_v20 = vpop.permute.xlu1 %2299  ;;  %3031 = vmatpush3.bf16.msra.mxu1 %v3520_v7  ;;  %v1353_v7 = vrot.slane %v1351_v55, 1  ;;  %v1517_v51 = vrot.slane %v2653_v46, 2  ;;  %v3537_v6 = vld [vmem:[%s4395_s1 + $0x88] sm:$0xff]   ;;  %v3539_v55 = vld [vmem:[%s4395_s1 + $0x90] sm:$0xff]   ;;  %v1521_v36 = vsel %vm1516_vm5, %v1518_v50, %v1520_v13  ;;  %v3562_v46 = vld [vmem:[%s4395_s1 + $0xd8] sm:$0xff]  }
  0xaf   : > { %3032 = vmatprep.subr.bf16.mxu1 %v3593_v5  ;;  %v4028_v29 = vsel %vm933_vm3, %v1144_v2, %v1146_v23  ;;  %v3544_v1 = vld [vmem:[%s4395_s1 + $0xa8] sm:$0xff]   ;;  %v1524_v2 = vrot.slane %v3920_v10, 2  ;;  %v3554_v23 = vld [vmem:[%s4395_s1 + $0xc0] sm:$0xff]  }
  0xb0   : > { %3013 = vmatmul.mubr.bf16.gmra.mrb[8].mxu1 %v643_v26  ;;  %3175 = vmatpush3.bf16.msra.mxu0 %v3518_v15  ;;  %v658_v15 = vrot.slane %v656_v60, 1  ;;  %v654_v26 = vor.u32 %v652_v11, %v650_v42  ;;  %v1357_v28 = vor.u32 %v1356_v57, %v1353_v7  ;;  %v1522_v60 = vrot.slane %v3887_v47, 2  ;;  %v3547_v7 = vld [vmem:[%s4395_s1 + $0x1b0] sm:$0xff]   ;;  %v3548_v57 = vld [vmem:[%s4395_s1 + $0xb8] sm:$0xff]  }
  0xb1   : > { %3016 = vmatprep.mubr.msk.bf16.mxu1 %vm3594_vm0, %v3593_v5  ;;  %3176 = vmatprep.subr.bf16.mxu0 %v3593_v5  ;;  %v1526_v11 = vrot.slane %v3961_v39, 2 }
  0xb2   : > { %v457_v33 = vpop.permute.xlu1 %456  ;;  %3033 = vmatpush3.bf16.msra.mxu1 %v3523_v22  ;;  %v4024_v22 = vld [vmem:[#allocation2 + $0x18] sm:$0xff]   ;;  %v1358_v41 = vsel %vm1305_vm2, %v1348_v53, %v1357_v28  ;;  %v3534_v53 = vld [vmem:[%s4395_s1 + $0x180] sm:$0xff]   ;;  %v1523_v47 = vsel %vm1516_vm5, %v1520_v13, %v1522_v60  ;;  %v1525_v10 = vsel %vm1516_vm5, %v1522_v60, %v1524_v2 }
  0xb3   : > { %3157 = vmatmul.mubr.bf16.gmra.mrb[8].mxu0 %v1340_v34  ;;  %3034 = vmatprep.subr.bf16.mxu1 %v3593_v5  ;;  %v2733_v33 = vcombine.low %v2078_v24, %v4022_v21  ;;  %v2101_v34 = vrot.slane %v4015_v17, 3  ;;  %v2103_v35 = vrot.slane %v4024_v22, 3  ;;  %v1721_v24 = vrot.slane %v4015_v17, 2  ;;  %v3553_v28 = vld [vmem:[%s4395_s1 + $0x1c0] sm:$0xff]  }
  0xb4   : > { %3177 = vmatpush3.bf16.msra.mxu0 %v3522_v31  ;;  %3160 = vmatprep.mubr.msk.bf16.mxu0 %vm3594_vm0, %v3593_v5  ;;  %v659_v31 = vsel %vm615_vm1, %v654_v26, %v658_v15  ;;  %v1664_v15 = vld [vmem:[#allocation2 + $0x8] sm:$0xc] }
  0xb5   : > { %3178 = vmatprep.subr.bf16.mxu0 %v3593_v5  ;;  %v4042_v42 = vsel %vm2099_vm4, %v2101_v34, %v2103_v35  ;;  %v4150_v39 = vcombine.low %v1664_v15, %v4022_v21  ;;  %v3557_v21 = vld [vmem:[%s4395_s1 + $0xc8] sm:$0xff]  }
  0xb6   : > { %3035 = vmatpush3.bf16.msra.mxu1 %v3525_v38  ;;  %v2100_v38 = vrot.slane %v2733_v33, 3  ;;  %v1723_v33 = vrot.slane %v4024_v22, 2 }
  0xb7   : > { %3036 = vmatprep.subr.bf16.mxu1 %v3593_v5  ;;  %v1720_v26 = vrot.slane %v4150_v39, 2 }
  0xb8   : > { %3017 = vmatmul.mubr.bf16.gmra.mrb[12].mxu1 %v651_v12  ;;  %3179 = vmatpush3.bf16.msra.mxu0 %v3526_v45  ;;  %v4045_v45 = vsel %vm2099_vm4, %v2100_v38, %v2101_v34  ;;  %v3541_v12 = vld [vmem:[%s4395_s1 + $0x98] sm:$0xff]   ;;  %v3559_v34 = vld [vmem:[%s4395_s1 + $0xd0] sm:$0xff]   ;;  %v1724_v38 = vsel %vm1516_vm5, %v1721_v24, %v1723_v33 }
  0xb9   : > { %3020 = vmatprep.mubr.msk.bf16.mxu1 %vm3594_vm0, %v3593_v5  ;;  %3180 = vmatprep.subr.bf16.mxu0 %v3593_v5 }
  0xba   : > { %3037 = vmatpush3.bf16.msra.mxu1 %v3528_v54  ;;  %v1519_v54 = vsel %vm1516_vm5, %v1517_v51, %v1518_v50  ;;  %v3564_v50 = vld [vmem:[%s4395_s1 + $0xe0] sm:$0xff]  }
  0xbb   : > { %3161 = vmatmul.mubr.bf16.gmra.mrb[12].mxu0 %v1349_v4  ;;  %3038 = vmatprep.subr.bf16.mxu1 %v3593_v5  ;;  %v3546_v4 = vld [vmem:[%s4395_s1 + $0xb0] sm:$0xff]   ;;  %v3563_v51 = vld [vmem:[%s4395_s1 + $0x1e0] sm:$0xff]  }
  0xbc   : > { %3181 = vmatpush3.bf16.msra.mxu0 %v3529_v62  ;;  %3164 = vmatprep.mubr.msk.bf16.mxu0 %vm3594_vm0, %v3593_v5  ;;  %v3543_v62 = vld [vmem:[%s4395_s1 + $0xa0] sm:$0xff]  }
  0xbd   : > { %3182 = vmatprep.subr.bf16.mxu0 %v3593_v5 }
  0xbe   : > { %3039 = vmatpush3.bf16.msra.mxu1 %v3531_v9  ;;  %v3549_v9 = vld [vmem:[%s4395_s1 + $0x1b8] sm:$0xff]  }
  0xbf   : > { %3060 = vmatprep.subr.bf16.mxu1 %v3593_v5 }
  0xc0   : > { %3021 = vmatmul.mubr.bf16.gmra.mrb[16].mxu1 %v659_v31  ;;  %3183 = vmatpush3.bf16.msra.mxu0 %v3532_v16  ;;  %v1527_v16 = vsel %vm1516_vm5, %v1524_v2, %v1526_v11  ;;  %v1722_v31 = vsel %vm1516_vm5, %v1720_v26, %v1721_v24  ;;  %v1910_v11 = vshll.u32 %v4024_v22, 16  ;;  %v3575_v26 = vld [vmem:[%s4395_s1 + $0x210] sm:$0xff]  }
  0xc1   : > { %3040 = vmatprep.mubr.msk.bf16.mxu1 %vm3594_vm0, %v3593_v5  ;;  %3204 = vmatprep.subr.bf16.mxu0 %v3593_v5 }
  0xc2   : > { %v1912_v24 = vrot.slane %v1910_v11, 3 }
  0xc3   : > { %3165 = vmatmul.mubr.bf16.gmra.mrb[16].mxu0 %v1358_v41  ;;  %v4187_v41 = vld [vmem:[#allocation2 + $0x20] sm:$0xff]  }
  0xc4   : > { %3184 = vmatprep.mubr.msk.bf16.mxu0 %vm3594_vm0, %v3593_v5 }
  0xc8   : > { %3041 = vmatmul.mubr.bf16.vlgmr.msra.gmra.mrb[0].mxu1 %v3843_v49  ;;  %v3536_v49 = vld [vmem:[%s4395_s1 + $0x188] sm:$0xff]  }
  0xc9   : > { %3044 = vmatprep.mubr.msk.bf16.mxu1 %vm3594_vm0, %v3593_v5  ;;  %3061 = vmatpush3.bf16.msra.mxu1 %v3535_v48  ;;  %v1725_v48 = vrot.slane %v4187_v41, 2 }
  0xca   : > { %3062 = vmatprep.subr.bf16.mxu1 %v3593_v5 }
  0xcb   : > { %3185 = vmatmul.mubr.bf16.vlgmr.msra.gmra.mrb[0].mxu0 %v1519_v54  ;;  %v3566_v54 = vld [vmem:[%s4395_s1 + $0xe8] sm:$0xff]  }
  0xcc   : > { %3205 = vmatpush3.bf16.msra.mxu0 %v3534_v53  ;;  %3188 = vmatprep.mubr.msk.bf16.mxu0 %vm3594_vm0, %v3593_v5  ;;  %v1726_v53 = vsel %vm1516_vm5, %v1723_v33, %v1725_v48 }
  0xcd   : > { %3206 = vmatprep.subr.bf16.mxu0 %v3593_v5  ;;  %3063 = vmatpush3.bf16.msra.mxu1 %v3537_v6  ;;  %v4212_v6 = vld [vmem:[#allocation2 + $0x28] sm:$0xff]  }
  0xce   : > { %3064 = vmatprep.subr.bf16.mxu1 %v3593_v5  ;;  %v1727_v13 = vrot.slane %v4212_v6, 2 }
  0xd0   : > { %3045 = vmatmul.mubr.bf16.gmra.mrb[4].mxu1 %v3845_v3  ;;  %3207 = vmatpush3.bf16.msra.mxu0 %v3536_v49  ;;  %v3540_v3 = vld [vmem:[%s4395_s1 + $0x198] sm:$0xff]   ;;  %v3567_v49 = vld [vmem:[%s4395_s1 + $0x1e8] sm:$0xff]  }
  0xd1   : > { %3208 = vmatprep.subr.bf16.mxu0 %v3593_v5  ;;  %3048 = vmatprep.mubr.msk.bf16.mxu1 %vm3594_vm0, %v3593_v5 }
  0xd2   : > { %3065 = vmatpush3.bf16.msra.mxu1 %v3539_v55  ;;  %v3568_v55 = vld [vmem:[%s4395_s1 + $0xf0] sm:$0xff]  }
  0xd3   : > { %3189 = vmatmul.mubr.bf16.gmra.mrb[4].mxu0 %v1521_v36  ;;  %3066 = vmatprep.subr.bf16.mxu1 %v3593_v5  ;;  %v1728_v36 = vsel %vm1516_vm5, %v1725_v48, %v1727_v13 }
  0xd4   : > { %3209 = vmatpush3.bf16.msra.mxu0 %v3538_v56  ;;  %3192 = vmatprep.mubr.msk.bf16.mxu0 %vm3594_vm0, %v3593_v5  ;;  %v3569_v56 = vld [vmem:[%s4395_s1 + $0x1f0] sm:$0xff]  }
  0xd5   : > { %3210 = vmatprep.subr.bf16.mxu0 %v3593_v5 }
  0xd6   : > { %3067 = vmatpush3.bf16.msra.mxu1 %v3541_v12  ;;  %v3570_v12 = vld [vmem:[#allocation2 + $0x30] ss:$0 sps:$4 sm:$0x33]  }
  0xd7   : > { %3068 = vmatprep.subr.bf16.mxu1 %v3593_v5  ;;  %v1729_v60 = vrot.slane %v3570_v12, 2  ;;  %v2107_v12 = vrot.slane %v4212_v6, 3 }
  0xd8   : > { %3049 = vmatmul.mubr.bf16.gmra.mrb[8].mxu1 %v3857_v18  ;;  %3211 = vmatpush3.bf16.msra.mxu0 %v3540_v3  ;;  %v3545_v18 = vld [vmem:[%s4395_s1 + $0x1a8] sm:$0xff]   ;;  %v3572_v3 = vld [vmem:[%s4395_s1 + $0x1f8] sm:$0xff]  }
  0xd9   : > { %3052 = vmatprep.mubr.msk.bf16.mxu1 %vm3594_vm0, %v3593_v5  ;;  %3212 = vmatprep.subr.bf16.mxu0 %v3593_v5 }
  0xda   : > { %3069 = vmatpush3.bf16.msra.mxu1 %v3543_v62  ;;  %v1898_v62 = vshrl.u32 %v4015_v17, 16 }
  0xdb   : > { %3193 = vmatmul.mubr.bf16.gmra.mrb[8].mxu0 %v1523_v47  ;;  %3070 = vmatprep.subr.bf16.mxu1 %v3593_v5  ;;  %v1890_v47 = vshrl.u32 %v4150_v39, 16 }
  0xdc   : > { %3213 = vmatpush3.bf16.msra.mxu0 %v3542_v0  ;;  %3196 = vmatprep.mubr.msk.bf16.mxu0 %vm3594_vm0, %v3593_v5  ;;  %v1901_v0 = vshll.u32 %v4015_v17, 16  ;;  %v1900_v2 = vrot.slane %v1898_v62, 2 }
  0xdd   : > { %3214 = vmatprep.subr.bf16.mxu0 %v3593_v5  ;;  %v1892_v17 = vrot.slane %v1890_v47, 2 }
  0xde   : > { %3071 = vmatpush3.bf16.msra.mxu1 %v3544_v1  ;;  %v1893_v1 = vshll.u32 %v4150_v39, 16 }
  0xdf   : > { %3072 = vmatprep.subr.bf16.mxu1 %v3593_v5 }
  0xe0   : > { %3053 = vmatmul.mubr.bf16.gmra.mrb[12].mxu1 %v3889_v52  ;;  %3215 = vmatpush3.bf16.msra.mxu0 %v3545_v18  ;;  %v3571_v52 = vld [vmem:[%s4395_s1 + $0xf8] sm:$0xff]   ;;  %v1730_v18 = vsel %vm1516_vm5, %v1727_v13, %v1729_v60 }
  0xe1   : > { %3056 = vmatprep.mubr.msk.bf16.mxu1 %vm3594_vm0, %v3593_v5  ;;  %3216 = vmatprep.subr.bf16.mxu0 %v3593_v5 }
  0xe2   : > { %3073 = vmatpush3.bf16.msra.mxu1 %v3546_v4  ;;  %v1903_v4 = vrot.slane %v1901_v0, 3 }
  0xe3   : > { %3197 = vmatmul.mubr.bf16.gmra.mrb[12].mxu0 %v1525_v10  ;;  %3074 = vmatprep.subr.bf16.mxu1 %v3593_v5  ;;  %v3573_v10 = vld [vmem:[%s4395_s1 + $0x200] sm:$0xff]  }
  0xe4   : > { %3217 = vmatpush3.bf16.msra.mxu0 %v3547_v7  ;;  %3200 = vmatprep.mubr.msk.bf16.mxu0 %vm3594_vm0, %v3593_v5  ;;  %v1895_v7 = vrot.slane %v1893_v1, 3 }
  0xe5   : > { %3218 = vmatprep.subr.bf16.mxu0 %v3593_v5 }
  0xe6   : > { %3075 = vmatpush3.bf16.msra.mxu1 %v3548_v57  ;;  %v1904_v57 = vor.u32 %v1903_v4, %v1900_v2  ;;  %v1896_v15 = vor.u32 %v1895_v7, %v1892_v17 }
  0xe7   : > { %3096 = vmatprep.subr.bf16.mxu1 %v3593_v5 }
  0xe8   : > { %3057 = vmatmul.mubr.bf16.gmra.mrb[16].mxu1 %v3924_v14  ;;  %3219 = vmatpush3.bf16.msra.mxu0 %v3549_v9  ;;  %v1907_v9 = vshrl.u32 %v4024_v22, 16  ;;  %v1905_v39 = vsel %vm1888_vm6, %v1896_v15, %v1904_v57 }
  0xe9   : > { %3076 = vmatprep.mubr.msk.bf16.mxu1 %vm3594_vm0, %v3593_v5  ;;  %3240 = vmatprep.subr.bf16.mxu0 %v3593_v5 }
  0xeb   : > { %3201 = vmatmul.mubr.bf16.gmra.mrb[16].mxu0 %v1527_v16  ;;  %v3574_v16 = vld [vmem:[%s4395_s1 + $0x208] sm:$0xff]  }
  0xec   : > { %3220 = vmatprep.mubr.msk.bf16.mxu0 %vm3594_vm0, %v3593_v5 }
  0xf0   : > { %3077 = vmatmul.mubr.bf16.vlgmr.msra.gmra.mrb[0].mxu1 %v3941_v25  ;;  %v3555_v25 = vld [vmem:[%s4395_s1 + $0x1c8] sm:$0xff]  }
  0xf1   : > { %3080 = vmatprep.mubr.msk.bf16.mxu1 %vm3594_vm0, %v3593_v5  ;;  %3097 = vmatpush3.bf16.msra.mxu1 %v3554_v23  ;;  %v1909_v23 = vrot.slane %v1907_v9, 2 }
  0xf2   : > { %3098 = vmatprep.subr.bf16.mxu1 %v3593_v5 }
  0xf3   : > { %3221 = vmatmul.mubr.bf16.vlgmr.msra.gmra.mrb[0].mxu0 %v1722_v31 }
  0xf4   : > { %3241 = vmatpush3.bf16.msra.mxu0 %v3553_v28  ;;  %3224 = vmatprep.mubr.msk.bf16.mxu0 %vm3594_vm0, %v3593_v5  ;;  %v1916_v28 = vshrl.u32 %v4187_v41, 16 }
  0xf5   : > { %3242 = vmatprep.subr.bf16.mxu0 %v3593_v5  ;;  %3099 = vmatpush3.bf16.msra.mxu1 %v3557_v21  ;;  %v1919_v21 = vshll.u32 %v4187_v41, 16 }
  0xf6   : > { %3100 = vmatprep.subr.bf16.mxu1 %v3593_v5  ;;  %v1918_v33 = vrot.slane %v1916_v28, 2 }
  0xf8   : > { %3081 = vmatmul.mubr.bf16.gmra.mrb[4].mxu1 %v3955_v32  ;;  %3243 = vmatpush3.bf16.msra.mxu0 %v3555_v25  ;;  %v3560_v32 = vld [vmem:[%s4395_s1 + $0x1d8] sm:$0xff]  }
  0xf9   : > { %3244 = vmatprep.subr.bf16.mxu0 %v3593_v5  ;;  %3084 = vmatprep.mubr.msk.bf16.mxu1 %vm3594_vm0, %v3593_v5  ;;  %v3576_v25 = vld [vmem:[%s4395_s1 + $0x218] sm:$0xff]  }
  0xfa   : > { %3101 = vmatpush3.bf16.msra.mxu1 %v3559_v34  ;;  %v1921_v34 = vrot.slane %v1919_v21, 3 }
  0xfb   : > { %3225 = vmatmul.mubr.bf16.gmra.mrb[4].mxu0 %v1724_v38  ;;  %3102 = vmatprep.subr.bf16.mxu1 %v3593_v5  ;;  %v1925_v38 = vshrl.u32 %v4212_v6, 16 }
  0xfc   : > { %3245 = vmatpush3.bf16.msra.mxu0 %v3558_v37  ;;  %3228 = vmatprep.mubr.msk.bf16.mxu0 %vm3594_vm0, %v3593_v5  ;;  %v3577_v37 = vld [vmem:[%s4395_s1 + $0x220] sm:$0xff]  }
  0xfd   : > { %3246 = vmatprep.subr.bf16.mxu0 %v3593_v5  ;;  %v1927_v48 = vrot.slane %v1925_v38, 2 }
  0xfe   : > { %3103 = vmatpush3.bf16.msra.mxu1 %v3562_v46  ;;  %v1928_v46 = vshll.u32 %v4212_v6, 16 }
  0xff   : > { %3104 = vmatprep.subr.bf16.mxu1 %v3593_v5 }
 0x100   : > { %3085 = vmatmul.mubr.bf16.gmra.mrb[8].mxu1 %v3966_v40  ;;  %3247 = vmatpush3.bf16.msra.mxu0 %v3560_v32  ;;  %v941_v40 = vrot.slane %v3924_v14, 1 }
 0x101   : > { %3088 = vmatprep.mubr.msk.bf16.mxu1 %vm3594_vm0, %v3593_v5  ;;  %3248 = vmatprep.subr.bf16.mxu0 %v3593_v5 }
 0x102   : > { %3105 = vmatpush3.bf16.msra.mxu1 %v3564_v50  ;;  %v942_v14 = vsel %vm933_vm3, %v939_v30, %v941_v40  ;;  %v943_v30 = vrot.slane %v3970_v43, 1  ;;  %v1930_v50 = vrot.slane %v1928_v46, 3 }
 0x103   : > { %3229 = vmatmul.mubr.bf16.gmra.mrb[8].mxu0 %v1726_v53  ;;  %3106 = vmatprep.subr.bf16.mxu1 %v3593_v5  ;;  %v3581_v53 = vld [vmem:[#allocation2 + $0x30] ss:$0 sps:$4 sm:$0x77]  }
 0x104   : > { %3249 = vmatpush3.bf16.msra.mxu0 %v3563_v51  ;;  %3232 = vmatprep.mubr.msk.bf16.mxu0 %vm3594_vm0, %v3593_v5  ;;  %v944_v43 = vsel %vm933_vm3, %v941_v40, %v943_v30  ;;  %v3578_v51 = vld [vmem:[%s4395_s1 + $0x228] sm:$0xff]   ;;  %v1934_v40 = vshrl.u32 %v3581_v53, 16 }
 0x105   : > { %3250 = vmatprep.subr.bf16.mxu0 %v3593_v5 }
 0x106   : > { %3107 = vmatpush3.bf16.msra.mxu1 %v3566_v54  ;;  %v3580_v54 = vld [vmem:[%s4395_s1 + $0x230] sm:$0xff]  }
 0x107   : > { %3108 = vmatprep.subr.bf16.mxu1 %v3593_v5 }
 0x108   : > { %3089 = vmatmul.mubr.bf16.gmra.mrb[12].mxu1 %v942_v14  ;;  %3251 = vmatpush3.bf16.msra.mxu0 %v3567_v49  ;;  %v1937_v49 = vshll.u32 %v3581_v53, 16 }
 0x109   : > { %3092 = vmatprep.mubr.msk.bf16.mxu1 %vm3594_vm0, %v3593_v5  ;;  %3252 = vmatprep.subr.bf16.mxu0 %v3593_v5 }
 0x10a   : > { %3109 = vmatpush3.bf16.msra.mxu1 %v3568_v55  ;;  %v1936_v55 = vrot.slane %v1934_v40, 2  ;;  %v1939_v14 = vrot.slane %v1937_v49, 3 }
 0x10b   : > { %3233 = vmatmul.mubr.bf16.gmra.mrb[12].mxu0 %v1728_v36  ;;  %3110 = vmatprep.subr.bf16.mxu1 %v3593_v5 }
 0x10c   : > { %3253 = vmatpush3.bf16.msra.mxu0 %v3569_v56  ;;  %3236 = vmatprep.mubr.msk.bf16.mxu0 %vm3594_vm0, %v3593_v5  ;;  %v3582_v56 = vld [vmem:[%s4395_s1 + $0x238] sm:$0xff]  }
 0x10d   : > { %3254 = vmatprep.subr.bf16.mxu0 %v3593_v5 }
 0x10e   : > { %3111 = vmatpush3.bf16.msra.mxu1 %v3571_v52  ;;  %v2105_v52 = vrot.slane %v4187_v41, 3 }
 0x10f   : > { %3312 = vmatprep.subr.bf16.mxu1 %v3593_v5 }
 0x110   : > { %3093 = vmatmul.mubr.bf16.gmra.mrb[16].mxu1 %v944_v43  ;;  %3255 = vmatpush3.bf16.msra.mxu0 %v3572_v3  ;;  %v2108_v30 = vsel %vm2099_vm4, %v2105_v52, %v2107_v12  ;;  %v2106_v41 = vsel %vm2099_vm4, %v2103_v35, %v2105_v52 }
 0x111   : > { %3112 = vmatprep.mubr.msk.bf16.mxu1 %vm3594_vm0, %v3593_v5  ;;  %3276 = vmatprep.subr.bf16.mxu0 %v3593_v5 }
 0x113   : > { %3237 = vmatmul.mubr.bf16.gmra.mrb[16].mxu0 %v1730_v18 }
 0x114   : > { %3256 = vmatprep.mubr.msk.bf16.mxu0 %vm3594_vm0, %v3593_v5 }
 0x118   : > { %3113 = vmatmul.mubr.bf16.vlgmr.msra.gmra.mrb[0].mxu1 %v3987_v59  ;;  %v1913_v59 = vor.u32 %v1912_v24, %v1909_v23 }
 0x119   : > { %3116 = vmatprep.mubr.msk.bf16.mxu1 %vm3594_vm0, %v3593_v5  ;;  %3320 = vmatpush3.bf16.msra.mxu1 %v3573_v10 }
 0x11a   : > { %3313 = vmatprep.subr.bf16.mxu1 %v3593_v5  ;;  %v1914_v31 = vsel %vm1888_vm6, %v1904_v57, %v1913_v59 }
 0x11b   : > { %3257 = vmatmul.mubr.bf16.vlgmr.msra.gmra.mrb[0].mxu0 %v1905_v39 }
 0x11c   : > { %3277 = vmatpush3.bf16.msra.mxu0 %v3573_v10  ;;  %3260 = vmatprep.mubr.msk.bf16.mxu0 %vm3594_vm0, %v3593_v5 }
 0x11d   : > { %3278 = vmatprep.subr.bf16.mxu0 %v3593_v5  ;;  %3321 = vmatpush3.bf16.msra.mxu1 %v3574_v16 }
 0x11e   : > { %3314 = vmatprep.subr.bf16.mxu1 %v3593_v5 }
 0x120   : > { %3117 = vmatmul.mubr.bf16.gmra.mrb[4].mxu1 %v3993_v61  ;;  %3279 = vmatpush3.bf16.msra.mxu0 %v3574_v16  ;;  %v1922_v61 = vor.u32 %v1921_v34, %v1918_v33 }
 0x121   : > { %3280 = vmatprep.subr.bf16.mxu0 %v3593_v5  ;;  %3120 = vmatprep.mubr.msk.bf16.mxu1 %vm3594_vm0, %v3593_v5 }
 0x122   : > { %3322 = vmatpush3.bf16.msra.mxu1 %v3575_v26  ;;  %v1923_v32 = vsel %vm1888_vm6, %v1913_v59, %v1922_v61 }
 0x123   : > { %3261 = vmatmul.mubr.bf16.gmra.mrb[4].mxu0 %v1914_v31  ;;  %3315 = vmatprep.subr.bf16.mxu1 %v3593_v5 }
 0x124   : > { %3281 = vmatpush3.bf16.msra.mxu0 %v3575_v26  ;;  %3264 = vmatprep.mubr.msk.bf16.mxu0 %vm3594_vm0, %v3593_v5 }
 0x125   : > { %3282 = vmatprep.subr.bf16.mxu0 %v3593_v5 }
 0x126   : > { %3323 = vmatpush3.bf16.msra.mxu1 %v3576_v25 }
 0x127   : > { %3316 = vmatprep.subr.bf16.mxu1 %v3593_v5 }
 0x128   : > { %3121 = vmatmul.mubr.bf16.gmra.mrb[8].mxu1 %v4008_v63  ;;  %3283 = vmatpush3.bf16.msra.mxu0 %v3576_v25  ;;  %v1931_v63 = vor.u32 %v1930_v50, %v1927_v48  ;;  %v2265_v48 = vpop.permute.xlu0 %2264 }
 0x129   : > { %3124 = vmatprep.mubr.msk.bf16.mxu1 %vm3594_vm0, %v3593_v5  ;;  %3284 = vmatprep.subr.bf16.mxu0 %v3593_v5 }
 0x12a   : > { %3324 = vmatpush3.bf16.msra.mxu1 %v3577_v37  ;;  %v1932_v13 = vsel %vm1888_vm6, %v1922_v61, %v1931_v63 }
 0x12b   : > { %3265 = vmatmul.mubr.bf16.gmra.mrb[8].mxu0 %v1923_v32  ;;  %3317 = vmatprep.subr.bf16.mxu1 %v3593_v5 }
 0x12c   : > { %3285 = vmatpush3.bf16.msra.mxu0 %v3577_v37  ;;  %3268 = vmatprep.mubr.msk.bf16.mxu0 %vm3594_vm0, %v3593_v5 }
 0x12d   : > { %3286 = vmatprep.subr.bf16.mxu0 %v3593_v5 }
 0x12e   : > { %3325 = vmatpush3.bf16.msra.mxu1 %v3578_v51 }
 0x12f   : > { %3318 = vmatprep.subr.bf16.mxu1 %v3593_v5 }
 0x130   : > { %3125 = vmatmul.mubr.bf16.gmra.mrb[12].mxu1 %v4018_v19  ;;  %3287 = vmatpush3.bf16.msra.mxu0 %v3578_v51  ;;  %v1940_v19 = vor.u32 %v1939_v14, %v1936_v55 }
 0x131   : > { %3128 = vmatprep.mubr.msk.bf16.mxu1 %vm3594_vm0, %v3593_v5  ;;  %3288 = vmatprep.subr.bf16.mxu0 %v3593_v5 }
 0x132   : > { %3326 = vmatpush3.bf16.msra.mxu1 %v3580_v54  ;;  %v1941_v36 = vsel %vm1888_vm6, %v1931_v63, %v1940_v19 }
 0x133   : > { %3269 = vmatmul.mubr.bf16.gmra.mrb[12].mxu0 %v1932_v13  ;;  %3319 = vmatprep.subr.bf16.mxu1 %v3593_v5 }
 0x134   : > { %3289 = vmatpush3.bf16.msra.mxu0 %v3580_v54  ;;  %3272 = vmatprep.mubr.msk.bf16.mxu0 %vm3594_vm0, %v3593_v5 }
 0x135   : > { %3290 = vmatprep.subr.bf16.mxu0 %v3593_v5 }
 0x136   : > { %3327 = vmatpush3.bf16.msra.mxu1 %v3582_v56 }
 0x138   : > { %3129 = vmatmul.mubr.bf16.gmra.mrb[16].mxu1 %v4028_v29  ;;  %3291 = vmatpush3.bf16.msra.mxu0 %v3582_v56  ;;  %v2109_v29 = vrot.slane %v3581_v53, 3 }
 0x139   : > { %3304 = vmatprep.mubr.msk.bf16.mxu1 %vm3594_vm0, %v3593_v5 }
 0x13a   : > { %v2110_v3 = vsel %vm2099_vm4, %v2107_v12, %v2109_v29 }
 0x13b   : > { %3273 = vmatmul.mubr.bf16.gmra.mrb[16].mxu0 %v1941_v36  ;;  %v2275_v36 = vpop.permute.xlu0 %2274 }
 0x13c   : > { %3292 = vmatprep.mubr.msk.bf16.mxu0 %vm3594_vm0, %v3593_v5 }
 0x140   : > { %3305 = vmatmul.mubr.bf16.vlgmr.msra.gmra.mrb[20].mxu1 %v2108_v30 }
 0x141   : > { %3308 = vmatprep.mubr.msk.bf16.mxu1 %vm3594_vm0, %v3593_v5 }
 0x143   : > { %3293 = vmatmul.mubr.bf16.vlgmr.msra.gmra.mrb[0].mxu0 %v4045_v45 }
 0x144   : > { %3296 = vmatprep.mubr.msk.bf16.mxu0 %vm3594_vm0, %v3593_v5 }
 0x148   : > { %3309 = vmatmul.mubr.bf16.gmra.mrb[24].mxu1 %v2110_v3 }
 0x14b   : > { %3297 = vmatmul.mubr.bf16.gmra.mrb[4].mxu0 %v4042_v42 }
 0x14c   : > { %3300 = vmatprep.mubr.msk.bf16.mxu0 %vm3594_vm0, %v3593_v5 }
 0x153   : > { %3301 = vmatmul.mubr.bf16.gmra.mrb[8].mxu0 %v2106_v41 }
 0x1eb   : > { %v1235_v6 = vpop.f32.mrb[0].mxu1 }
 0x1ec   : > { %v3114_v60 = vpop.f32.mrb[1].mxu1 }
 0x1ed   : > { %v1238_v45 = vpop.f32.mrb[2].mxu1 }
 0x1ee   : > { %v3115_v62 = vpop.f32.mrb[3].mxu1 }
 0x1f3   : > { %v1243_v0 = vpop.f32.mrb[4].mxu1 }
 0x1f4   : > { %v3118_v43 = vpop.f32.mrb[5].mxu1 }
 0x1f5   : > { %v4352_v47 = vpop.f32.mrb[6].mxu1 }
 0x1f6   : > { %v3119_v1 = vpop.f32.mrb[7].mxu1 }
 0x1fb   : > { %v4354_v18 = vpop.f32.mrb[8].mxu1 }
 0x1fc   : > { %v3122_v42 = vpop.f32.mrb[9].mxu1 }
 0x1fd   : > { %v4356_v2 = vpop.f32.mrb[10].mxu1 }
 0x1fe   : > { %v3123_v5 = vpop.f32.mrb[11].mxu1 }
 0x203   : > { %v1259_v4 = vpop.f32.mrb[12].mxu1 }
 0x204   : > { %v3126_v22 = vpop.f32.mrb[13].mxu1 }
 0x205   : > { %v1262_v17 = vpop.f32.mrb[14].mxu1 }
 0x206   : > { %v3127_v35 = vpop.f32.mrb[15].mxu1  ;;  %v2053_v7 = vpop.f32.mrb[12].mxu0 }
 0x207   : > { %v3334_v10 = vadd.f32 %v2053_v7, %v1259_v4  ;;  %v3270_v57 = vpop.f32.mrb[13].mxu0  ;;  %v2285_v7 = vpop.permute.xlu0 %2284 }
 0x208   : > { %v2056_v9 = vpop.f32.mrb[14].mxu0 }
 0x209   : > { %v3336_v11 = vadd.f32 %v2056_v9, %v1262_v17  ;;  %v3271_v15 = vpop.f32.mrb[15].mxu0 }
 0x20b   : > { %v1267_v16 = vpop.f32.mrb[16].mxu1 }
 0x20c   : > { %v3130_v39 = vpop.f32.mrb[17].mxu1 }
 0x20d   : > { %v1270_v23 = vpop.f32.mrb[18].mxu1 }
 0x20e   : > { %v3131_v24 = vpop.f32.mrb[19].mxu1  ;;  %v2061_v59 = vpop.f32.mrb[16].mxu0 }
 0x20f   : > { %v3338_v26 = vadd.f32 %v2061_v59, %v1267_v16  ;;  %v3274_v28 = vpop.f32.mrb[17].mxu0  ;;  %v2295_v24 = vpop.permute.xlu0 %2294 }
 0x210   : > { %v2064_v21 = vpop.f32.mrb[18].mxu0 }
 0x211   : > { %v3340_v31 = vadd.f32 %v2064_v21, %v1270_v23  ;;  %v3275_v25 = vpop.f32.mrb[19].mxu0 }
 0x213   : > { %v2222_v33 = vpop.f32.mrb[20].mxu1 }
 0x214   : > { %v4359_v34 = vadd.f32 %v3334_v10, %v2222_v33  ;;  %v3306_v61 = vpop.f32.mrb[21].mxu1 }
 0x215   : > { %v2225_v37 = vpop.f32.mrb[22].mxu1 }
 0x216   : > { %v4361_v38 = vadd.f32 %v3336_v11, %v2225_v37  ;;  %v3307_v46 = vpop.f32.mrb[23].mxu1  ;;  %v2198_v32 = vpop.f32.mrb[0].mxu0  ;;  %v2313_v59 = vmul.f32 %v4359_v34, %v3917_v8 }
 0x217   : > { %v3328_v50 = vadd.f32 %v2198_v32, %v1235_v6  ;;  %v3294_v51 = vpop.f32.mrb[1].mxu0  ;;  %v2305_v32 = vpop.permute.xlu0 %2304 }
 0x218   : > { %v2850_v53 = vpack.c.bf16 %v4361_v38, %v4359_v34  ;;  %v2201_v63 = vpop.f32.mrb[2].mxu0  ;;  %v2314_v25 = vmul.f32 %v4361_v38, %v2295_v24  ;;  %v2339_v37 = vmul.f32 %v4359_v34, %v2313_v59 }
 0x219   : > { %v2307_v54 = vmul.f32 %v3328_v50, %v3866_v27  ;;  %v3329_v40 = vadd.f32 %v2201_v63, %v1238_v45  ;;  %v3295_v49 = vpop.f32.mrb[3].mxu0 }
 0x21a   : > { %2869 = vst [vmem:[%s4366_s17 + $0x18] sm:$0xff] %v2850_v53  }
 0x21b   : > { %v2308_v13 = vmul.f32 %v3329_v40, %v2265_v48  ;;  %v2835_v55 = vpack.c.bf16 %v3329_v40, %v3328_v50  ;;  %v2230_v14 = vpop.f32.mrb[24].mxu1  ;;  %v2333_v12 = vmul.f32 %v3328_v50, %v2307_v54  ;;  %v2340_v48 = vmul.f32 %v4361_v38, %v2314_v25 }
 0x21c   : > { %v3339_v56 = vadd.f32 %v3338_v26, %v2230_v14  ;;  %v3310_v19 = vpop.f32.mrb[25].mxu1 }
 0x21d   : > { %v2317_v52 = vadd.f32 %v2308_v13, %v2307_v54  ;;  %v2334_v30 = vmul.f32 %v3329_v40, %v2308_v13  ;;  %2836 = vst [vmem:[%s4366_s17] sm:$0xff] %v2835_v55   ;;  %v2233_v29 = vpop.f32.mrb[26].mxu1 }
 0x21e   : > { %v3341_v3 = vadd.f32 %v3340_v31, %v2233_v29  ;;  %v3311_v41 = vpop.f32.mrb[27].mxu1  ;;  %v2206_v6 = vpop.f32.mrb[4].mxu0 }
 0x21f   : > { %v2343_v60 = vadd.f32 %v2334_v30, %v2333_v12  ;;  %v3330_v27 = vadd.f32 %v2206_v6, %v1243_v0  ;;  %v3298_v45 = vpop.f32.mrb[5].mxu0 }
 0x220   : > { %v2855_v62 = vpack.c.bf16 %v3341_v3, %v3339_v56  ;;  %v2209_v43 = vpop.f32.mrb[6].mxu0  ;;  %v2316_v8 = vmul.f32 %v3341_v3, %v2305_v32 }
 0x221   : > { %v2309_v1 = vmul.f32 %v3330_v27, %v3882_v44  ;;  %v3331_v42 = vadd.f32 %v2209_v43, %v4352_v47  ;;  %v3299_v5 = vpop.f32.mrb[7].mxu0 }
 0x222   : > { %2870 = vst [vmem:[%s4366_s17 + $0x20] sm:$0xff] %v2855_v62   ;;  %v2342_v40 = vmul.f32 %v3341_v3, %v2316_v8 }
 0x223   : > { %v2318_v4 = vadd.f32 %v2317_v52, %v2309_v1  ;;  %v2335_v22 = vmul.f32 %v3330_v27, %v2309_v1  ;;  %v2310_v17 = vmul.f32 %v3331_v42, %v2275_v36  ;;  %v2840_v35 = vpack.c.bf16 %v3331_v42, %v3330_v27 }
 0x225   : > { %v2344_v10 = vadd.f32 %v2343_v60, %v2335_v22  ;;  %v2319_v57 = vadd.f32 %v2318_v4, %v2310_v17  ;;  %v2336_v9 = vmul.f32 %v3331_v42, %v2310_v17  ;;  %2867 = vst [vmem:[%s4366_s17 + $0x8] sm:$0xff] %v2840_v35  }
 0x226   : > { %v2214_v0 = vpop.f32.mrb[8].mxu0 }
 0x227   : > { %v2345_v11 = vadd.f32 %v2344_v10, %v2336_v9  ;;  %v3332_v15 = vadd.f32 %v2214_v0, %v4354_v18  ;;  %v3302_v16 = vpop.f32.mrb[9].mxu0 }
 0x228   : > { %v2217_v44 = vpop.f32.mrb[10].mxu0 }
 0x229   : > { %v2311_v47 = vmul.f32 %v3332_v15, %v3898_v58  ;;  %v3333_v39 = vadd.f32 %v2217_v44, %v4356_v2  ;;  %v3303_v23 = vpop.f32.mrb[11].mxu0  ;;  %v2315_v58 = vmul.f32 %v3339_v56, %v3933_v20 }
 0x22b   : > { %v2320_v26 = vadd.f32 %v2319_v57, %v2311_v47  ;;  %v2337_v28 = vmul.f32 %v3332_v15, %v2311_v47  ;;  %v2312_v21 = vmul.f32 %v3333_v39, %v2285_v7  ;;  %v2845_v31 = vpack.c.bf16 %v3333_v39, %v3332_v15 }
 0x22c   : > { %v2341_v53 = vmul.f32 %v3339_v56, %v2315_v58 }
 0x22d   : > { %v2346_v33 = vadd.f32 %v2345_v11, %v2337_v28  ;;  %v2321_v18 = vadd.f32 %v2320_v26, %v2312_v21  ;;  %v2338_v61 = vmul.f32 %v3333_v39, %v2312_v21  ;;  %2868 = vst [vmem:[%s4366_s17 + $0x10] sm:$0xff] %v2845_v31  }
 0x22f   : > { %v2322_v2 = vadd.f32 %v2321_v18, %v2313_v59  ;;  %v2347_v46 = vadd.f32 %v2346_v33, %v2338_v61 }
 0x231   : > { %v2323_v50 = vadd.f32 %v2322_v2, %v2314_v25  ;;  %v2348_v51 = vadd.f32 %v2347_v46, %v2339_v37 }
 0x233   : > { %v2324_v63 = vadd.f32 %v2323_v50, %v2315_v58  ;;  %v2349_v54 = vadd.f32 %v2348_v51, %v2340_v48 }
 0x235   : > { %v2325_v49 = vadd.f32 %v2324_v63, %v2316_v8  ;;  %v2350_v13 = vadd.f32 %v2349_v54, %v2341_v53 }
 0x237   : > { %v2326_v55 = vrot.slane %v2325_v49, 4  ;;  %v2351_v14 = vadd.f32 %v2350_v13, %v2342_v40 }
 0x239   : > { %v2327_v34 = vadd.f32 %v2326_v55, %v2325_v49  ;;  %v2352_v19 = vrot.slane %v2351_v14, 4 }
 0x23b   : > { %v2328_v20 = vrot.slane %v2327_v34, 2  ;;  %v2353_v36 = vadd.f32 %v2352_v19, %v2351_v14 }
 0x23d   : > { %v2329_v12 = vadd.f32 %v2328_v20, %v2327_v34  ;;  %v2354_v52 = vrot.slane %v2353_v36, 2 }
 0x23f   : > { %v2330_v38 = vrot.slane %v2329_v12, 1  ;;  %v2355_v30 = vadd.f32 %v2354_v52, %v2353_v36 }
 0x241   : > { %v2331_v56 = vadd.f32 %v2330_v38, %v2329_v12  ;;  %v2356_v29 = vrot.slane %v2355_v30, 1 }
 0x243   : > { %2332 = vst [vmem:[%s289_s21] sm:$0x1] %v2331_v56  ;;  %v2357_v3 = vadd.f32 %v2356_v29, %v2355_v30 }
 0x245   : > { %2358 = vst [vmem:[%s289_s21 + $0x1] sm:$0x1] %v2357_v3 }
 0x246 PF: > { %s18_s24 = sadd.s32 1, %s3590_s24  }
 0x247   : > { %p15_p4 = scmp.ge.s32.totalorder %s18_s24, 4  }
 0x249   :  { %17 = sbr.rel (!%p15_p4) target bundleno = 1 (0x1), region = 94 }

</bundles_post_ra>
